<compile_context>
chip_gen: v5e
topology: v5e:2x2
jax: 0.10.0
libtpu: 0.0.40
codegen_flags: <defaults>
</compile_context>

<pallas_src>
import jax
import jax.numpy as jnp
from jax.experimental import pallas as pl
from jax.experimental.pallas import tpu as pltpu


def bpcnn_kernel(seq_ref, m_ref, b2_ref, o_ref):
    # seq_ref: (tb, H) int32  branch-history indices for this batch tile
    # m_ref  : (H, T)  f32    folded table  M[h, t] = sum_f tanh(w1+b1)[f,t] * w2[f*H+h]
    # b2_ref : (1, 1)  f32    linear bias (SMEM scalar)
    # o_ref  : (tb, 1) f32    sigmoid output for this tile
    tb, H = seq_ref.shape
    T = m_ref.shape[1]

    seq = seq_ref[...]                                              # (tb, H)
    lane_t = jax.lax.broadcasted_iota(jnp.int32, (1, H, T), 2)      # table idx on lanes
    # On-the-fly gather (no materialized one-hot in HBM):
    #   picked[b, h, t] = M[h, t]  iff  t == seq[b, h]  else 0
    picked = jnp.where(seq[:, :, None] == lane_t, m_ref[...][None, :, :], 0.0)
    s = jnp.sum(jnp.sum(picked, axis=2), axis=1, keepdims=True)     # (tb, 1)
    o_ref[...] = jax.nn.sigmoid(s + b2_ref[0, 0])


def bpcnn_forward(seq, c1_weight, c1_bias, l2_weight, l2_bias,
                  *, table_size, num_filters, history_len, batch_tile=8):
    B = seq.shape[0]
    T, F, H = table_size, num_filters, history_len

    # ---- parameter-only precompute (independent of `seq`, done once) ----
    w1 = c1_weight.reshape(F, T).astype(jnp.float32)                # 1x1 conv weight
    g = jnp.tanh(w1 + c1_bias.astype(jnp.float32)[:, None])         # (F, T)
    # PyTorch flattens (B, F, 1, H) -> (B, F*H): linear weight index k = f*H + h.
    w2 = l2_weight.reshape(F, H).astype(jnp.float32)                # (F, H)
    m = jnp.einsum("ft,fh->ht", g, w2)                              # (H, T) folded table
    b2 = l2_bias.reshape(1, 1).astype(jnp.float32)

    # ---- batch tiling: pad B to a multiple of the tile, 1-D grid over tiles ----
    # tb=8 keeps the (tb, H, T) in-kernel temp ~1.6 MB -> safe under the default
    # scoped-VMEM limit on every generation (v5e 16 MiB / v6e 32 MiB / v7x 32 MiB);
    # raise batch_tile on v5e/v6e to amortize per-grid-step overhead if desired.
    tb = batch_tile
    nb = pl.cdiv(B, tb)
    b_pad = nb * tb
    seq_i = seq.astype(jnp.int32)
    if b_pad != B:
        seq_i = jnp.pad(seq_i, ((0, b_pad - B), (0, 0)))

    out = pl.pallas_call(
        bpcnn_kernel,
        out_shape=jax.ShapeDtypeStruct((b_pad, 1), jnp.float32),
        grid=(nb,),
        in_specs=[
            pl.BlockSpec((tb, H), lambda i: (i, 0)),                # seq tile (pipelined)
            pl.BlockSpec((H, T), lambda i: (0, 0)),                 # folded table (pinned)
            pl.BlockSpec(memory_space=pltpu.MemorySpace.SMEM),      # bias scalar in SMEM
        ],
        out_specs=pl.BlockSpec((tb, 1), lambda i: (i, 0)),
        compiler_params=pltpu.CompilerParams(
            dimension_semantics=("parallel",)),                     # megacore on v7x
    )(seq_i, m, b2)
    return out[:B]


def bpcnn_reference(seq, c1_weight, c1_bias, l2_weight, l2_bias,
                    *, table_size, num_filters, history_len):
    # literal pure-JAX replica of the PyTorch forward, for correctness checking
    x = jax.nn.one_hot(seq, table_size, dtype=jnp.float32)          # (B, H, T)
    w1 = c1_weight.reshape(num_filters, table_size)                 # (F, T)
    h = jnp.einsum("bht,ft->bfh", x, w1) + c1_bias[None, :, None]   # (B, F, H)
    h = jnp.tanh(h)
    flat = h.reshape(seq.shape[0], num_filters * history_len)       # filter-major
    out = flat @ l2_weight.reshape(1, -1).T + l2_bias
    return jax.nn.sigmoid(out)


if __name__ == "__main__":
    table_size, num_filters, history_len = 256, 2, 200
    batch = 2

    key = jax.random.PRNGKey(0)
    k_seq, k_w1, k_b1, k_w2, k_b2 = jax.random.split(key, 5)

    # deterministic synthetic parameters (shapes match nn.Conv2d / nn.Linear)
    c1_weight = jax.random.normal(k_w1, (num_filters, table_size, 1, 1),
                                  dtype=jnp.float32) * 0.1
    c1_bias = jax.random.normal(k_b1, (num_filters,), dtype=jnp.float32) * 0.1
    l2_weight = jax.random.normal(k_w2, (1, history_len * num_filters),
                                  dtype=jnp.float32) * 0.05
    l2_bias = jax.random.normal(k_b2, (1,), dtype=jnp.float32) * 0.05

    # integer branch-history sequence, values in [0, tableSize)
    seq = jax.random.randint(k_seq, (batch, history_len), 0, table_size,
                             dtype=jnp.int32)

    out = bpcnn_forward(seq, c1_weight, c1_bias, l2_weight, l2_bias,
                        table_size=table_size, num_filters=num_filters,
                        history_len=history_len)
    out = jax.block_until_ready(out)

    ref = bpcnn_reference(seq, c1_weight, c1_bias, l2_weight, l2_bias,
                          table_size=table_size, num_filters=num_filters,
                          history_len=history_len)
    assert out.shape == (batch, 1)
    assert jnp.allclose(out, ref, rtol=1e-5, atol=1e-5), (out, ref)
    print("KERNEL_OK")
</pallas_src>

<mosaic_0001>
module attributes {stable_mosaic.version = 11 : i64} {
  func.func @bpcnn_kernel(%arg0: i32, %arg1: memref<8x200xi32, #tpu.memory_space<vmem>>, %arg2: memref<200x256xf32, #tpu.memory_space<vmem>>, %arg3: memref<1x1xf32, #tpu.memory_space<smem>>, %arg4: memref<8x1xf32, #tpu.memory_space<vmem>>) attributes {dimension_semantics = [#tpu.dimension_semantics<parallel>], iteration_bounds = array<i64: 1>, scalar_prefetch = 0 : i64, scratch_operands = 0 : i64, tpu.core_type = #tpu.core_type<tc>, window_params = [{transform_indices = @transform_0, window_bounds = array<i64: 8, 200>}, {pipeline_mode = #tpu.pipeline_mode<synchronous>, transform_indices = @transform_1, window_bounds = array<i64: 200, 256>}, {transform_indices = @transform_2, window_bounds = array<i64: 1, 1>}, {transform_indices = @transform_3, window_bounds = array<i64: 8, 1>}]} {
    %c0 = arith.constant 0 : index
    %c0_0 = arith.constant 0 : index
    %0 = vector.load %arg1[%c0, %c0_0] : memref<8x200xi32, #tpu.memory_space<vmem>>, vector<8x200xi32>
    %1 = tpu.iota {dimensions = array<i32: 2>} : vector<1x200x256xi32>
    %2 = vector.shape_cast %0 : vector<8x200xi32> to vector<8x200x1xi32>
    %3 = vector.broadcast %2 : vector<8x200x1xi32> to vector<8x200x256xi32>
    %4 = vector.broadcast %1 : vector<1x200x256xi32> to vector<8x200x256xi32>
    %5 = arith.cmpi eq, %3, %4 : vector<8x200x256xi32>
    %c0_1 = arith.constant 0 : index
    %c0_2 = arith.constant 0 : index
    %6 = vector.load %arg2[%c0_1, %c0_2] : memref<200x256xf32, #tpu.memory_space<vmem>>, vector<200x256xf32>
    %7 = vector.shape_cast %6 : vector<200x256xf32> to vector<1x200x256xf32>
    %cst = arith.constant 0.000000e+00 : f32
    %8 = vector.shape_cast %7 : vector<1x200x256xf32> to vector<1x200x256xf32>
    %9 = vector.broadcast %8 : vector<1x200x256xf32> to vector<8x200x256xf32>
    %10 = vector.broadcast %cst : f32 to vector<8x200x256xf32>
    %11 = arith.select %5, %9, %10 : vector<8x200x256xi1>, vector<8x200x256xf32>
    %cst_3 = arith.constant dense<0.000000e+00> : vector<8x200xf32>
    %12 = vector.multi_reduction <add>, %11, %cst_3 [2] : vector<8x200x256xf32> to vector<8x200xf32>
    %cst_4 = arith.constant dense<0.000000e+00> : vector<8xf32>
    %13 = vector.multi_reduction <add>, %12, %cst_4 [1] : vector<8x200xf32> to vector<8xf32>
    %14 = vector.shape_cast %13 : vector<8xf32> to vector<8x1xf32>
    %c0_5 = arith.constant 0 : index
    %c0_6 = arith.constant 0 : index
    %15 = memref.load %arg3[%c0_5, %c0_6] : memref<1x1xf32, #tpu.memory_space<smem>>
    %16 = vector.broadcast %15 : f32 to vector<8x1xf32>
    %17 = arith.addf %14, %16 : vector<8x1xf32>
    %18 = arith.negf %17 : vector<8x1xf32>
    %19 = math.exp %18 : vector<8x1xf32>
    %cst_7 = arith.constant 1.000000e+00 : f32
    %20 = vector.broadcast %cst_7 : f32 to vector<8x1xf32>
    %21 = arith.addf %20, %19 : vector<8x1xf32>
    %22 = arith.divf %20, %21 : vector<8x1xf32>
    %c0_8 = arith.constant 0 : index
    %c0_9 = arith.constant 0 : index
    %23 = vector.load %arg4[%c0_8, %c0_9] : memref<8x1xf32, #tpu.memory_space<vmem>>, vector<8x1xf32>
    tpu.vector_store %arg4[%c0_8, %c0_9], %22 {strides = array<i32>} : memref<8x1xf32, #tpu.memory_space<vmem>>, vector<8x1xf32>,
    return
  }
  func.func @transform_0(%arg0: i32) -> (i32, i32) {
    %c0_i32 = arith.constant 0 : i32
    %c0_i32_0 = arith.constant 0 : i32
    return %arg0, %c0_i32 : i32, i32
  }
  func.func @transform_1(%arg0: i32) -> (i32, i32) {
    %c0_i32 = arith.constant 0 : i32
    %c0_i32_0 = arith.constant 0 : i32
    %c0_i32_1 = arith.constant 0 : i32
    return %c0_i32, %c0_i32_0 : i32, i32
  }
  func.func @transform_2(%arg0: i32) -> (i32, i32) {
    %c0_i32 = arith.constant 0 : i32
    %c0_i32_0 = arith.constant 0 : i32
    %c0_i32_1 = arith.constant 0 : i32
    return %c0_i32, %c0_i32_0 : i32, i32
  }
  func.func @transform_3(%arg0: i32) -> (i32, i32) {
    %c0_i32 = arith.constant 0 : i32
    %c0_i32_0 = arith.constant 0 : i32
    return %arg0, %c0_i32 : i32, i32
  }
}

</mosaic_0001>

<bundles_post_ra>
// kernel: tpu_custom_call.1
= control target key start
LH: loop header
LB: loop body
LE: loop exit
PB: predicated region body
PF: predicated region fallthrough
CT: control target
= control target key end

     0   :  { %9 = vsyncpa [#allocation4], 0  ;;  %s6674_s0 = inlined_call_operand.hbm [shape: s32[8,200], index: 0, kind: input, shape index: {}]   ;;  %s6675_s1 = inlined_call_operand.hbm [shape: f32[200,256], index: 1, kind: input, shape index: {}]   ;;  %s6676_s2 = inlined_call_operand.<no memory space> [shape: f32[1,1], index: 2, kind: input, shape index: {}]   ;;  %s6677_s3 = inlined_call_operand.vmem [shape: f32[8,1], index: 3, kind: output, shape index: {}]  }
   0x1   :  { %s16_s14 = sshll.u32 %s6674_s0, 4  ;;  %s17_s14 = int_to_ptr.hbm [resolvable:$true] %s16_s14 }
   0x2   :  { %10 = vsyncpa [#allocation6], 0  ;;  %s3714_s15 = smov [#allocation3]   ;;  %s26_s19 = sshll.u32 %s6675_s1, 4  ;;  %s27_s19 = int_to_ptr.hbm [resolvable:$true] %s26_s19 }
   0x3   :  { %s18_s16 = sshll.u32 %s3714_s15, 4  ;;  %s3715_s20 = smov [#allocation5]   ;;  %s19_s16 = int_to_ptr.vmem [resolvable:$true] %s18_s16 }
   0x4   :  { %21 = dma.hbm_to_vmem [thread:$0]  %s17_s14, 256, %s19_s16, [#allocation4]  }
   0x5   :  { %s28_s21 = sshll.u32 %s3715_s20, 4  ;;  %s3716_s22 = smov 256   ;;  %s29_s21 = int_to_ptr.vmem [resolvable:$true] %s28_s21 }
   0x6   :  { %s3717_s23 = smov 16  }
   0x7   :  { %34 = dma.hbm_to_vmem [thread:$0]  %s27_s19, 6400, %s29_s21, [#allocation6], %s3716_s22, %s3716_s22, %s3717_s23  }
   0x8   :  { %3710 = dma.done.wait [#allocation4], 256  }
   0x9   :  { %3711 = vsyncadd [#allocation4], 4294967040 }
   0xa   :  { %3712 = dma.done.wait [#allocation6], 6400  }
   0xb   :  { %3713 = vsyncadd [#allocation6], 4294960896  ;;  %v47_v0 = vlaneseq  ;;  %v45_v4 = vld [vmem:[#allocation3] sm:$0xff]  ;;  %v3844_v25 = vld [vmem:[#allocation3 + $0x8] sm:$0xff] }
   0xc   :  { %v3756_v5 = vperm.slane %v45_v4, 0  ;;  %v3785_v11 = vperm.slane %v45_v4, 1  ;;  %v3790_v12 = vperm.slane %v45_v4, 2  ;;  %v3801_v15 = vperm.slane %v45_v4, 3 }
   0xd   :  { %v3745_v1 = vshrl.u32 %v47_v0, 7  ;;  %v3806_v16 = vperm.slane %v45_v4, 4  ;;  %v3817_v19 = vperm.slane %v45_v4, 5  ;;  %v3822_v20 = vperm.slane %v45_v4, 6 }
   0xe   :  { %v3833_v23 = vperm.slane %v45_v4, 7  ;;  %v3847_v26 = vperm.slane %v3844_v25, 0  ;;  %v299_v30 = vperm.slane %v3844_v25, 1  ;;  %v3914_v31 = vperm.slane %v3844_v25, 2 }
   0xf   :  { %3393 = vset.pattern.permute.xlu0 %v3745_v1  ;;  %v3749_v2 = vadd.s32 32, %v3745_v1  ;;  %v3752_v3 = vadd.s32 16, %v3745_v1  ;;  %v3762_v6 = vadd.s32 8, %v3745_v1  ;;  %v3765_v7 = vadd.s32 40, %v3745_v1  ;;  %6847 = vst [vmem:[#allocation9_spill] sm:$0xff] %v3822_v20 }
  0x10   :  { %v3768_v8 = vadd.s32 24, %v3745_v1  ;;  %v3777_v9 = vadd.s32 56, %v3745_v1  ;;  %v3780_v10 = vadd.s32 48, %v3745_v1  ;;  %v3793_v13 = vadd.s32 80, %v3745_v1  ;;  %6848 = vst [vmem:[#allocation10_spill] sm:$0xff] %v3833_v23 }
  0x11   :  { %3397 = vset.pattern.permute.xlu2 %v3749_v2  ;;  %3395 = vset.pattern.permute.xlu1 %v3752_v3  ;;  %v3796_v14 = vadd.s32 72, %v3745_v1  ;;  %v3809_v17 = vadd.s32 96, %v3745_v1  ;;  %v3812_v18 = vadd.s32 88, %v3745_v1  ;;  %v3825_v21 = vadd.s32 120, %v3745_v1 }
  0x12   :  { %v3828_v22 = vadd.s32 112, %v3745_v1  ;;  %v3839_v24 = vadd.s32 64, %v3745_v1  ;;  %v131_v27 = vadd.s32 104, %v3745_v1  ;;  %v3920_v33 = vperm.slane %v3844_v25, 3 }
  0x13   :  { %v3928_v35 = vperm.slane %v3844_v25, 4  ;;  %v3934_v37 = vperm.slane %v3844_v25, 5  ;;  %v3942_v39 = vperm.slane %v3844_v25, 6  ;;  %v3946_v40 = vperm.slane %v3844_v25, 7  ;;  %v4033_v25 = vld [vmem:[#allocation5 + $0x28] sm:$0xff] }
  0x14   :  { %v4022_v63 = vand.u32 127, %v47_v0 }
  0x15   :  { %6853 = vst [vmem:[#allocation15_spill] sm:$0xff] %v3934_v37 }
  0x16   :  { %6854 = vst [vmem:[#allocation16_spill] sm:$0xff] %v3942_v39 }
  0x17   :  { %55 = vperm.xlu0 %3393, %v3756_v5   ;;  %6855 = vst [vmem:[#allocation17_spill] sm:$0xff] %v3946_v40 }
  0x19   :  { %79 = vperm.xlu2 %3397, %v3756_v5   ;;  %67 = vperm.xlu1 %3395, %v3756_v5  }
  0x1f   :  { %3394 = vset.pattern.permute.xlu0 %v3762_v6 }
  0x21   :  { %3398 = vset.pattern.permute.xlu2 %v3765_v7  ;;  %3396 = vset.pattern.permute.xlu1 %v3768_v8 }
  0x27   :  { %61 = vperm.xlu0 %3394, %v3756_v5  }
  0x29   :  { %85 = vperm.xlu2 %3398, %v3756_v5   ;;  %73 = vperm.xlu1 %3396, %v3756_v5  }
  0x2f   :  { %3417 = vset.pattern.permute.xlu0 %v3768_v8 }
  0x31   :  { %3400 = vset.pattern.permute.xlu2 %v3777_v9  ;;  %3399 = vset.pattern.permute.xlu1 %v3780_v10 }
  0x37   :  { %225 = vperm.xlu0 %3417, %v3785_v11  }
  0x39   :  { %97 = vperm.xlu2 %3400, %v3756_v5   ;;  %91 = vperm.xlu1 %3399, %v3756_v5  }
  0x3f   :  { %377 = vperm.xlu0 %3417, %v3790_v12  }
  0x41   :  { %3402 = vset.pattern.permute.xlu2 %v3793_v13  ;;  %3401 = vset.pattern.permute.xlu1 %v3796_v14 }
  0x47   :  { %529 = vperm.xlu0 %3417, %v3801_v15  }
  0x49   :  { %115 = vperm.xlu2 %3402, %v3756_v5   ;;  %109 = vperm.xlu1 %3401, %v3756_v5  }
  0x4f   :  { %681 = vperm.xlu0 %3417, %v3806_v16  }
  0x51   :  { %3404 = vset.pattern.permute.xlu2 %v3809_v17  ;;  %3403 = vset.pattern.permute.xlu1 %v3812_v18 }
  0x57   :  { %833 = vperm.xlu0 %3417, %v3817_v19  }
  0x59   :  { %127 = vperm.xlu2 %3404, %v3756_v5   ;;  %121 = vperm.xlu1 %3403, %v3756_v5  }
  0x5f   :  { %985 = vperm.xlu0 %3417, %v3822_v20  }
  0x61   :  { %3406 = vset.pattern.permute.xlu2 %v3825_v21  ;;  %3405 = vset.pattern.permute.xlu1 %v3828_v22 }
  0x67   :  { %1137 = vperm.xlu0 %3417, %v3833_v23  }
  0x69   :  { %145 = vperm.xlu2 %3406, %v3756_v5   ;;  %139 = vperm.xlu1 %3405, %v3756_v5  }
  0x6f   :  { %3538 = vset.pattern.permute.xlu0 %v3839_v24 }
  0x71   :  { %3408 = vset.pattern.permute.xlu2 %v3762_v6  ;;  %3407 = vset.pattern.permute.xlu1 %v3745_v1 }
  0x73   :  { %v3984_v49 = vpop.permute.xlu2 %79 }
  0x74   :  { %6862 = vst [vmem:[#allocation24_spill] sm:$0xff] %v3984_v49  ;;  %v4117_v49 = vld [vmem:[#allocation5 + $0x168] sm:$0xff] }
  0x77   :  { %103 = vperm.xlu0 %3538, %v3756_v5  }
  0x79   :  { %158 = vperm.xlu2 %3408, %v3847_v26   ;;  %152 = vperm.xlu1 %3407, %v3847_v26  }
  0x7f   :  { %255 = vperm.xlu0 %3538, %v3785_v11  }
  0x81   :  { %3410 = vset.pattern.permute.xlu2 %v3749_v2  ;;  %3409 = vset.pattern.permute.xlu1 %v3768_v8 }
  0x83   :  { %v3993_v52 = vpop.permute.xlu2 %85 }
  0x84   :  { %6865 = vst [vmem:[#allocation27_spill] sm:$0xff] %v3993_v52 }
  0x87   :  { %407 = vperm.xlu0 %3538, %v3790_v12  }
  0x89   :  { %176 = vperm.xlu2 %3410, %v3847_v26   ;;  %170 = vperm.xlu1 %3409, %v3847_v26   ;;  %v3901_v28 = vpop.permute.xlu0 %55 }
  0x8a   :  { %6849 = vst [vmem:[#allocation11_spill] sm:$0xff] %v3901_v28 }
  0x8b   :  { %v68_v48 = vpop.permute.xlu1 %67 }
  0x8c   :  { %vm1270_vm0 = vcmp.eq.s32.totalorder %v68_v48, %v4022_v63 }
  0x8f   :  { %559 = vperm.xlu0 %3538, %v3801_v15  }
  0x91   :  { %3412 = vset.pattern.permute.xlu2 %v3780_v10  ;;  %3411 = vset.pattern.permute.xlu1 %v3765_v7 }
  0x93   :  { %v98_v54 = vpop.permute.xlu2 %97 }
  0x94   :  { %vm1280_vm2 = vcmp.eq.s32.totalorder %v98_v54, %v4022_v63 }
  0x97   :  { %711 = vperm.xlu0 %3538, %v3806_v16  }
  0x99   :  { %188 = vperm.xlu2 %3412, %v3847_v26   ;;  %182 = vperm.xlu1 %3411, %v3847_v26   ;;  %v3908_v29 = vpop.permute.xlu0 %61 }
  0x9a   :  { %6850 = vst [vmem:[#allocation12_spill] sm:$0xff] %v3908_v29 }
  0x9b   :  { %v3989_v50 = vpop.permute.xlu1 %73 }
  0x9c   :  { %6863 = vst [vmem:[#allocation25_spill] sm:$0xff] %v3989_v50  ;;  %v4129_v50 = vld [vmem:[#allocation5] sm:$0xff] }
  0x9f   :  { %863 = vperm.xlu0 %3538, %v3817_v19  }
  0xa1   :  { %3414 = vset.pattern.permute.xlu2 %v3745_v1  ;;  %3413 = vset.pattern.permute.xlu1 %v3839_v24 }
  0xa3   :  { %v116_v57 = vpop.permute.xlu2 %115 }
  0xa4   :  { %vm1286_vm4 = vcmp.eq.s32.totalorder %v116_v57, %v4022_v63 }
  0xa7   :  { %1015 = vperm.xlu0 %3538, %v3822_v20  }
  0xa9   :  { %207 = vperm.xlu2 %3414, %v3785_v11   ;;  %200 = vperm.xlu1 %3413, %v3847_v26   ;;  %v3916_v32 = vpop.permute.xlu0 %225 }
  0xab   :  { %v3998_v53 = vpop.permute.xlu1 %91 }
  0xac   :  { %6866 = vst [vmem:[#allocation28_spill] sm:$0xff] %v3998_v53  ;;  %v4099_v53 = vld [vmem:[#allocation5 + $0x130] sm:$0xff] }
  0xaf   :  { %1167 = vperm.xlu0 %3538, %v3833_v23  }
  0xb1   :  { %3416 = vset.pattern.permute.xlu2 %v3752_v3  ;;  %3415 = vset.pattern.permute.xlu1 %v3762_v6  ;;  %v3922_v34 = vpop.permute.xlu0 %377 }
  0xb2   :  { %6851 = vst [vmem:[#allocation13_spill] sm:$0xff] %v3922_v34 }
  0xb3   :  { %v4013_v60 = vpop.permute.xlu2 %127 }
  0xb4   :  { %6871 = vst [vmem:[#allocation33_spill] sm:$0xff] %v4013_v60 }
  0xb7   :  { %3543 = vset.pattern.permute.xlu0 %v131_v27 }
  0xb9   :  { %219 = vperm.xlu2 %3416, %v3785_v11   ;;  %213 = vperm.xlu1 %3415, %v3785_v11   ;;  %v3931_v36 = vpop.permute.xlu0 %529 }
  0xba   :  { %6852 = vst [vmem:[#allocation14_spill] sm:$0xff] %v3931_v36 }
  0xbb   :  { %v4005_v56 = vpop.permute.xlu1 %109 }
  0xbc   :  { %6868 = vst [vmem:[#allocation30_spill] sm:$0xff] %v4005_v56 }
  0xbf   :  { %133 = vperm.xlu0 %3543, %v3756_v5   ;;  %v4027_v5 = vadd.s32 128, %v4022_v63 }
  0xc1   :  { %3419 = vset.pattern.permute.xlu2 %v3765_v7  ;;  %3418 = vset.pattern.permute.xlu1 %v3749_v2  ;;  %v3939_v38 = vpop.permute.xlu0 %681  ;;  %vm1271_vm1 = vcmp.eq.s32.totalorder %v68_v48, %v4027_v5  ;;  %vm1281_vm3 = vcmp.eq.s32.totalorder %v98_v54, %v4027_v5  ;;  %vm1287_vm5 = vcmp.eq.s32.totalorder %v116_v57, %v4027_v5 }
  0xc3   :  { %v4024_v4 = vpop.permute.xlu2 %145 }
  0xc4   :  { %6874 = vst [vmem:[#allocation36_spill] sm:$0xff] %v4024_v4  ;;  %v4069_v4 = vld [vmem:[#allocation5 + $0xd0] sm:$0xff] }
  0xc7   :  { %285 = vperm.xlu0 %3543, %v3785_v11  }
  0xc9   :  { %237 = vperm.xlu2 %3419, %v3785_v11   ;;  %231 = vperm.xlu1 %3418, %v3785_v11   ;;  %v3948_v41 = vpop.permute.xlu0 %833 }
  0xca   :  { %6856 = vst [vmem:[#allocation18_spill] sm:$0xff] %v3948_v41  ;;  %v4045_v41 = vld [vmem:[#allocation5 + $0x78] sm:$0xff] }
  0xcb   :  { %v4011_v59 = vpop.permute.xlu1 %121 }
  0xcc   :  { %6870 = vst [vmem:[#allocation32_spill] sm:$0xff] %v4011_v59  ;;  %v4071_v59 = vld [vmem:[#allocation5 + $0xd8] sm:$0xff] }
  0xcf   :  { %437 = vperm.xlu0 %3543, %v3790_v12  }
  0xd1   :  { %3421 = vset.pattern.permute.xlu2 %v3777_v9  ;;  %3420 = vset.pattern.permute.xlu1 %v3780_v10  ;;  %v3953_v42 = vpop.permute.xlu0 %985 }
  0xd2   :  { %6857 = vst [vmem:[#allocation19_spill] sm:$0xff] %v3953_v42 }
  0xd3   :  { %v4037_v27 = vpop.permute.xlu2 %158 }
  0xd4   :  { %6875 = vst [vmem:[#allocation37_spill] sm:$0xff] %v4037_v27 }
  0xd7   :  { %589 = vperm.xlu0 %3543, %v3801_v15  }
  0xd9   :  { %249 = vperm.xlu2 %3421, %v3785_v11   ;;  %243 = vperm.xlu1 %3420, %v3785_v11   ;;  %v3958_v43 = vpop.permute.xlu0 %1137 }
  0xda   :  { %6858 = vst [vmem:[#allocation20_spill] sm:$0xff] %v3958_v43  ;;  %v1721_v43 = vsel %vm1271_vm1, %v4033_v25, 0.0  ;;  %vm1323_vm1 = vcmp.eq.s32.totalorder %v3916_v32, %v4027_v5 }
  0xdb   :  { %v4019_v62 = vpop.permute.xlu1 %139 }
  0xdc   :  { %6873 = vst [vmem:[#allocation35_spill] sm:$0xff] %v4019_v62  ;;  %v4057_v62 = vld [vmem:[#allocation5 + $0xa0] sm:$0xff] }
  0xdf   :  { %741 = vperm.xlu0 %3543, %v3806_v16  }
  0xe1   :  { %3423 = vset.pattern.permute.xlu2 %v3793_v13  ;;  %3422 = vset.pattern.permute.xlu1 %v3796_v14 }
  0xe3   :  { %v4049_v36 = vpop.permute.xlu2 %176 }
  0xe4   :  { %6876 = vst [vmem:[#allocation38_spill] sm:$0xff] %v4049_v36  ;;  %v1736_v36 = vsel %vm1286_vm4, %v4057_v62, 0.0 }
  0xe7   :  { %893 = vperm.xlu0 %3543, %v3817_v19  }
  0xe9   :  { %267 = vperm.xlu2 %3423, %v3785_v11   ;;  %261 = vperm.xlu1 %3422, %v3785_v11   ;;  %v3964_v44 = vpop.permute.xlu0 %103 }
  0xea   :  { %6859 = vst [vmem:[#allocation21_spill] sm:$0xff] %v3964_v44 }
  0xef   :  { %1045 = vperm.xlu0 %3543, %v3822_v20  }
  0xf1   :  { %3425 = vset.pattern.permute.xlu2 %v3809_v17  ;;  %3424 = vset.pattern.permute.xlu1 %v3812_v18  ;;  %v3969_v45 = vpop.permute.xlu0 %255 }
  0xf2   :  { %6860 = vst [vmem:[#allocation22_spill] sm:$0xff] %v3969_v45 }
  0xf7   :  { %1197 = vperm.xlu0 %3543, %v3833_v23  }
  0xf9   :  { %279 = vperm.xlu2 %3425, %v3785_v11   ;;  %273 = vperm.xlu1 %3424, %v3785_v11   ;;  %v3974_v46 = vpop.permute.xlu0 %407 }
  0xff   :  { %3548 = vset.pattern.permute.xlu0 %v3752_v3 }
 0x101   :  { %3427 = vset.pattern.permute.xlu2 %v3825_v21  ;;  %3426 = vset.pattern.permute.xlu1 %v3828_v22  ;;  %v3980_v47 = vpop.permute.xlu0 %559 }
 0x102   :  { %6861 = vst [vmem:[#allocation23_spill] sm:$0xff] %v3980_v47 }
 0x107   :  { %164 = vperm.xlu0 %3548, %v3847_v26  }
 0x109   :  { %297 = vperm.xlu2 %3427, %v3785_v11   ;;  %291 = vperm.xlu1 %3426, %v3785_v11   ;;  %v3991_v51 = vpop.permute.xlu0 %711  ;;  %v4031_v11 = vld [vmem:[#allocation5 + $0x20] sm:$0xff] }
 0x10a   :  { %6864 = vst [vmem:[#allocation26_spill] sm:$0xff] %v3991_v51 }
 0x10f   :  { %316 = vperm.xlu0 %3548, %v299_v30  }
 0x111   :  { %3429 = vset.pattern.permute.xlu2 %v3762_v6  ;;  %3428 = vset.pattern.permute.xlu1 %v3745_v1  ;;  %v4000_v55 = vpop.permute.xlu0 %863 }
 0x112   :  { %6867 = vst [vmem:[#allocation29_spill] sm:$0xff] %v4000_v55 }
 0x117   :  { %468 = vperm.xlu0 %3548, %v3914_v31  }
 0x119   :  { %310 = vperm.xlu2 %3429, %v299_v30   ;;  %304 = vperm.xlu1 %3428, %v299_v30   ;;  %v4007_v58 = vpop.permute.xlu0 %1015 }
 0x11a   :  { %6869 = vst [vmem:[#allocation31_spill] sm:$0xff] %v4007_v58 }
 0x11f   :  { %620 = vperm.xlu0 %3548, %v3920_v33  }
 0x121   :  { %3431 = vset.pattern.permute.xlu2 %v3749_v2  ;;  %3430 = vset.pattern.permute.xlu1 %v3768_v8  ;;  %v4015_v61 = vpop.permute.xlu0 %1167 }
 0x122   :  { %6872 = vst [vmem:[#allocation34_spill] sm:$0xff] %v4015_v61 }
 0x127   :  { %772 = vperm.xlu0 %3548, %v3928_v35  }
 0x129   :  { %328 = vperm.xlu2 %3431, %v299_v30   ;;  %322 = vperm.xlu1 %3430, %v299_v30  }
 0x12f   :  { %924 = vperm.xlu0 %3548, %v3934_v37  }
 0x131   :  { %3433 = vset.pattern.permute.xlu2 %v3780_v10  ;;  %3432 = vset.pattern.permute.xlu1 %v3765_v7  ;;  %v134_v0 = vpop.permute.xlu0 %133 }
 0x132   :  { %vm1292_vm6 = vcmp.eq.s32.totalorder %v134_v0, %v4022_v63  ;;  %vm1293_vm7 = vcmp.eq.s32.totalorder %v134_v0, %v4027_v5  ;;  %v4087_v0 = vld [vmem:[#allocation5 + $0x108] sm:$0xff] }
 0x137   :  { %1076 = vperm.xlu0 %3548, %v3942_v39  }
 0x139   :  { %340 = vperm.xlu2 %3433, %v299_v30   ;;  %334 = vperm.xlu1 %3432, %v299_v30   ;;  %v4051_v34 = vpop.permute.xlu0 %285 }
 0x13a   :  { %6877 = vst [vmem:[#allocation39_spill] sm:$0xff] %v4051_v34  ;;  %v189_v34 = vpop.permute.xlu2 %188 }
 0x13b   :  { %vm1310_vm12 = vcmp.eq.s32.totalorder %v189_v34, %v4022_v63  ;;  %vm1311_vm13 = vcmp.eq.s32.totalorder %v189_v34, %v4027_v5 }
 0x13f   :  { %1228 = vperm.xlu0 %3548, %v3946_v40  }
 0x141   :  { %3435 = vset.pattern.permute.xlu2 %v3745_v1  ;;  %3434 = vset.pattern.permute.xlu1 %v3839_v24 }
 0x147   :  { %3553 = vset.pattern.permute.xlu0 %v3777_v9 }
 0x149   :  { %359 = vperm.xlu2 %3435, %v3790_v12   ;;  %352 = vperm.xlu1 %3434, %v299_v30  }
 0x14f   :  { %194 = vperm.xlu0 %3553, %v3847_v26   ;;  %v153_v26 = vpop.permute.xlu1 %152 }
 0x150   :  { %vm1298_vm8 = vcmp.eq.s32.totalorder %v153_v26, %v4022_v63  ;;  %vm1299_vm9 = vcmp.eq.s32.totalorder %v153_v26, %v4027_v5 }
 0x151   :  { %3437 = vset.pattern.permute.xlu2 %v3752_v3  ;;  %3436 = vset.pattern.permute.xlu1 %v3762_v6 }
 0x157   :  { %346 = vperm.xlu0 %3553, %v299_v30   ;;  %v1720_v30 = vsel %vm1270_vm0, %v4031_v11, 0.0  ;;  %v171_v48 = vpop.permute.xlu1 %170  ;;  %vm1322_vm0 = vcmp.eq.s32.totalorder %v3916_v32, %v4022_v63  ;;  %v4163_v32 = vld [vmem:[#allocation5 + $0x60] sm:$0xff] }
 0x158   :  { %v2122_v42 = vadd.f32 %v1721_v43, %v1720_v30  ;;  %v1731_v30 = vsel %vm1281_vm3, %v4045_v41, 0.0  ;;  %vm1304_vm10 = vcmp.eq.s32.totalorder %v171_v48, %v4022_v63  ;;  %vm1305_vm11 = vcmp.eq.s32.totalorder %v171_v48, %v4027_v5 }
 0x159   :  { %371 = vperm.xlu2 %3437, %v3790_v12   ;;  %365 = vperm.xlu1 %3436, %v3790_v12  }
 0x15f   :  { %498 = vperm.xlu0 %3553, %v3914_v31   ;;  %v4063_v54 = vpop.permute.xlu1 %182 }
 0x160   :  { %6878 = vst [vmem:[#allocation40_spill] sm:$0xff] %v4063_v54  ;;  %v208_v54 = vpop.permute.xlu2 %207 }
 0x161   :  { %3439 = vset.pattern.permute.xlu2 %v3765_v7  ;;  %3438 = vset.pattern.permute.xlu1 %v3749_v2  ;;  %vm1316_vm14 = vcmp.eq.s32.totalorder %v208_v54, %v4022_v63  ;;  %vm1317_vm15 = vcmp.eq.s32.totalorder %v208_v54, %v4027_v5  ;;  %v4147_v54 = vld [vmem:[#allocation5 + $0x30] sm:$0xff] }
 0x162   :  { %v1772_v28 = vsel %vm1322_vm0, %v4147_v54, 0.0 }
 0x167   :  { %650 = vperm.xlu0 %3553, %v3920_v33   ;;  %v4077_v57 = vpop.permute.xlu1 %200 }
 0x168   :  { %6880 = vst [vmem:[#allocation42_spill] sm:$0xff] %v4077_v57 }
 0x169   :  { %389 = vperm.xlu2 %3439, %v3790_v12   ;;  %383 = vperm.xlu1 %3438, %v3790_v12  }
 0x16f   :  { %802 = vperm.xlu0 %3553, %v3928_v35  }
 0x171   :  { %3441 = vset.pattern.permute.xlu2 %v3777_v9  ;;  %3440 = vset.pattern.permute.xlu1 %v3780_v10 }
 0x177   :  { %954 = vperm.xlu0 %3553, %v3934_v37  }
 0x179   :  { %401 = vperm.xlu2 %3441, %v3790_v12   ;;  %395 = vperm.xlu1 %3440, %v3790_v12  }
 0x17f   :  { %1106 = vperm.xlu0 %3553, %v3942_v39   ;;  %v4215_v39 = vld [vmem:[#allocation5 + $0x128] sm:$0xff] }
 0x181   :  { %3443 = vset.pattern.permute.xlu2 %v3793_v13  ;;  %3442 = vset.pattern.permute.xlu1 %v3796_v14 }
 0x187   :  { %1258 = vperm.xlu0 %3553, %v3946_v40  }
 0x189   :  { %419 = vperm.xlu2 %3443, %v3790_v12   ;;  %413 = vperm.xlu1 %3442, %v3790_v12  }
 0x18f   :  { %3559 = vset.pattern.permute.xlu0 %v3839_v24 }
 0x191   :  { %3445 = vset.pattern.permute.xlu2 %v3809_v17  ;;  %3444 = vset.pattern.permute.xlu1 %v3812_v18 }
 0x199   :  { %431 = vperm.xlu2 %3445, %v3790_v12   ;;  %425 = vperm.xlu1 %3444, %v3790_v12  }
 0x1a1   :  { %3447 = vset.pattern.permute.xlu2 %v3825_v21  ;;  %3446 = vset.pattern.permute.xlu1 %v3828_v22 }
 0x1a9   :  { %449 = vperm.xlu2 %3447, %v3790_v12   ;;  %443 = vperm.xlu1 %3446, %v3790_v12   ;;  %v4043_v12 = vld [vmem:[#allocation5 + $0x70] sm:$0xff] }
 0x1aa   :  { %v1730_v43 = vsel %vm1280_vm2, %v4043_v12, 0.0 }
 0x1ab   :  { %v2137_v27 = vadd.f32 %v1731_v30, %v1730_v43  ;;  %v4067_v30 = vpop.permute.xlu0 %437 }
 0x1ac   :  { %6879 = vst [vmem:[#allocation41_spill] sm:$0xff] %v4067_v30  ;;  %v1743_v30 = vsel %vm1293_vm7, %v4071_v59, 0.0 }
 0x1b1   :  { %3449 = vset.pattern.permute.xlu2 %v3762_v6  ;;  %3448 = vset.pattern.permute.xlu1 %v3745_v1 }
 0x1b2   :  { %2123 = vadd.xlane.f32.xlu0 %v2122_v42  ;;  %v4059_v42 = vld [vmem:[#allocation5 + $0xa8] sm:$0xff] }
 0x1b3   :  { %v1737_v43 = vsel %vm1287_vm5, %v4059_v42, 0.0  ;;  %v4081_v52 = vpop.permute.xlu0 %589 }
 0x1b4   :  { %v2146_v60 = vadd.f32 %v1737_v43, %v1736_v36  ;;  %v4085_v36 = vld [vmem:[#allocation5 + $0x100] sm:$0xff]  ;;  %v4093_v43 = vpop.permute.xlu2 %219 }
 0x1b5   :  { %6882 = vst [vmem:[#allocation44_spill] sm:$0xff] %v4093_v43 }
 0x1b9   :  { %462 = vperm.xlu2 %3449, %v3914_v31   ;;  %456 = vperm.xlu1 %3448, %v3914_v31  }
 0x1ba   :  { %2138 = vadd.xlane.f32.xlu0 %v2137_v27  ;;  %v1742_v27 = vsel %vm1292_vm6, %v4069_v4, 0.0 }
 0x1bb   :  { %v2155_v56 = vadd.f32 %v1743_v30, %v1742_v27  ;;  %v1748_v30 = vsel %vm1298_vm8, %v4085_v36, 0.0  ;;  %v1749_v27 = vsel %vm1299_vm9, %v4087_v0, 0.0 }
 0x1bc   :  { %v2164_v57 = vadd.f32 %v1749_v27, %v1748_v30  ;;  %v4109_v43 = vpop.permute.xlu2 %237  ;;  %v1754_v30 = vsel %vm1304_vm10, %v4099_v53, 0.0 }
 0x1bd   :  { %6885 = vst [vmem:[#allocation47_spill] sm:$0xff] %v4109_v43 }
 0x1c1   :  { %3451 = vset.pattern.permute.xlu2 %v3749_v2  ;;  %3450 = vset.pattern.permute.xlu1 %v3768_v8 }
 0x1c2   :  { %2147 = vadd.xlane.f32.xlu0 %v2146_v60  ;;  %v4091_v60 = vpop.permute.xlu1 %213 }
 0x1c3   :  { %6881 = vst [vmem:[#allocation43_spill] sm:$0xff] %v4091_v60  ;;  %v4107_v60 = vpop.permute.xlu0 %741 }
 0x1c4   :  { %6884 = vst [vmem:[#allocation46_spill] sm:$0xff] %v4107_v60  ;;  %v4121_v60 = vpop.permute.xlu2 %249 }
 0x1c5   :  { %6886 = vst [vmem:[#allocation48_spill] sm:$0xff] %v4121_v60  ;;  %v1766_v60 = vsel %vm1316_vm14, %v4129_v50, 0.0 }
 0x1c9   :  { %480 = vperm.xlu2 %3451, %v3914_v31   ;;  %474 = vperm.xlu1 %3450, %v3914_v31  }
 0x1ca   :  { %2156 = vadd.xlane.f32.xlu0 %v2155_v56  ;;  %v4101_v56 = vld [vmem:[#allocation5 + $0x138] sm:$0xff]  ;;  %v4105_v26 = vpop.permute.xlu1 %231 }
 0x1cb   :  { %6883 = vst [vmem:[#allocation45_spill] sm:$0xff] %v4105_v26  ;;  %v1755_v27 = vsel %vm1305_vm11, %v4101_v56, 0.0  ;;  %v4123_v26 = vpop.permute.xlu0 %893 }
 0x1cc   :  { %v2173_v29 = vadd.f32 %v1755_v27, %v1754_v30  ;;  %6887 = vst [vmem:[#allocation49_spill] sm:$0xff] %v4123_v26  ;;  %v1761_v27 = vsel %vm1311_vm13, %v4117_v49, 0.0  ;;  %v4135_v26 = vpop.permute.xlu2 %267 }
 0x1cd   :  { %6888 = vst [vmem:[#allocation50_spill] sm:$0xff] %v4135_v26  ;;  %v4149_v26 = vld [vmem:[#allocation5 + $0x38] sm:$0xff] }
 0x1d1   :  { %3453 = vset.pattern.permute.xlu2 %v3780_v10  ;;  %3452 = vset.pattern.permute.xlu1 %v3765_v7 }
 0x1d2   :  { %2165 = vadd.xlane.f32.xlu0 %v2164_v57  ;;  %v4115_v57 = vld [vmem:[#allocation5 + $0x160] sm:$0xff]  ;;  %v244_v48 = vpop.permute.xlu1 %243 }
 0x1d3   :  { %v1760_v30 = vsel %vm1310_vm12, %v4115_v57, 0.0  ;;  %vm1328_vm2 = vcmp.eq.s32.totalorder %v244_v48, %v4022_v63  ;;  %vm1329_vm3 = vcmp.eq.s32.totalorder %v244_v48, %v4027_v5 }
 0x1d4   :  { %v2182_v43 = vadd.f32 %v1761_v27, %v1760_v30  ;;  %v4139_v27 = vpop.permute.xlu0 %1045  ;;  %v280_v23 = vpop.permute.xlu2 %279 }
 0x1d5   :  { %6889 = vst [vmem:[#allocation51_spill] sm:$0xff] %v4139_v27  ;;  %v1773_v27 = vsel %vm1323_vm1, %v4149_v26, 0.0  ;;  %vm1340_vm6 = vcmp.eq.s32.totalorder %v280_v23, %v4022_v63  ;;  %vm1341_vm7 = vcmp.eq.s32.totalorder %v280_v23, %v4027_v5 }
 0x1d6   :  { %v2200_v61 = vadd.f32 %v1773_v27, %v1772_v28 }
 0x1d9   :  { %492 = vperm.xlu2 %3453, %v3914_v31   ;;  %486 = vperm.xlu1 %3452, %v3914_v31  }
 0x1da   :  { %2174 = vadd.xlane.f32.xlu0 %v2173_v29  ;;  %v4131_v29 = vld [vmem:[#allocation5 + $0x8] sm:$0xff]  ;;  %v262_v34 = vpop.permute.xlu1 %261 }
 0x1db   :  { %v1767_v30 = vsel %vm1317_vm15, %v4131_v29, 0.0  ;;  %vm1334_vm4 = vcmp.eq.s32.totalorder %v262_v34, %v4022_v63  ;;  %vm1335_vm5 = vcmp.eq.s32.totalorder %v262_v34, %v4027_v5 }
 0x1dc   :  { %v4155_v58 = vpop.permute.xlu0 %1197  ;;  %v298_v27 = vpop.permute.xlu2 %297 }
 0x1dd   :  { %6891 = vst [vmem:[#allocation53_spill] sm:$0xff] %v4155_v58  ;;  %v4177_v58 = vld [vmem:[#allocation5 + $0x90] sm:$0xff]  ;;  %vm1346_vm8 = vcmp.eq.s32.totalorder %v298_v27, %v4022_v63  ;;  %vm1347_vm9 = vcmp.eq.s32.totalorder %v298_v27, %v4027_v5 }
 0x1e1   :  { %3455 = vset.pattern.permute.xlu2 %v3745_v1  ;;  %3454 = vset.pattern.permute.xlu1 %v3839_v24 }
 0x1e2   :  { %2183 = vadd.xlane.f32.xlu0 %v2182_v43  ;;  %v2191_v43 = vadd.f32 %v1767_v30, %v1766_v60  ;;  %v4153_v40 = vpop.permute.xlu1 %273  ;;  %v4165_v60 = vld [vmem:[#allocation5 + $0x68] sm:$0xff]  ;;  %v1778_v30 = vsel %vm1328_vm2, %v4163_v32, 0.0 }
 0x1e3   :  { %6890 = vst [vmem:[#allocation52_spill] sm:$0xff] %v4153_v40  ;;  %v1779_v28 = vsel %vm1329_vm3, %v4165_v60, 0.0  ;;  %v1784_v40 = vsel %vm1334_vm4, %v4177_v58, 0.0  ;;  %vm1382_vm4 = vcmp.eq.s32.totalorder %v3974_v46, %v4022_v63 }
 0x1e4   :  { %v4175_v48 = vpop.permute.xlu0 %164 }
 0x1e5   :  { %6894 = vst [vmem:[#allocation56_spill] sm:$0xff] %v4175_v48 }
 0x1e9   :  { %511 = vperm.xlu2 %3455, %v3801_v15   ;;  %504 = vperm.xlu1 %3454, %v3914_v31  }
 0x1ea   :  { %2192 = vadd.xlane.f32.xlu0 %v2191_v43  ;;  %v4161_v31 = vpop.permute.xlu1 %291  ;;  %v2209_v43 = vadd.f32 %v1779_v28, %v1778_v30  ;;  %v4183_v28 = vpop.permute.xlu2 %310 }
 0x1eb   :  { %6892 = vst [vmem:[#allocation54_spill] sm:$0xff] %v4161_v31  ;;  %v4179_v31 = vld [vmem:[#allocation5 + $0x98] sm:$0xff] }
 0x1ec   :  { %v1785_v30 = vsel %vm1335_vm5, %v4179_v31, 0.0  ;;  %6895 = vst [vmem:[#allocation57_spill] sm:$0xff] %v4183_v28  ;;  %vm1383_vm5 = vcmp.eq.s32.totalorder %v3974_v46, %v4027_v5 }
 0x1ed   :  { %v2218_v51 = vadd.f32 %v1785_v30, %v1784_v40  ;;  %v317_v30 = vpop.permute.xlu0 %316 }
 0x1ee   :  { %vm1352_vm10 = vcmp.eq.s32.totalorder %v317_v30, %v4022_v63  ;;  %vm1353_vm11 = vcmp.eq.s32.totalorder %v317_v30, %v4027_v5  ;;  %v4235_v30 = vld [vmem:[#allocation5 + $0x158] sm:$0xff] }
 0x1ef   :  { %6904 = vst [vmem:[#allocation66_spill] sm:$0xff] %v4235_v30 }
 0x1f1   :  { %3457 = vset.pattern.permute.xlu2 %v3752_v3  ;;  %3456 = vset.pattern.permute.xlu1 %v3762_v6 }
 0x1f2   :  { %2201 = vadd.xlane.f32.xlu0 %v2200_v61  ;;  %v4173_v61 = vpop.permute.xlu1 %304  ;;  %v4197_v40 = vpop.permute.xlu2 %328 }
 0x1f3   :  { %6893 = vst [vmem:[#allocation55_spill] sm:$0xff] %v4173_v61  ;;  %v4193_v61 = vld [vmem:[#allocation5 + $0xc8] sm:$0xff] }
 0x1f4   :  { %v1791_v28 = vsel %vm1341_vm7, %v4193_v61, 0.0  ;;  %6897 = vst [vmem:[#allocation59_spill] sm:$0xff] %v4197_v40 }
 0x1f9   :  { %523 = vperm.xlu2 %3457, %v3801_v15   ;;  %517 = vperm.xlu1 %3456, %v3801_v15  }
 0x1fa   :  { %2210 = vadd.xlane.f32.xlu0 %v2209_v43  ;;  %v4189_v34 = vpop.permute.xlu1 %322  ;;  %v4191_v43 = vld [vmem:[#allocation5 + $0xc0] sm:$0xff]  ;;  %v4209_v44 = vpop.permute.xlu2 %340 }
 0x1fb   :  { %6896 = vst [vmem:[#allocation58_spill] sm:$0xff] %v4189_v34  ;;  %v1790_v48 = vsel %vm1340_vm6, %v4191_v43, 0.0  ;;  %v4205_v34 = vld [vmem:[#allocation5 + $0xf8] sm:$0xff] }
 0x1fc   :  { %v2227_v47 = vadd.f32 %v1791_v28, %v1790_v48  ;;  %v1797_v40 = vsel %vm1347_vm9, %v4205_v34, 0.0  ;;  %6898 = vst [vmem:[#allocation60_spill] sm:$0xff] %v4209_v44  ;;  %v4211_v48 = vpop.permute.xlu0 %468  ;;  %v4213_v28 = vld [vmem:[#allocation5 + $0x120] sm:$0xff]  ;;  %v1803_v44 = vsel %vm1353_vm11, %v4215_v39, 0.0 }
 0x1fd   :  { %6899 = vst [vmem:[#allocation61_spill] sm:$0xff] %v4211_v48  ;;  %v1802_v27 = vsel %vm1352_vm10, %v4213_v28, 0.0 }
 0x1fe   :  { %v2245_v55 = vadd.f32 %v1803_v44, %v1802_v27 }
 0x201   :  { %3459 = vset.pattern.permute.xlu2 %v3765_v7  ;;  %3458 = vset.pattern.permute.xlu1 %v3749_v2 }
 0x202   :  { %2219 = vadd.xlane.f32.xlu0 %v2218_v51  ;;  %v335_v23 = vpop.permute.xlu1 %334  ;;  %v4203_v51 = vld [vmem:[#allocation5 + $0xf0] sm:$0xff]  ;;  %v4223_v48 = vpop.permute.xlu2 %359 }
 0x203   :  { %v1796_v45 = vsel %vm1346_vm8, %v4203_v51, 0.0  ;;  %6900 = vst [vmem:[#allocation62_spill] sm:$0xff] %v4223_v48  ;;  %vm1358_vm12 = vcmp.eq.s32.totalorder %v335_v23, %v4022_v63  ;;  %vm1359_vm13 = vcmp.eq.s32.totalorder %v335_v23, %v4027_v5 }
 0x204   :  { %v4225_v37 = vpop.permute.xlu0 %620  ;;  %v1809_v44 = vsel %vm1359_vm13, %v4235_v30, 0.0 }
 0x205   :  { %6901 = vst [vmem:[#allocation63_spill] sm:$0xff] %v4225_v37  ;;  %v4249_v37 = vld [vmem:[#allocation5 + $0x188] sm:$0xff] }
 0x206   :  { %6907 = vst [vmem:[#allocation69_spill] sm:$0xff] %v4249_v37 }
 0x209   :  { %541 = vperm.xlu2 %3459, %v3801_v15   ;;  %535 = vperm.xlu1 %3458, %v3801_v15  }
 0x20a   :  { %2228 = vadd.xlane.f32.xlu0 %v2227_v47  ;;  %v2236_v47 = vadd.f32 %v1797_v40, %v1796_v45  ;;  %v353_v20 = vpop.permute.xlu1 %352  ;;  %v4233_v40 = vld [vmem:[#allocation5 + $0x150] sm:$0xff]  ;;  %v372_v27 = vpop.permute.xlu2 %371 }
 0x20b   :  { %6903 = vst [vmem:[#allocation65_spill] sm:$0xff] %v4233_v40  ;;  %vm1364_vm14 = vcmp.eq.s32.totalorder %v353_v20, %v4022_v63  ;;  %vm1365_vm15 = vcmp.eq.s32.totalorder %v353_v20, %v4027_v5  ;;  %vm1370_vm0 = vcmp.eq.s32.totalorder %v372_v27, %v4022_v63  ;;  %vm1371_vm1 = vcmp.eq.s32.totalorder %v372_v27, %v4027_v5  ;;  %v4271_v27 = vld [vmem:[#allocation5 + $0x50] sm:$0xff] }
 0x211   :  { %3461 = vset.pattern.permute.xlu2 %v3777_v9  ;;  %3460 = vset.pattern.permute.xlu1 %v3780_v10 }
 0x212   :  { %2237 = vadd.xlane.f32.xlu0 %v2236_v47  ;;  %v4231_v45 = vpop.permute.xlu1 %365  ;;  %v1808_v47 = vsel %vm1358_vm12, %v4233_v40, 0.0 }
 0x213   :  { %6902 = vst [vmem:[#allocation64_spill] sm:$0xff] %v4231_v45  ;;  %v2254_v48 = vadd.f32 %v1809_v44, %v1808_v47  ;;  %v4247_v45 = vld [vmem:[#allocation5 + $0x180] sm:$0xff]  ;;  %v1815_v47 = vsel %vm1365_vm15, %v4249_v37, 0.0  ;;  %v390_v44 = vpop.permute.xlu2 %389 }
 0x214   :  { %6906 = vst [vmem:[#allocation68_spill] sm:$0xff] %v4247_v45  ;;  %v1814_v30 = vsel %vm1364_vm14, %v4247_v45, 0.0  ;;  %vm1376_vm2 = vcmp.eq.s32.totalorder %v390_v44, %v4022_v63  ;;  %vm1377_vm3 = vcmp.eq.s32.totalorder %v390_v44, %v4027_v5 }
 0x215   :  { %v2263_v40 = vadd.f32 %v1815_v47, %v1814_v30 }
 0x219   :  { %553 = vperm.xlu2 %3461, %v3801_v15   ;;  %547 = vperm.xlu1 %3460, %v3801_v15  }
 0x21a   :  { %2246 = vadd.xlane.f32.xlu0 %v2245_v55  ;;  %v4243_v55 = vpop.permute.xlu0 %772  ;;  %v4245_v23 = vpop.permute.xlu1 %383 }
 0x21b   :  { %6905 = vst [vmem:[#allocation67_spill] sm:$0xff] %v4245_v23  ;;  %v1821_v23 = vsel %vm1371_vm1, %v4033_v25, 0.0  ;;  %v4263_v37 = vpop.permute.xlu2 %401  ;;  %v1826_v25 = vsel %vm1376_vm2, %v4271_v27, 0.0 }
 0x21c   :  { %6910 = vst [vmem:[#allocation72_spill] sm:$0xff] %v4263_v37  ;;  %v4283_v37 = vld [vmem:[#allocation5 + $0x88] sm:$0xff] }
 0x221   :  { %3463 = vset.pattern.permute.xlu2 %v3793_v13  ;;  %3462 = vset.pattern.permute.xlu1 %v3796_v14 }
 0x222   :  { %2255 = vadd.xlane.f32.xlu0 %v2254_v48  ;;  %v4257_v20 = vpop.permute.xlu1 %395  ;;  %v1820_v48 = vsel %vm1370_vm0, %v4031_v11, 0.0  ;;  %v4261_v45 = vpop.permute.xlu0 %924  ;;  %v4273_v11 = vld [vmem:[#allocation5 + $0x58] sm:$0xff] }
 0x223   :  { %6908 = vst [vmem:[#allocation70_spill] sm:$0xff] %v4257_v20  ;;  %v2272_v30 = vadd.f32 %v1821_v23, %v1820_v48  ;;  %v1827_v47 = vsel %vm1377_vm3, %v4273_v11, 0.0  ;;  %v4277_v23 = vpop.permute.xlu2 %419  ;;  %v4281_v20 = vld [vmem:[#allocation5 + $0x80] sm:$0xff] }
 0x224   :  { %6909 = vst [vmem:[#allocation71_spill] sm:$0xff] %v4261_v45  ;;  %v2281_v44 = vadd.f32 %v1827_v47, %v1826_v25  ;;  %v4301_v25 = vld [vmem:[#allocation5 + $0xb0] sm:$0xff]  ;;  %v4303_v47 = vld [vmem:[#allocation5 + $0xb8] sm:$0xff] }
 0x225   :  { %6912 = vst [vmem:[#allocation74_spill] sm:$0xff] %v4273_v11 }
 0x226   :  { %6913 = vst [vmem:[#allocation75_spill] sm:$0xff] %v4277_v23 }
 0x227   :  { %6917 = vst [vmem:[#allocation79_spill] sm:$0xff] %v4301_v25 }
 0x228   :  { %6918 = vst [vmem:[#allocation80_spill] sm:$0xff] %v4303_v47 }
 0x229   :  { %571 = vperm.xlu2 %3463, %v3801_v15   ;;  %565 = vperm.xlu1 %3462, %v3801_v15  }
 0x22a   :  { %2264 = vadd.xlane.f32.xlu0 %v2263_v40  ;;  %v4269_v40 = vpop.permute.xlu1 %413  ;;  %v4279_v48 = vpop.permute.xlu0 %1076 }
 0x22b   :  { %6911 = vst [vmem:[#allocation73_spill] sm:$0xff] %v4269_v40  ;;  %v1833_v40 = vsel %vm1383_vm5, %v4283_v37, 0.0 }
 0x22c   :  { %6914 = vst [vmem:[#allocation76_spill] sm:$0xff] %v4279_v48  ;;  %v4293_v48 = vpop.permute.xlu2 %431 }
 0x22d   :  { %6915 = vst [vmem:[#allocation77_spill] sm:$0xff] %v4293_v48 }
 0x231   :  { %3465 = vset.pattern.permute.xlu2 %v3809_v17  ;;  %3464 = vset.pattern.permute.xlu1 %v3812_v18 }
 0x232   :  { %2273 = vadd.xlane.f32.xlu0 %v2272_v30  ;;  %v1832_v30 = vsel %vm1382_vm4, %v4281_v20, 0.0  ;;  %v426_v23 = vpop.permute.xlu1 %425  ;;  %v4295_v11 = vpop.permute.xlu0 %1228 }
 0x233   :  { %v2290_v45 = vadd.f32 %v1833_v40, %v1832_v30  ;;  %6916 = vst [vmem:[#allocation78_spill] sm:$0xff] %v4295_v11  ;;  %vm1388_vm6 = vcmp.eq.s32.totalorder %v426_v23, %v4022_v63  ;;  %vm1389_vm7 = vcmp.eq.s32.totalorder %v426_v23, %v4027_v5  ;;  %v4317_v11 = vld [vmem:[#allocation5 + $0xe0] sm:$0xff] }
 0x234   :  { %v1838_v40 = vsel %vm1388_vm6, %v4301_v25, 0.0  ;;  %v1839_v30 = vsel %vm1389_vm7, %v4303_v47, 0.0  ;;  %6922 = vst [vmem:[#allocation84_spill] sm:$0xff] %v4317_v11 }
 0x235   :  { %v2299_v48 = vadd.f32 %v1839_v30, %v1838_v40 }
 0x239   :  { %583 = vperm.xlu2 %3465, %v3801_v15   ;;  %577 = vperm.xlu1 %3464, %v3801_v15  }
 0x23a   :  { %2282 = vadd.xlane.f32.xlu0 %v2281_v44  ;;  %v444_v46 = vpop.permute.xlu1 %443  ;;  %v4305_v44 = vpop.permute.xlu2 %449 }
 0x23b   :  { %6919 = vst [vmem:[#allocation81_spill] sm:$0xff] %v4305_v44  ;;  %vm1394_vm8 = vcmp.eq.s32.totalorder %v444_v46, %v4022_v63  ;;  %vm1395_vm9 = vcmp.eq.s32.totalorder %v444_v46, %v4027_v5  ;;  %v4319_v44 = vld [vmem:[#allocation5 + $0xe8] sm:$0xff]  ;;  %v4331_v46 = vld [vmem:[#allocation5 + $0x118] sm:$0xff] }
 0x23c   :  { %6923 = vst [vmem:[#allocation85_spill] sm:$0xff] %v4319_v44  ;;  %v1844_v40 = vsel %vm1394_vm8, %v4317_v11, 0.0  ;;  %v1845_v30 = vsel %vm1395_vm9, %v4319_v44, 0.0  ;;  %v4353_v11 = vld [vmem:[#allocation5 + $0x178] sm:$0xff]  ;;  %vm1442_vm8 = vcmp.eq.s32.totalorder %v4081_v52, %v4022_v63  ;;  %vm1443_vm9 = vcmp.eq.s32.totalorder %v4081_v52, %v4027_v5 }
 0x23d   :  { %v2308_v47 = vadd.f32 %v1845_v30, %v1844_v40  ;;  %6926 = vst [vmem:[#allocation88_spill] sm:$0xff] %v4331_v46 }
 0x23e   :  { %6932 = vst [vmem:[#allocation94_spill] sm:$0xff] %v4353_v11 }
 0x241   :  { %3467 = vset.pattern.permute.xlu2 %v3825_v21  ;;  %3466 = vset.pattern.permute.xlu1 %v3828_v22 }
 0x242   :  { %2291 = vadd.xlane.f32.xlu0 %v2290_v45  ;;  %v4313_v45 = vpop.permute.xlu0 %194  ;;  %v4315_v23 = vpop.permute.xlu1 %456 }
 0x243   :  { %6920 = vst [vmem:[#allocation82_spill] sm:$0xff] %v4313_v45  ;;  %v463_v25 = vpop.permute.xlu2 %462 }
 0x244   :  { %6921 = vst [vmem:[#allocation83_spill] sm:$0xff] %v4315_v23  ;;  %vm1400_vm10 = vcmp.eq.s32.totalorder %v463_v25, %v4022_v63  ;;  %vm1401_vm11 = vcmp.eq.s32.totalorder %v463_v25, %v4027_v5 }
 0x245   :  { %v1851_v40 = vsel %vm1401_vm11, %v4331_v46, 0.0 }
 0x249   :  { %601 = vperm.xlu2 %3467, %v3801_v15   ;;  %595 = vperm.xlu1 %3466, %v3801_v15  }
 0x24a   :  { %2300 = vadd.xlane.f32.xlu0 %v2299_v48  ;;  %v4327_v15 = vpop.permute.xlu1 %474  ;;  %v4329_v48 = vld [vmem:[#allocation5 + $0x110] sm:$0xff]  ;;  %v4333_v23 = vpop.permute.xlu0 %346 }
 0x24b   :  { %6924 = vst [vmem:[#allocation86_spill] sm:$0xff] %v4327_v15  ;;  %v1850_v45 = vsel %vm1400_vm10, %v4329_v48, 0.0  ;;  %v481_v30 = vpop.permute.xlu2 %480  ;;  %v4345_v15 = vld [vmem:[#allocation5 + $0x148] sm:$0xff] }
 0x24c   :  { %6925 = vst [vmem:[#allocation87_spill] sm:$0xff] %v4329_v48  ;;  %v2317_v44 = vadd.f32 %v1851_v40, %v1850_v45  ;;  %vm1406_vm12 = vcmp.eq.s32.totalorder %v481_v30, %v4022_v63  ;;  %vm1407_vm13 = vcmp.eq.s32.totalorder %v481_v30, %v4027_v5  ;;  %v4351_v48 = vld [vmem:[#allocation5 + $0x170] sm:$0xff] }
 0x24d   :  { %6927 = vst [vmem:[#allocation89_spill] sm:$0xff] %v4333_v23  ;;  %v1857_v46 = vsel %vm1407_vm13, %v4345_v15, 0.0 }
 0x24e   :  { %6930 = vst [vmem:[#allocation92_spill] sm:$0xff] %v4345_v15 }
 0x251   :  { %3469 = vset.pattern.permute.xlu2 %v3762_v6  ;;  %3468 = vset.pattern.permute.xlu1 %v3745_v1 }
 0x252   :  { %2309 = vadd.xlane.f32.xlu0 %v2308_v47  ;;  %v4341_v25 = vpop.permute.xlu1 %486  ;;  %v4343_v47 = vld [vmem:[#allocation5 + $0x140] sm:$0xff]  ;;  %v499_v40 = vpop.permute.xlu0 %498 }
 0x253   :  { %6928 = vst [vmem:[#allocation90_spill] sm:$0xff] %v4341_v25  ;;  %v1856_v23 = vsel %vm1406_vm12, %v4343_v47, 0.0  ;;  %v4349_v45 = vpop.permute.xlu2 %492  ;;  %vm1412_vm14 = vcmp.eq.s32.totalorder %v499_v40, %v4022_v63  ;;  %vm1413_vm15 = vcmp.eq.s32.totalorder %v499_v40, %v4027_v5  ;;  %v4369_v40 = vld [vmem:[#allocation5 + $0x18] sm:$0xff] }
 0x254   :  { %6929 = vst [vmem:[#allocation91_spill] sm:$0xff] %v4343_v47  ;;  %v1862_v30 = vsel %vm1412_vm14, %v4351_v48, 0.0  ;;  %v1863_v25 = vsel %vm1413_vm15, %v4353_v11, 0.0 }
 0x255   :  { %6931 = vst [vmem:[#allocation93_spill] sm:$0xff] %v4349_v45  ;;  %v2335_v47 = vadd.f32 %v1863_v25, %v1862_v30 }
 0x256   :  { %6936 = vst [vmem:[#allocation98_spill] sm:$0xff] %v4369_v40 }
 0x259   :  { %614 = vperm.xlu2 %3469, %v3920_v33   ;;  %608 = vperm.xlu1 %3468, %v3920_v33  }
 0x25a   :  { %2318 = vadd.xlane.f32.xlu0 %v2317_v44  ;;  %v2326_v44 = vadd.f32 %v1857_v46, %v1856_v23  ;;  %v4367_v46 = vld [vmem:[#allocation5 + $0x10] sm:$0xff] }
 0x25b   :  { %v4361_v45 = vpop.permute.xlu1 %504  ;;  %v4363_v15 = vpop.permute.xlu2 %511  ;;  %6935 = vst [vmem:[#allocation97_spill] sm:$0xff] %v4367_v46 }
 0x25c   :  { %6933 = vst [vmem:[#allocation95_spill] sm:$0xff] %v4361_v45 }
 0x25d   :  { %6934 = vst [vmem:[#allocation96_spill] sm:$0xff] %v4363_v15 }
 0x261   :  { %3471 = vset.pattern.permute.xlu2 %v3749_v2  ;;  %3470 = vset.pattern.permute.xlu1 %v3768_v8 }
 0x262   :  { %2327 = vadd.xlane.f32.xlu0 %v2326_v44 }
 0x263   :  { %v4373_v44 = vpop.permute.xlu2 %523 }
 0x264   :  { %6937 = vst [vmem:[#allocation99_spill] sm:$0xff] %v4373_v44  ;;  %v4385_v44 = vld [vmem:[#allocation5 + $0x48] sm:$0xff] }
 0x269   :  { %632 = vperm.xlu2 %3471, %v3920_v33   ;;  %626 = vperm.xlu1 %3470, %v3920_v33  }
 0x26a   :  { %2336 = vadd.xlane.f32.xlu0 %v2335_v47 }
 0x26b   :  { %v518_v23 = vpop.permute.xlu1 %517  ;;  %v4379_v47 = vpop.permute.xlu2 %541 }
 0x26c   :  { %vm1418_vm0 = vcmp.eq.s32.totalorder %v518_v23, %v4022_v63  ;;  %vm1419_vm1 = vcmp.eq.s32.totalorder %v518_v23, %v4027_v5  ;;  %6938 = vst [vmem:[#allocation100_spill] sm:$0xff] %v4379_v47  ;;  %v4383_v23 = vld [vmem:[#allocation5 + $0x40] sm:$0xff] }
 0x26d   :  { %v1868_v45 = vsel %vm1418_vm0, %v4367_v46, 0.0  ;;  %v1869_v25 = vsel %vm1419_vm1, %v4369_v40, 0.0 }
 0x26e   :  { %v2344_v30 = vadd.f32 %v1869_v25, %v1868_v45 }
 0x271   :  { %3473 = vset.pattern.permute.xlu2 %v3780_v10  ;;  %3472 = vset.pattern.permute.xlu1 %v3765_v7 }
 0x272   :  { %2345 = vadd.xlane.f32.xlu0 %v2344_v30 }
 0x273   :  { %v554_v45 = vpop.permute.xlu2 %553 }
 0x274   :  { %vm1430_vm4 = vcmp.eq.s32.totalorder %v554_v45, %v4022_v63  ;;  %vm1431_vm5 = vcmp.eq.s32.totalorder %v554_v45, %v4027_v5 }
 0x275   :  { %v1880_v47 = vsel %vm1430_vm4, %v4043_v12, 0.0  ;;  %v1881_v46 = vsel %vm1431_vm5, %v4045_v41, 0.0  ;;  %v1893_v41 = vsel %vm1443_vm9, %v4071_v59, 0.0 }
 0x276   :  { %v2362_v11 = vadd.f32 %v1881_v46, %v1880_v47 }
 0x279   :  { %644 = vperm.xlu2 %3473, %v3920_v33   ;;  %638 = vperm.xlu1 %3472, %v3920_v33  }
 0x27b   :  { %v536_v15 = vpop.permute.xlu1 %535 }
 0x27c   :  { %vm1424_vm2 = vcmp.eq.s32.totalorder %v536_v15, %v4022_v63  ;;  %vm1425_vm3 = vcmp.eq.s32.totalorder %v536_v15, %v4027_v5 }
 0x27d   :  { %v1874_v25 = vsel %vm1424_vm2, %v4383_v23, 0.0  ;;  %v1875_v30 = vsel %vm1425_vm3, %v4385_v44, 0.0  ;;  %vm1472_vm2 = vcmp.eq.s32.totalorder %v3939_v38, %v4022_v63  ;;  %vm1473_vm3 = vcmp.eq.s32.totalorder %v3939_v38, %v4027_v5 }
 0x27e   :  { %v2353_v40 = vadd.f32 %v1875_v30, %v1874_v25 }
 0x280   :  { %2354 = vadd.xlane.f32.xlu0 %v2353_v40 }
 0x281   :  { %3475 = vset.pattern.permute.xlu2 %v3745_v1  ;;  %3474 = vset.pattern.permute.xlu1 %v3839_v24 }
 0x283   :  { %v572_v15 = vpop.permute.xlu2 %571 }
 0x284   :  { %vm1436_vm6 = vcmp.eq.s32.totalorder %v572_v15, %v4022_v63  ;;  %vm1437_vm7 = vcmp.eq.s32.totalorder %v572_v15, %v4027_v5 }
 0x285   :  { %v1886_v40 = vsel %vm1436_vm6, %v4057_v62, 0.0  ;;  %v1887_v45 = vsel %vm1437_vm7, %v4059_v42, 0.0 }
 0x286   :  { %v2371_v25 = vadd.f32 %v1887_v45, %v1886_v40 }
 0x288   :  { %2363 = vadd.xlane.f32.xlu0 %v2362_v11 }
 0x289   :  { %663 = vperm.xlu2 %3475, %v3806_v16   ;;  %656 = vperm.xlu1 %3474, %v3920_v33   ;;  %v1892_v33 = vsel %vm1442_vm8, %v4069_v4, 0.0 }
 0x28a   :  { %v2380_v62 = vadd.f32 %v1893_v41, %v1892_v33 }
 0x28b   :  { %v4417_v12 = vpop.permute.xlu1 %547 }
 0x290   :  { %2372 = vadd.xlane.f32.xlu0 %v2371_v25 }
 0x291   :  { %3477 = vset.pattern.permute.xlu2 %v3752_v3  ;;  %3476 = vset.pattern.permute.xlu1 %v3762_v6 }
 0x293   :  { %v4427_v59 = vpop.permute.xlu2 %583 }
 0x298   :  { %2381 = vadd.xlane.f32.xlu0 %v2380_v62 }
 0x299   :  { %675 = vperm.xlu2 %3477, %v3806_v16   ;;  %669 = vperm.xlu1 %3476, %v3806_v16  }
 0x29b   :  { %v4421_v52 = vpop.permute.xlu1 %565 }
 0x2a1   :  { %3479 = vset.pattern.permute.xlu2 %v3765_v7  ;;  %3478 = vset.pattern.permute.xlu1 %v3749_v2 }
 0x2a3   :  { %v4433_v11 = vpop.permute.xlu2 %601 }
 0x2a9   :  { %693 = vperm.xlu2 %3479, %v3806_v16   ;;  %687 = vperm.xlu1 %3478, %v3806_v16  }
 0x2ab   :  { %v4425_v4 = vpop.permute.xlu1 %577 }
 0x2b1   :  { %3481 = vset.pattern.permute.xlu2 %v3777_v9  ;;  %3480 = vset.pattern.permute.xlu1 %v3780_v10 }
 0x2b3   :  { %v4439_v47 = vpop.permute.xlu2 %614 }
 0x2b9   :  { %705 = vperm.xlu2 %3481, %v3806_v16   ;;  %699 = vperm.xlu1 %3480, %v3806_v16  }
 0x2bb   :  { %v4431_v42 = vpop.permute.xlu1 %595 }
 0x2c1   :  { %3483 = vset.pattern.permute.xlu2 %v3793_v13  ;;  %3482 = vset.pattern.permute.xlu1 %v3796_v14 }
 0x2c3   :  { %v4445_v45 = vpop.permute.xlu2 %632 }
 0x2c4   :  { %6939 = vst [vmem:[#allocation101_spill] sm:$0xff] %v4445_v45 }
 0x2c9   :  { %723 = vperm.xlu2 %3483, %v3806_v16   ;;  %717 = vperm.xlu1 %3482, %v3806_v16  }
 0x2cb   :  { %v609_v46 = vpop.permute.xlu1 %608 }
 0x2cc   :  { %vm1448_vm10 = vcmp.eq.s32.totalorder %v609_v46, %v4022_v63  ;;  %vm1449_vm11 = vcmp.eq.s32.totalorder %v609_v46, %v4027_v5 }
 0x2cd   :  { %v1898_v30 = vsel %vm1448_vm10, %v4085_v36, 0.0  ;;  %v1899_v15 = vsel %vm1449_vm11, %v4087_v0, 0.0 }
 0x2ce   :  { %v2389_v40 = vadd.f32 %v1899_v15, %v1898_v30 }
 0x2d0   :  { %2390 = vadd.xlane.f32.xlu0 %v2389_v40 }
 0x2d1   :  { %3485 = vset.pattern.permute.xlu2 %v3809_v17  ;;  %3484 = vset.pattern.permute.xlu1 %v3812_v18 }
 0x2d3   :  { %v645_v36 = vpop.permute.xlu2 %644 }
 0x2d4   :  { %vm1460_vm14 = vcmp.eq.s32.totalorder %v645_v36, %v4022_v63  ;;  %vm1461_vm15 = vcmp.eq.s32.totalorder %v645_v36, %v4027_v5 }
 0x2d5   :  { %v1910_v62 = vsel %vm1460_vm14, %v4115_v57, 0.0  ;;  %v1911_v46 = vsel %vm1461_vm15, %v4117_v49, 0.0  ;;  %v1923_v49 = vsel %vm1473_vm3, %v4149_v26, 0.0 }
 0x2d6   :  { %v2407_v15 = vadd.f32 %v1911_v46, %v1910_v62 }
 0x2d9   :  { %735 = vperm.xlu2 %3485, %v3806_v16   ;;  %729 = vperm.xlu1 %3484, %v3806_v16  }
 0x2db   :  { %v627_v25 = vpop.permute.xlu1 %626 }
 0x2dc   :  { %vm1454_vm12 = vcmp.eq.s32.totalorder %v627_v25, %v4022_v63  ;;  %vm1455_vm13 = vcmp.eq.s32.totalorder %v627_v25, %v4027_v5 }
 0x2dd   :  { %v1904_v0 = vsel %vm1454_vm12, %v4099_v53, 0.0  ;;  %v1905_v33 = vsel %vm1455_vm13, %v4101_v56, 0.0  ;;  %vm1502_vm12 = vcmp.eq.s32.totalorder %v4243_v55, %v4022_v63  ;;  %vm1503_vm13 = vcmp.eq.s32.totalorder %v4243_v55, %v4027_v5 }
 0x2de   :  { %v2398_v41 = vadd.f32 %v1905_v33, %v1904_v0 }
 0x2e0   :  { %2399 = vadd.xlane.f32.xlu0 %v2398_v41 }
 0x2e1   :  { %3487 = vset.pattern.permute.xlu2 %v3825_v21  ;;  %3486 = vset.pattern.permute.xlu1 %v3828_v22 }
 0x2e3   :  { %v664_v30 = vpop.permute.xlu2 %663 }
 0x2e4   :  { %vm1466_vm0 = vcmp.eq.s32.totalorder %v664_v30, %v4022_v63  ;;  %vm1467_vm1 = vcmp.eq.s32.totalorder %v664_v30, %v4027_v5 }
 0x2e5   :  { %v1916_v53 = vsel %vm1466_vm0, %v4129_v50, 0.0  ;;  %v1917_v56 = vsel %vm1467_vm1, %v4131_v29, 0.0 }
 0x2e6   :  { %v2416_v40 = vadd.f32 %v1917_v56, %v1916_v53 }
 0x2e8   :  { %2408 = vadd.xlane.f32.xlu0 %v2407_v15 }
 0x2e9   :  { %753 = vperm.xlu2 %3487, %v3806_v16   ;;  %747 = vperm.xlu1 %3486, %v3806_v16   ;;  %v1922_v16 = vsel %vm1472_vm2, %v4147_v54, 0.0 }
 0x2ea   :  { %v2425_v50 = vadd.f32 %v1923_v49, %v1922_v16 }
 0x2eb   :  { %v4479_v57 = vpop.permute.xlu1 %638 }
 0x2f0   :  { %2417 = vadd.xlane.f32.xlu0 %v2416_v40 }
 0x2f1   :  { %3489 = vset.pattern.permute.xlu2 %v3762_v6  ;;  %3488 = vset.pattern.permute.xlu1 %v3745_v1 }
 0x2f3   :  { %v4489_v26 = vpop.permute.xlu2 %675 }
 0x2f4   :  { %6942 = vst [vmem:[#allocation104_spill] sm:$0xff] %v4489_v26 }
 0x2f8   :  { %2426 = vadd.xlane.f32.xlu0 %v2425_v50 }
 0x2f9   :  { %766 = vperm.xlu2 %3489, %v3928_v35   ;;  %760 = vperm.xlu1 %3488, %v3928_v35  }
 0x2fb   :  { %v4483_v38 = vpop.permute.xlu1 %656 }
 0x2fc   :  { %6940 = vst [vmem:[#allocation102_spill] sm:$0xff] %v4483_v38 }
 0x301   :  { %3491 = vset.pattern.permute.xlu2 %v3749_v2  ;;  %3490 = vset.pattern.permute.xlu1 %v3768_v8 }
 0x303   :  { %v4495_v25 = vpop.permute.xlu2 %693 }
 0x304   :  { %6944 = vst [vmem:[#allocation106_spill] sm:$0xff] %v4495_v25 }
 0x309   :  { %784 = vperm.xlu2 %3491, %v3928_v35   ;;  %778 = vperm.xlu1 %3490, %v3928_v35  }
 0x30b   :  { %v4487_v29 = vpop.permute.xlu1 %669 }
 0x30c   :  { %6941 = vst [vmem:[#allocation103_spill] sm:$0xff] %v4487_v29  ;;  %v5168_v29 = vld [vmem:[#allocation5 + $0x188] sm:$0xff] }
 0x311   :  { %3493 = vset.pattern.permute.xlu2 %v3780_v10  ;;  %3492 = vset.pattern.permute.xlu1 %v3765_v7 }
 0x313   :  { %v4501_v0 = vpop.permute.xlu2 %705 }
 0x314   :  { %6945 = vst [vmem:[#allocation107_spill] sm:$0xff] %v4501_v0 }
 0x319   :  { %796 = vperm.xlu2 %3493, %v3928_v35   ;;  %790 = vperm.xlu1 %3492, %v3928_v35  }
 0x31b   :  { %v4493_v54 = vpop.permute.xlu1 %687 }
 0x31c   :  { %6943 = vst [vmem:[#allocation105_spill] sm:$0xff] %v4493_v54 }
 0x321   :  { %3495 = vset.pattern.permute.xlu2 %v3745_v1  ;;  %3494 = vset.pattern.permute.xlu1 %v3839_v24 }
 0x323   :  { %v4507_v46 = vpop.permute.xlu2 %723 }
 0x324   :  { %6946 = vst [vmem:[#allocation108_spill] sm:$0xff] %v4507_v46 }
 0x329   :  { %815 = vperm.xlu2 %3495, %v3817_v19   ;;  %808 = vperm.xlu1 %3494, %v3928_v35  }
 0x32b   :  { %v700_v36 = vpop.permute.xlu1 %699 }
 0x32c   :  { %vm1478_vm4 = vcmp.eq.s32.totalorder %v700_v36, %v4022_v63  ;;  %vm1479_vm5 = vcmp.eq.s32.totalorder %v700_v36, %v4027_v5 }
 0x32d   :  { %v1928_v33 = vsel %vm1478_vm4, %v4163_v32, 0.0  ;;  %v1929_v41 = vsel %vm1479_vm5, %v4165_v60, 0.0 }
 0x32e   :  { %v2434_v62 = vadd.f32 %v1929_v41, %v1928_v33 }
 0x330   :  { %2435 = vadd.xlane.f32.xlu0 %v2434_v62  ;;  %v6954_v62 = vld [vmem:[#allocation65_spill] sm:$0xff] }
 0x331   :  { %3497 = vset.pattern.permute.xlu2 %v3752_v3  ;;  %3496 = vset.pattern.permute.xlu1 %v3762_v6 }
 0x333   :  { %v736_v32 = vpop.permute.xlu2 %735 }
 0x334   :  { %vm1490_vm8 = vcmp.eq.s32.totalorder %v736_v32, %v4022_v63  ;;  %vm1491_vm9 = vcmp.eq.s32.totalorder %v736_v32, %v4027_v5  ;;  %v6955_v32 = vld [vmem:[#allocation66_spill] sm:$0xff] }
 0x335   :  { %v1940_v53 = vsel %vm1490_vm8, %v4191_v43, 0.0  ;;  %v1941_v56 = vsel %vm1491_vm9, %v4193_v61, 0.0  ;;  %v1952_v61 = vsel %vm1502_vm12, %v4213_v28, 0.0 }
 0x336   :  { %v2452_v16 = vadd.f32 %v1941_v56, %v1940_v53 }
 0x339   :  { %827 = vperm.xlu2 %3497, %v3817_v19   ;;  %821 = vperm.xlu1 %3496, %v3817_v19  }
 0x33b   :  { %v718_v35 = vpop.permute.xlu1 %717 }
 0x33c   :  { %vm1484_vm6 = vcmp.eq.s32.totalorder %v718_v35, %v4022_v63  ;;  %vm1485_vm7 = vcmp.eq.s32.totalorder %v718_v35, %v4027_v5 }
 0x33d   :  { %v1934_v60 = vsel %vm1484_vm6, %v4177_v58, 0.0  ;;  %v1935_v30 = vsel %vm1485_vm7, %v4179_v31, 0.0 }
 0x33e   :  { %v2443_v15 = vadd.f32 %v1935_v30, %v1934_v60 }
 0x340   :  { %2444 = vadd.xlane.f32.xlu0 %v2443_v15 }
 0x341   :  { %3499 = vset.pattern.permute.xlu2 %v3765_v7  ;;  %3498 = vset.pattern.permute.xlu1 %v3749_v2 }
 0x343   :  { %v754_v40 = vpop.permute.xlu2 %753 }
 0x344   :  { %vm1496_vm10 = vcmp.eq.s32.totalorder %v754_v40, %v4022_v63  ;;  %vm1497_vm11 = vcmp.eq.s32.totalorder %v754_v40, %v4027_v5  ;;  %v6958_v40 = vld [vmem:[#allocation68_spill] sm:$0xff] }
 0x345   :  { %v1946_v58 = vsel %vm1496_vm10, %v4203_v51, 0.0  ;;  %v1947_v31 = vsel %vm1497_vm11, %v4205_v34, 0.0  ;;  %v1953_v34 = vsel %vm1503_vm13, %v4215_v39, 0.0 }
 0x346   :  { %v2461_v49 = vadd.f32 %v1947_v31, %v1946_v58  ;;  %v2470_v43 = vadd.f32 %v1953_v34, %v1952_v61  ;;  %v6959_v58 = vld [vmem:[#allocation69_spill] sm:$0xff]  ;;  %v4581_v61 = vld [vmem:[#allocation5 + $0x20] sm:$0xff] }
 0x348   :  { %2453 = vadd.xlane.f32.xlu0 %v2452_v16 }
 0x349   :  { %845 = vperm.xlu2 %3499, %v3817_v19   ;;  %839 = vperm.xlu1 %3498, %v3817_v19  }
 0x34b   :  { %v4541_v51 = vpop.permute.xlu1 %729 }
 0x34c   :  { %6947 = vst [vmem:[#allocation109_spill] sm:$0xff] %v4541_v51 }
 0x350   :  { %2462 = vadd.xlane.f32.xlu0 %v2461_v49 }
 0x351   :  { %3501 = vset.pattern.permute.xlu2 %v3777_v9  ;;  %3500 = vset.pattern.permute.xlu1 %v3780_v10 }
 0x353   :  { %v4551_v39 = vpop.permute.xlu2 %766 }
 0x354   :  { %6950 = vst [vmem:[#allocation112_spill] sm:$0xff] %v4551_v39 }
 0x358   :  { %2471 = vadd.xlane.f32.xlu0 %v2470_v43  ;;  %v4584_v43 = vld [vmem:[#allocation5 + $0x28] sm:$0xff] }
 0x359   :  { %857 = vperm.xlu2 %3501, %v3817_v19   ;;  %851 = vperm.xlu1 %3500, %v3817_v19  }
 0x35b   :  { %v4545_v55 = vpop.permute.xlu1 %747 }
 0x35c   :  { %6948 = vst [vmem:[#allocation110_spill] sm:$0xff] %v4545_v55 }
 0x361   :  { %3503 = vset.pattern.permute.xlu2 %v3793_v13  ;;  %3502 = vset.pattern.permute.xlu1 %v3796_v14 }
 0x363   :  { %v4557_v36 = vpop.permute.xlu2 %784 }
 0x364   :  { %6952 = vst [vmem:[#allocation114_spill] sm:$0xff] %v4557_v36 }
 0x369   :  { %875 = vperm.xlu2 %3503, %v3817_v19   ;;  %869 = vperm.xlu1 %3502, %v3817_v19  }
 0x36b   :  { %v4549_v28 = vpop.permute.xlu1 %760 }
 0x36c   :  { %6949 = vst [vmem:[#allocation111_spill] sm:$0xff] %v4549_v28 }
 0x371   :  { %3505 = vset.pattern.permute.xlu2 %v3809_v17  ;;  %3504 = vset.pattern.permute.xlu1 %v3812_v18 }
 0x373   :  { %v4563_v41 = vpop.permute.xlu2 %796 }
 0x374   :  { %6953 = vst [vmem:[#allocation115_spill] sm:$0xff] %v4563_v41 }
 0x379   :  { %887 = vperm.xlu2 %3505, %v3817_v19   ;;  %881 = vperm.xlu1 %3504, %v3817_v19  }
 0x37b   :  { %v4555_v50 = vpop.permute.xlu1 %778 }
 0x37c   :  { %6951 = vst [vmem:[#allocation113_spill] sm:$0xff] %v4555_v50  ;;  %v6995_v50 = vld [vmem:[#allocation98_spill] sm:$0xff] }
 0x381   :  { %3507 = vset.pattern.permute.xlu2 %v3825_v21  ;;  %3506 = vset.pattern.permute.xlu1 %v3828_v22 }
 0x383   :  { %v4569_v15 = vpop.permute.xlu2 %815 }
 0x384   :  { %6956 = vst [vmem:[#allocation65_spill] sm:$0xff] %v4569_v15  ;;  %v6994_v15 = vld [vmem:[#allocation97_spill] sm:$0xff] }
 0x389   :  { %905 = vperm.xlu2 %3507, %v3817_v19   ;;  %899 = vperm.xlu1 %3506, %v3817_v19   ;;  %v6957_v19 = vld [vmem:[#allocation15_spill] sm:$0xff] }
 0x38b   :  { %v791_v33 = vpop.permute.xlu1 %790 }
 0x38c   :  { %vm1508_vm14 = vcmp.eq.s32.totalorder %v791_v33, %v4022_v63  ;;  %vm1509_vm15 = vcmp.eq.s32.totalorder %v791_v33, %v4027_v5 }
 0x38d   :  { %v1958_v35 = vsel %vm1508_vm14, %v6954_v62, 0.0  ;;  %v1959_v60 = vsel %vm1509_vm15, %v6955_v32, 0.0 }
 0x38e   :  { %v2479_v30 = vadd.f32 %v1959_v60, %v1958_v35  ;;  %v6960_v60 = vld [vmem:[#allocation74_spill] sm:$0xff] }
 0x390   :  { %2480 = vadd.xlane.f32.xlu0 %v2479_v30 }
 0x391   :  { %3509 = vset.pattern.permute.xlu2 %v3762_v6  ;;  %3508 = vset.pattern.permute.xlu1 %v3745_v1 }
 0x393   :  { %v828_v56 = vpop.permute.xlu2 %827 }
 0x394   :  { %vm1520_vm2 = vcmp.eq.s32.totalorder %v828_v56, %v4022_v63  ;;  %vm1521_vm3 = vcmp.eq.s32.totalorder %v828_v56, %v4027_v5  ;;  %v6961_v56 = vld [vmem:[#allocation29_spill] sm:$0xff] }
 0x395   :  { %v1970_v34 = vsel %vm1520_vm2, %v4581_v61, 0.0  ;;  %v1971_v33 = vsel %vm1521_vm3, %v4584_v43, 0.0  ;;  %vm1532_vm6 = vcmp.eq.s32.totalorder %v6961_v56, %v4022_v63  ;;  %vm1533_vm7 = vcmp.eq.s32.totalorder %v6961_v56, %v4027_v5 }
 0x396   :  { %v2497_v35 = vadd.f32 %v1971_v33, %v1970_v34 }
 0x399   :  { %918 = vperm.xlu2 %3509, %v6957_v19   ;;  %912 = vperm.xlu1 %3508, %v6957_v19  }
 0x39b   :  { %v809_v53 = vpop.permute.xlu1 %808 }
 0x39c   :  { %vm1514_vm0 = vcmp.eq.s32.totalorder %v809_v53, %v4022_v63  ;;  %vm1515_vm1 = vcmp.eq.s32.totalorder %v809_v53, %v4027_v5 }
 0x39d   :  { %v1964_v16 = vsel %vm1514_vm0, %v6958_v40, 0.0  ;;  %v1965_v31 = vsel %vm1515_vm1, %v6959_v58, 0.0  ;;  %v1983_v40 = vsel %vm1533_vm7, %v4283_v37, 0.0  ;;  %v6962_v58 = vld [vmem:[#allocation9_spill] sm:$0xff] }
 0x39e   :  { %v2488_v49 = vadd.f32 %v1965_v31, %v1964_v16 }
 0x3a0   :  { %2489 = vadd.xlane.f32.xlu0 %v2488_v49 }
 0x3a1   :  { %3511 = vset.pattern.permute.xlu2 %v3749_v2  ;;  %3510 = vset.pattern.permute.xlu1 %v3768_v8 }
 0x3a3   :  { %v846_v62 = vpop.permute.xlu2 %845 }
 0x3a4   :  { %vm1526_vm4 = vcmp.eq.s32.totalorder %v846_v62, %v4022_v63  ;;  %vm1527_vm5 = vcmp.eq.s32.totalorder %v846_v62, %v4027_v5 }
 0x3a5   :  { %v1976_v32 = vsel %vm1526_vm4, %v4271_v27, 0.0  ;;  %v1977_v30 = vsel %vm1527_vm5, %v6960_v60, 0.0  ;;  %v1982_v27 = vsel %vm1532_vm6, %v4281_v20, 0.0  ;;  %v6970_v60 = vld [vmem:[#allocation79_spill] sm:$0xff] }
 0x3a6   :  { %v2506_v53 = vadd.f32 %v1977_v30, %v1976_v32  ;;  %v2515_v16 = vadd.f32 %v1983_v40, %v1982_v27  ;;  %v4633_v40 = vpop.permute.xlu0 %650 }
 0x3a8   :  { %2498 = vadd.xlane.f32.xlu0 %v2497_v35 }
 0x3a9   :  { %936 = vperm.xlu2 %3511, %v6957_v19   ;;  %930 = vperm.xlu1 %3510, %v6957_v19  }
 0x3ab   :  { %v4607_v31 = vpop.permute.xlu1 %821 }
 0x3ac   :  { %6963 = vst [vmem:[#allocation66_spill] sm:$0xff] %v4607_v31 }
 0x3b0   :  { %2507 = vadd.xlane.f32.xlu0 %v2506_v53  ;;  %v6971_v53 = vld [vmem:[#allocation80_spill] sm:$0xff] }
 0x3b1   :  { %3513 = vset.pattern.permute.xlu2 %v3780_v10  ;;  %3512 = vset.pattern.permute.xlu1 %v3765_v7 }
 0x3b3   :  { %v4617_v33 = vpop.permute.xlu2 %857 }
 0x3b4   :  { %6966 = vst [vmem:[#allocation69_spill] sm:$0xff] %v4617_v33 }
 0x3b8   :  { %2516 = vadd.xlane.f32.xlu0 %v2515_v16 }
 0x3b9   :  { %948 = vperm.xlu2 %3513, %v6957_v19   ;;  %942 = vperm.xlu1 %3512, %v6957_v19  }
 0x3bb   :  { %v4611_v49 = vpop.permute.xlu1 %839 }
 0x3bc   :  { %6964 = vst [vmem:[#allocation15_spill] sm:$0xff] %v4611_v49 }
 0x3c1   :  { %3515 = vset.pattern.permute.xlu2 %v3745_v1  ;;  %3514 = vset.pattern.permute.xlu1 %v3839_v24 }
 0x3c3   :  { %v4623_v62 = vpop.permute.xlu2 %875 }
 0x3c4   :  { %6968 = vst [vmem:[#allocation29_spill] sm:$0xff] %v4623_v62 }
 0x3c9   :  { %967 = vperm.xlu2 %3515, %v6962_v58   ;;  %960 = vperm.xlu1 %3514, %v6957_v19  }
 0x3cb   :  { %v4615_v34 = vpop.permute.xlu1 %851 }
 0x3cc   :  { %6965 = vst [vmem:[#allocation68_spill] sm:$0xff] %v4615_v34  ;;  %v6976_v34 = vld [vmem:[#allocation88_spill] sm:$0xff] }
 0x3d1   :  { %3517 = vset.pattern.permute.xlu2 %v3752_v3  ;;  %3516 = vset.pattern.permute.xlu1 %v3762_v6 }
 0x3d3   :  { %v4629_v32 = vpop.permute.xlu2 %887 }
 0x3d4   :  { %6969 = vst [vmem:[#allocation9_spill] sm:$0xff] %v4629_v32  ;;  %v4641_v32 = vpop.permute.xlu0 %802 }
 0x3d9   :  { %979 = vperm.xlu2 %3517, %v6962_v58   ;;  %973 = vperm.xlu1 %3516, %v6962_v58  }
 0x3db   :  { %v4621_v19 = vpop.permute.xlu1 %869 }
 0x3dc   :  { %6967 = vst [vmem:[#allocation74_spill] sm:$0xff] %v4621_v19  ;;  %v955_v49 = vpop.permute.xlu0 %954 }
 0x3dd   :  { %vm1562_vm0 = vcmp.eq.s32.totalorder %v955_v49, %v4022_v63  ;;  %vm1563_vm1 = vcmp.eq.s32.totalorder %v955_v49, %v4027_v5 }
 0x3e1   :  { %3519 = vset.pattern.permute.xlu2 %v3765_v7  ;;  %3518 = vset.pattern.permute.xlu1 %v3749_v2 }
 0x3e3   :  { %v4637_v16 = vpop.permute.xlu2 %905 }
 0x3e4   :  { %6972 = vst [vmem:[#allocation79_spill] sm:$0xff] %v4637_v16  ;;  %v6975_v16 = vld [vmem:[#allocation87_spill] sm:$0xff] }
 0x3e9   :  { %997 = vperm.xlu2 %3519, %v6962_v58   ;;  %991 = vperm.xlu1 %3518, %v6962_v58  }
 0x3eb   :  { %v882_v35 = vpop.permute.xlu1 %881 }
 0x3ec   :  { %vm1538_vm8 = vcmp.eq.s32.totalorder %v882_v35, %v4022_v63  ;;  %vm1539_vm9 = vcmp.eq.s32.totalorder %v882_v35, %v4027_v5 }
 0x3ed   :  { %v1988_v30 = vsel %vm1538_vm8, %v6970_v60, 0.0  ;;  %v1989_v56 = vsel %vm1539_vm9, %v6971_v53, 0.0 }
 0x3ee   :  { %v2524_v27 = vadd.f32 %v1989_v56, %v1988_v30  ;;  %v6973_v30 = vld [vmem:[#allocation84_spill] sm:$0xff]  ;;  %v6974_v56 = vld [vmem:[#allocation85_spill] sm:$0xff] }
 0x3f0   :  { %2525 = vadd.xlane.f32.xlu0 %v2524_v27 }
 0x3f1   :  { %3521 = vset.pattern.permute.xlu2 %v3777_v9  ;;  %3520 = vset.pattern.permute.xlu1 %v3780_v10 }
 0x3f3   :  { %v919_v60 = vpop.permute.xlu2 %918 }
 0x3f4   :  { %vm1550_vm12 = vcmp.eq.s32.totalorder %v919_v60, %v4022_v63  ;;  %vm1551_vm13 = vcmp.eq.s32.totalorder %v919_v60, %v4027_v5 }
 0x3f5   :  { %v2000_v62 = vsel %vm1550_vm12, %v6975_v16, 0.0  ;;  %v2001_v33 = vsel %vm1551_vm13, %v6976_v34, 0.0  ;;  %v4659_v16 = vpop.permute.xlu0 %1106  ;;  %v6979_v34 = vld [vmem:[#allocation94_spill] sm:$0xff] }
 0x3f6   :  { %v2542_v31 = vadd.f32 %v2001_v33, %v2000_v62  ;;  %v2013_v33 = vsel %vm1563_vm1, %v6979_v34, 0.0 }
 0x3f9   :  { %1009 = vperm.xlu2 %3521, %v6962_v58   ;;  %1003 = vperm.xlu1 %3520, %v6962_v58  }
 0x3fb   :  { %v900_v35 = vpop.permute.xlu1 %899 }
 0x3fc   :  { %vm1544_vm10 = vcmp.eq.s32.totalorder %v900_v35, %v4022_v63  ;;  %vm1545_vm11 = vcmp.eq.s32.totalorder %v900_v35, %v4027_v5 }
 0x3fd   :  { %v1994_v53 = vsel %vm1544_vm10, %v6973_v30, 0.0  ;;  %v1995_v27 = vsel %vm1545_vm11, %v6974_v56, 0.0  ;;  %v6978_v30 = vld [vmem:[#allocation92_spill] sm:$0xff] }
 0x3fe   :  { %v2533_v19 = vadd.f32 %v1995_v27, %v1994_v53  ;;  %v4671_v27 = vpop.permute.xlu0 %1258 }
 0x400   :  { %2534 = vadd.xlane.f32.xlu0 %v2533_v19  ;;  %v6977_v19 = vld [vmem:[#allocation91_spill] sm:$0xff] }
 0x401   :  { %3523 = vset.pattern.permute.xlu2 %v3793_v13  ;;  %3522 = vset.pattern.permute.xlu1 %v3796_v14 }
 0x403   :  { %v937_v35 = vpop.permute.xlu2 %936 }
 0x404   :  { %vm1556_vm14 = vcmp.eq.s32.totalorder %v937_v35, %v4022_v63  ;;  %vm1557_vm15 = vcmp.eq.s32.totalorder %v937_v35, %v4027_v5 }
 0x405   :  { %v2006_v60 = vsel %vm1556_vm14, %v6977_v19, 0.0  ;;  %v2007_v53 = vsel %vm1557_vm15, %v6978_v30, 0.0  ;;  %v6982_v19 = vld [vmem:[#allocation16_spill] sm:$0xff] }
 0x406   :  { %v2551_v56 = vadd.f32 %v2007_v53, %v2006_v60  ;;  %v6987_v53 = vld [vmem:[#allocation21_spill] sm:$0xff]  ;;  %v4737_v46 = vpop.xlane.xlu0 %2123 }
 0x407   :  { %vm1282_vm2 = vcmp.eq.s32.totalorder %v6987_v53, %v4022_v63  ;;  %vm1283_vm3 = vcmp.eq.s32.totalorder %v6987_v53, %v4027_v5  ;;  %6996 = vst [vmem:[#allocation94_spill] sm:$0xff] %v4737_v46 }
 0x408   :  { %2543 = vadd.xlane.f32.xlu0 %v2542_v31  ;;  %v2012_v31 = vsel %vm1562_vm0, %v4351_v48, 0.0  ;;  %v1732_v34 = vsel %vm1282_vm2, %v4281_v20, 0.0 }
 0x409   :  { %1027 = vperm.xlu2 %3523, %v6962_v58   ;;  %1021 = vperm.xlu1 %3522, %v6962_v58   ;;  %v2560_v62 = vadd.f32 %v2013_v33, %v2012_v31  ;;  %v6989_v31 = vld [vmem:[#allocation23_spill] sm:$0xff]  ;;  %v1733_v33 = vsel %vm1283_vm3, %v4283_v37, 0.0 }
 0x40a   :  { %vm1432_vm6 = vcmp.eq.s32.totalorder %v6989_v31, %v4022_v63  ;;  %vm1433_vm7 = vcmp.eq.s32.totalorder %v6989_v31, %v4027_v5  ;;  %v6992_v31 = vld [vmem:[#allocation34_spill] sm:$0xff] }
 0x40b   :  { %v4675_v35 = vpop.permute.xlu1 %912  ;;  %vm1632_vm12 = vcmp.eq.s32.totalorder %v6992_v31, %v4022_v63  ;;  %vm1633_vm13 = vcmp.eq.s32.totalorder %v6992_v31, %v4027_v5 }
 0x40c   :  { %6980 = vst [vmem:[#allocation80_spill] sm:$0xff] %v4675_v35  ;;  %v2082_v28 = vsel %vm1632_vm12, %v4281_v20, 0.0  ;;  %v2083_v39 = vsel %vm1633_vm13, %v4283_v37, 0.0 }
 0x410   :  { %2552 = vadd.xlane.f32.xlu0 %v2551_v56  ;;  %v6988_v56 = vld [vmem:[#allocation22_spill] sm:$0xff] }
 0x411   :  { %3525 = vset.pattern.permute.xlu2 %v3809_v17  ;;  %3524 = vset.pattern.permute.xlu1 %v3812_v18  ;;  %vm1332_vm4 = vcmp.eq.s32.totalorder %v6988_v56, %v4022_v63  ;;  %vm1333_vm5 = vcmp.eq.s32.totalorder %v6988_v56, %v4027_v5 }
 0x412   :  { %v1782_v53 = vsel %vm1332_vm4, %v4281_v20, 0.0  ;;  %v1783_v56 = vsel %vm1333_vm5, %v4283_v37, 0.0 }
 0x413   :  { %v4685_v60 = vpop.permute.xlu2 %948  ;;  %v4741_v51 = vadd.f32 %v1783_v56, %v1782_v53 }
 0x414   :  { %6984 = vst [vmem:[#allocation87_spill] sm:$0xff] %v4685_v60  ;;  %v1883_v60 = vsel %vm1433_vm7, %v4283_v37, 0.0 }
 0x418   :  { %2561 = vadd.xlane.f32.xlu0 %v2560_v62  ;;  %v6990_v62 = vld [vmem:[#allocation26_spill] sm:$0xff] }
 0x419   :  { %1039 = vperm.xlu2 %3525, %v6962_v58   ;;  %1033 = vperm.xlu1 %3524, %v6962_v58   ;;  %vm1482_vm8 = vcmp.eq.s32.totalorder %v6990_v62, %v4022_v63  ;;  %vm1483_vm9 = vcmp.eq.s32.totalorder %v6990_v62, %v4027_v5 }
 0x41a   :  { %v1933_v62 = vsel %vm1483_vm9, %v4283_v37, 0.0 }
 0x41b   :  { %v4679_v49 = vpop.permute.xlu1 %930 }
 0x41c   :  { %6981 = vst [vmem:[#allocation84_spill] sm:$0xff] %v4679_v49  ;;  %v1932_v49 = vsel %vm1482_vm8, %v4281_v20, 0.0 }
 0x421   :  { %3527 = vset.pattern.permute.xlu2 %v3825_v21  ;;  %3526 = vset.pattern.permute.xlu1 %v3828_v22 }
 0x423   :  { %v4691_v30 = vpop.permute.xlu2 %967 }
 0x424   :  { %6986 = vst [vmem:[#allocation91_spill] sm:$0xff] %v4691_v30  ;;  %v1882_v30 = vsel %vm1432_vm6, %v4281_v20, 0.0 }
 0x425   :  { %v4743_v0 = vadd.f32 %v1883_v60, %v1882_v30  ;;  %v4770_v60 = vld [vmem:[#allocation5 + $0x78] sm:$0xff] }
 0x429   :  { %1057 = vperm.xlu2 %3527, %v6962_v58   ;;  %1051 = vperm.xlu1 %3526, %v6962_v58  }
 0x42b   :  { %v4683_v48 = vpop.permute.xlu1 %942 }
 0x42c   :  { %6983 = vst [vmem:[#allocation85_spill] sm:$0xff] %v4683_v48 }
 0x431   :  { %3529 = vset.pattern.permute.xlu2 %v3762_v6  ;;  %3528 = vset.pattern.permute.xlu1 %v3745_v1 }
 0x439   :  { %1070 = vperm.xlu2 %3529, %v6982_v19   ;;  %1064 = vperm.xlu1 %3528, %v6982_v19  }
 0x43b   :  { %v4689_v58 = vpop.permute.xlu1 %960 }
 0x43c   :  { %6985 = vst [vmem:[#allocation88_spill] sm:$0xff] %v4689_v58  ;;  %v6991_v58 = vld [vmem:[#allocation31_spill] sm:$0xff] }
 0x43d   :  { %vm1582_vm10 = vcmp.eq.s32.totalorder %v6991_v58, %v4022_v63  ;;  %vm1583_vm11 = vcmp.eq.s32.totalorder %v6991_v58, %v4027_v5  ;;  %v4730_v58 = vpop.permute.xlu2 %979 }
 0x43e   :  { %v2032_v35 = vsel %vm1582_vm10, %v4281_v20, 0.0  ;;  %6993 = vst [vmem:[#allocation92_spill] sm:$0xff] %v4730_v58  ;;  %v2033_v31 = vsel %vm1583_vm11, %v4283_v37, 0.0  ;;  %v4745_v58 = vadd.f32 %v1933_v62, %v1932_v49  ;;  %v4751_v20 = vadd.f32 %v2083_v39, %v2082_v28  ;;  %v4767_v39 = vld [vmem:[#allocation5 + $0x70] sm:$0xff] }
 0x440   :  { %6997 = vst [vmem:[#allocation16_spill] sm:$0xff] %v4745_v58 }
 0x441   :  { %3531 = vset.pattern.permute.xlu2 %v3749_v2  ;;  %3530 = vset.pattern.permute.xlu1 %v3768_v8  ;;  %6999 = vst [vmem:[#allocation22_spill] sm:$0xff] %v4751_v20 }
 0x445   :  { %v4753_v37 = vpop.permute.xlu2 %997 }
 0x446   :  { %7000 = vst [vmem:[#allocation23_spill] sm:$0xff] %v4753_v37 }
 0x449   :  { %1088 = vperm.xlu2 %3531, %v6982_v19   ;;  %1082 = vperm.xlu1 %3530, %v6982_v19  }
 0x44b   :  { %v974_v48 = vpop.permute.xlu1 %973 }
 0x44c   :  { %vm1568_vm14 = vcmp.eq.s32.totalorder %v974_v48, %v4022_v63  ;;  %vm1569_vm15 = vcmp.eq.s32.totalorder %v974_v48, %v4027_v5  ;;  %v4739_v48 = vadd.f32 %v1733_v33, %v1732_v34  ;;  %v7003_v34 = vld [vmem:[#allocation10_spill] sm:$0xff] }
 0x44d   :  { %v2018_v41 = vsel %vm1568_vm14, %v6994_v15, 0.0  ;;  %v2019_v36 = vsel %vm1569_vm15, %v6995_v50, 0.0  ;;  %v4749_v50 = vadd.f32 %v2033_v31, %v2032_v35  ;;  %v4761_v35 = vpop.xlane.xlu0 %2138 }
 0x44e   :  { %v2569_v55 = vadd.f32 %v2019_v36, %v2018_v41  ;;  %7001 = vst [vmem:[#allocation26_spill] sm:$0xff] %v4761_v35 }
 0x44f   :  { %6998 = vst [vmem:[#allocation21_spill] sm:$0xff] %v4749_v50 }
 0x450   :  { %2570 = vadd.xlane.f32.xlu0 %v2569_v55 }
 0x451   :  { %3533 = vset.pattern.permute.xlu2 %v3780_v10  ;;  %3532 = vset.pattern.permute.xlu1 %v3765_v7 }
 0x453   :  { %v1010_v36 = vpop.permute.xlu2 %1009 }
 0x454   :  { %vm1580_vm2 = vcmp.eq.s32.totalorder %v1010_v36, %v4022_v63  ;;  %vm1581_vm3 = vcmp.eq.s32.totalorder %v1010_v36, %v4027_v5  ;;  %v7012_v36 = vld [vmem:[#allocation56_spill] sm:$0xff] }
 0x455   :  { %v2030_v49 = vsel %vm1580_vm2, %v4767_v39, 0.0  ;;  %v4773_v30 = vpop.xlane.xlu0 %2147  ;;  %vm1302_vm6 = vcmp.eq.s32.totalorder %v7012_v36, %v4022_v63  ;;  %vm1303_vm7 = vcmp.eq.s32.totalorder %v7012_v36, %v4027_v5 }
 0x456   :  { %7002 = vst [vmem:[#allocation31_spill] sm:$0xff] %v4773_v30 }
 0x459   :  { %1100 = vperm.xlu2 %3533, %v6982_v19   ;;  %1094 = vperm.xlu1 %3532, %v6982_v19  }
 0x45b   :  { %v992_v55 = vpop.permute.xlu1 %991 }
 0x45c   :  { %vm1574_vm0 = vcmp.eq.s32.totalorder %v992_v55, %v4022_v63  ;;  %vm1575_vm1 = vcmp.eq.s32.totalorder %v992_v55, %v4027_v5 }
 0x45d   :  { %v2024_v41 = vsel %vm1574_vm0, %v4383_v23, 0.0  ;;  %v2025_v15 = vsel %vm1575_vm1, %v4385_v44, 0.0  ;;  %v2031_v44 = vsel %vm1581_vm3, %v4770_v60, 0.0 }
 0x45e   :  { %v2578_v28 = vadd.f32 %v2025_v15, %v2024_v41  ;;  %v2587_v23 = vadd.f32 %v2031_v44, %v2030_v49  ;;  %v4831_v41 = vpop.xlane.xlu0 %2156  ;;  %v7016_v15 = vld [vmem:[#allocation63_spill] sm:$0xff]  ;;  %v7019_v44 = vld [vmem:[#allocation76_spill] sm:$0xff] }
 0x45f   :  { %7013 = vst [vmem:[#allocation56_spill] sm:$0xff] %v4831_v41  ;;  %vm1452_vm10 = vcmp.eq.s32.totalorder %v7016_v15, %v4022_v63  ;;  %vm1453_vm11 = vcmp.eq.s32.totalorder %v7016_v15, %v4027_v5  ;;  %v7018_v49 = vld [vmem:[#allocation71_spill] sm:$0xff]  ;;  %vm1602_vm0 = vcmp.eq.s32.totalorder %v7019_v44, %v4022_v63  ;;  %vm1603_vm1 = vcmp.eq.s32.totalorder %v7019_v44, %v4027_v5 }
 0x460   :  { %2579 = vadd.xlane.f32.xlu0 %v2578_v28  ;;  %v7017_v28 = vld [vmem:[#allocation78_spill] sm:$0xff]  ;;  %vm1552_vm14 = vcmp.eq.s32.totalorder %v7018_v49, %v4022_v63  ;;  %vm1553_vm15 = vcmp.eq.s32.totalorder %v7018_v49, %v4027_v5 }
 0x461   :  { %3535 = vset.pattern.permute.xlu2 %v3745_v1  ;;  %3534 = vset.pattern.permute.xlu1 %v3839_v24  ;;  %vm1652_vm12 = vcmp.eq.s32.totalorder %v7017_v28, %v4022_v63  ;;  %vm1653_vm13 = vcmp.eq.s32.totalorder %v7017_v28, %v4027_v5 }
 0x468   :  { %2588 = vadd.xlane.f32.xlu0 %v2587_v23 }
 0x469   :  { %1119 = vperm.xlu2 %3535, %v7003_v34   ;;  %1112 = vperm.xlu1 %3534, %v6982_v19  }
 0x471   :  { %3537 = vset.pattern.permute.xlu2 %v3752_v3  ;;  %3536 = vset.pattern.permute.xlu1 %v3762_v6  ;;  %v4789_v3 = vpop.permute.xlu2 %1027 }
 0x472   :  { %7004 = vst [vmem:[#allocation34_spill] sm:$0xff] %v4789_v3 }
 0x479   :  { %1131 = vperm.xlu2 %3537, %v7003_v34   ;;  %1125 = vperm.xlu1 %3536, %v7003_v34   ;;  %v4793_v19 = vpop.permute.xlu2 %1039 }
 0x481   :  { %3540 = vset.pattern.permute.xlu2 %v3765_v7  ;;  %3539 = vset.pattern.permute.xlu1 %v3749_v2 }
 0x483   :  { %v4797_v33 = vpop.permute.xlu2 %1057 }
 0x489   :  { %1149 = vperm.xlu2 %3540, %v7003_v34   ;;  %1143 = vperm.xlu1 %3539, %v7003_v34  }
 0x491   :  { %3542 = vset.pattern.permute.xlu2 %v3777_v9  ;;  %3541 = vset.pattern.permute.xlu1 %v3780_v10 }
 0x493   :  { %v4801_v9 = vpop.permute.xlu2 %1070 }
 0x494   :  { %7005 = vst [vmem:[#allocation97_spill] sm:$0xff] %v4801_v9 }
 0x499   :  { %1161 = vperm.xlu2 %3542, %v7003_v34   ;;  %1155 = vperm.xlu1 %3541, %v7003_v34  }
 0x4a1   :  { %3545 = vset.pattern.permute.xlu2 %v3793_v13  ;;  %3544 = vset.pattern.permute.xlu1 %v3796_v14  ;;  %v4805_v13 = vpop.permute.xlu1 %1003 }
 0x4a2   :  { %7006 = vst [vmem:[#allocation98_spill] sm:$0xff] %v4805_v13 }
 0x4a3   :  { %v4807_v14 = vpop.permute.xlu2 %1088 }
 0x4a4   :  { %7007 = vst [vmem:[#allocation10_spill] sm:$0xff] %v4807_v14 }
 0x4a9   :  { %1179 = vperm.xlu2 %3545, %v7003_v34   ;;  %1173 = vperm.xlu1 %3544, %v7003_v34   ;;  %v4811_v53 = vpop.permute.xlu1 %1021 }
 0x4b1   :  { %3547 = vset.pattern.permute.xlu2 %v3809_v17  ;;  %3546 = vset.pattern.permute.xlu1 %v3812_v18  ;;  %v4817_v17 = vpop.permute.xlu1 %1033 }
 0x4b2   :  { %7009 = vst [vmem:[#allocation117_spill] sm:$0xff] %v4817_v17 }
 0x4b3   :  { %v4813_v56 = vpop.permute.xlu2 %1100 }
 0x4b4   :  { %7008 = vst [vmem:[#allocation116_spill] sm:$0xff] %v4813_v56 }
 0x4b9   :  { %1191 = vperm.xlu2 %3547, %v7003_v34   ;;  %1185 = vperm.xlu1 %3546, %v7003_v34   ;;  %v4823_v62 = vpop.permute.xlu1 %1051 }
 0x4ba   :  { %7011 = vst [vmem:[#allocation119_spill] sm:$0xff] %v4823_v62 }
 0x4c1   :  { %3550 = vset.pattern.permute.xlu2 %v3825_v21  ;;  %3549 = vset.pattern.permute.xlu1 %v3828_v22  ;;  %v4857_v23 = vpop.permute.xlu1 %1064 }
 0x4c3   :  { %v4819_v18 = vpop.permute.xlu2 %1119 }
 0x4c4   :  { %7010 = vst [vmem:[#allocation118_spill] sm:$0xff] %v4819_v18 }
 0x4c9   :  { %1209 = vperm.xlu2 %3550, %v7003_v34   ;;  %1203 = vperm.xlu1 %3549, %v7003_v34   ;;  %v3568_v34 = vld [vmem:[#allocation5 + $0x120] sm:$0xff]  ;;  %v4885_v18 = vpop.permute.xlu1 %1082 }
 0x4ca   :  { %v1902_v28 = vsel %vm1452_vm10, %v3568_v34, 0.0  ;;  %v2102_v44 = vsel %vm1652_vm12, %v3568_v34, 0.0  ;;  %v2002_v56 = vsel %vm1552_vm14, %v3568_v34, 0.0  ;;  %v2052_v3 = vsel %vm1602_vm0, %v3568_v34, 0.0  ;;  %7023 = vst [vmem:[#allocation78_spill] sm:$0xff] %v4885_v18 }
 0x4d1   :  { %3552 = vset.pattern.permute.xlu2 %v3762_v6  ;;  %3551 = vset.pattern.permute.xlu1 %v3745_v1  ;;  %v7014_v1 = vld [vmem:[#allocation61_spill] sm:$0xff] }
 0x4d2   :  { %vm1402_vm8 = vcmp.eq.s32.totalorder %v7014_v1, %v4022_v63  ;;  %vm1403_vm9 = vcmp.eq.s32.totalorder %v7014_v1, %v4027_v5  ;;  %v7015_v6 = vld [vmem:[#allocation17_spill] sm:$0xff]  ;;  %7020 = vst [vmem:[#allocation61_spill] sm:$0xff] %v4857_v23 }
 0x4d3   :  { %v1132_v21 = vpop.permute.xlu2 %1131 }
 0x4d4   :  { %vm1620_vm4 = vcmp.eq.s32.totalorder %v1132_v21, %v4022_v63  ;;  %vm1621_vm5 = vcmp.eq.s32.totalorder %v1132_v21, %v4027_v5  ;;  %v1752_v21 = vsel %vm1302_vm6, %v3568_v34, 0.0 }
 0x4d5   :  { %v2070_v22 = vsel %vm1620_vm4, %v4581_v61, 0.0  ;;  %v2071_v31 = vsel %vm1621_vm5, %v4584_v43, 0.0 }
 0x4d6   :  { %v2647_v55 = vadd.f32 %v2071_v31, %v2070_v22  ;;  %v3569_v22 = vld [vmem:[#allocation5 + $0x128] sm:$0xff] }
 0x4d7   :  { %v1753_v31 = vsel %vm1303_vm7, %v3569_v22, 0.0  ;;  %v1853_v15 = vsel %vm1403_vm9, %v3569_v22, 0.0  ;;  %v1903_v49 = vsel %vm1453_vm11, %v3569_v22, 0.0  ;;  %v2103_v62 = vsel %vm1653_vm13, %v3569_v22, 0.0 }
 0x4d8   :  { %2648 = vadd.xlane.f32.xlu0 %v2647_v55  ;;  %v1852_v55 = vsel %vm1402_vm8, %v3568_v34, 0.0  ;;  %v2003_v17 = vsel %vm1553_vm15, %v3569_v22, 0.0  ;;  %v2053_v20 = vsel %vm1603_vm1, %v3569_v22, 0.0  ;;  %v4871_v14 = vadd.f32 %v2103_v62, %v2102_v44  ;;  %v4889_v62 = vld [vmem:[#allocation5 + $0x50] sm:$0xff]  ;;  %v4892_v22 = vld [vmem:[#allocation5 + $0x58] sm:$0xff] }
 0x4d9   :  { %1222 = vperm.xlu2 %3552, %v7015_v6   ;;  %1216 = vperm.xlu1 %3551, %v7015_v6   ;;  %v4873_v36 = vadd.f32 %v1753_v31, %v1752_v21  ;;  %v4875_v50 = vadd.f32 %v1853_v15, %v1852_v55  ;;  %v4877_v23 = vadd.f32 %v1903_v49, %v1902_v28  ;;  %v4920_v49 = vld [vmem:[#allocation5 + $0x68] sm:$0xff] }
 0x4da   :  { %v4881_v1 = vadd.f32 %v2003_v17, %v2002_v56  ;;  %v4883_v9 = vadd.f32 %v2053_v20, %v2052_v3  ;;  %v4895_v56 = vpop.xlane.xlu0 %2165  ;;  %v4899_v20 = vpop.permute.xlu1 %1094  ;;  %vm1584_vm8 = vcmp.eq.s32.totalorder %v4811_v53, %v4022_v63  ;;  %vm1585_vm9 = vcmp.eq.s32.totalorder %v4811_v53, %v4027_v5  ;;  %v4949_v53 = vld [vmem:[#allocation5] sm:$0xff] }
 0x4db   :  { %7024 = vst [vmem:[#allocation71_spill] sm:$0xff] %v4895_v56 }
 0x4dc   :  { %7021 = vst [vmem:[#allocation17_spill] sm:$0xff] %v4881_v1  ;;  %v7033_v1 = vld [vmem:[#allocation89_spill] sm:$0xff] }
 0x4dd   :  { %7022 = vst [vmem:[#allocation63_spill] sm:$0xff] %v4883_v9  ;;  %v4955_v9 = vld [vmem:[#allocation5 + $0x30] sm:$0xff]  ;;  %vm1362_vm0 = vcmp.eq.s32.totalorder %v7033_v1, %v4022_v63  ;;  %vm1363_vm1 = vcmp.eq.s32.totalorder %v7033_v1, %v4027_v5 }
 0x4e1   :  { %3555 = vset.pattern.permute.xlu2 %v3749_v2  ;;  %3554 = vset.pattern.permute.xlu1 %v3768_v8 }
 0x4e2   :  { %v4903_v3 = vpop.permute.xlu1 %1112  ;;  %v4912_v55 = vpop.xlane.xlu0 %2174 }
 0x4e3   :  { %v1150_v34 = vpop.permute.xlu2 %1149  ;;  %7027 = vst [vmem:[#allocation121_spill] sm:$0xff] %v4912_v55 }
 0x4e4   :  { %vm1626_vm2 = vcmp.eq.s32.totalorder %v1150_v34, %v4022_v63  ;;  %vm1627_vm3 = vcmp.eq.s32.totalorder %v1150_v34, %v4027_v5 }
 0x4e5   :  { %v2076_v21 = vsel %vm1626_vm2, %v4889_v62, 0.0  ;;  %v2077_v2 = vsel %vm1627_vm3, %v4892_v22, 0.0  ;;  %vm1462_vm2 = vcmp.eq.s32.totalorder %v4633_v40, %v4022_v63  ;;  %vm1463_vm3 = vcmp.eq.s32.totalorder %v4633_v40, %v4027_v5 }
 0x4e6   :  { %v2656_v8 = vadd.f32 %v2077_v2, %v2076_v21 }
 0x4e8   :  { %2657 = vadd.xlane.f32.xlu0 %v2656_v8 }
 0x4e9   :  { %1240 = vperm.xlu2 %3555, %v7015_v6   ;;  %1234 = vperm.xlu1 %3554, %v7015_v6  }
 0x4ea   :  { %v4923_v44 = vpop.xlane.xlu0 %2183 }
 0x4eb   :  { %v4907_v17 = vpop.permute.xlu1 %1125  ;;  %7028 = vst [vmem:[#allocation122_spill] sm:$0xff] %v4923_v44 }
 0x4ec   :  { %7025 = vst [vmem:[#allocation76_spill] sm:$0xff] %v4907_v17  ;;  %v4958_v17 = vld [vmem:[#allocation5 + $0x38] sm:$0xff] }
 0x4f1   :  { %3557 = vset.pattern.permute.xlu2 %v3780_v10  ;;  %3556 = vset.pattern.permute.xlu1 %v3765_v7  ;;  %v4917_v10 = vld [vmem:[#allocation5 + $0x60] sm:$0xff] }
 0x4f2   :  { %v4929_v8 = vpop.xlane.xlu0 %2192 }
 0x4f3   :  { %v1162_v7 = vpop.permute.xlu2 %1161  ;;  %7029 = vst [vmem:[#allocation123_spill] sm:$0xff] %v4929_v8 }
 0x4f4   :  { %vm1630_vm6 = vcmp.eq.s32.totalorder %v1162_v7, %v4022_v63  ;;  %vm1631_vm7 = vcmp.eq.s32.totalorder %v1162_v7, %v4027_v5  ;;  %v4939_v7 = vld [vmem:[#allocation5 + $0x90] sm:$0xff] }
 0x4f5   :  { %v2081_v21 = vsel %vm1631_vm7, %v4770_v60, 0.0  ;;  %vm1613_vm7 = vcmp.eq.s32.totalorder %v4659_v16, %v4027_v5 }
 0x4f9   :  { %1252 = vperm.xlu2 %3557, %v7015_v6   ;;  %1246 = vperm.xlu1 %3556, %v7015_v6  }
 0x4fb   :  { %v4910_v31 = vpop.permute.xlu1 %1143 }
 0x4fc   :  { %7026 = vst [vmem:[#allocation120_spill] sm:$0xff] %v4910_v31 }
 0x501   :  { %3558 = vset.pattern.permute.xlu1 %v3839_v24 }
 0x509   :  { %1264 = vperm.xlu1 %3558, %v7015_v6   ;;  %v2080_v6 = vsel %vm1630_vm6, %v4767_v39, 0.0  ;;  %vm1612_vm6 = vcmp.eq.s32.totalorder %v4659_v16, %v4022_v63 }
 0x50a   :  { %v2662_v2 = vadd.f32 %v2081_v21, %v2080_v6  ;;  %v7031_v6 = vld [vmem:[#allocation25_spill] sm:$0xff] }
 0x50b   :  { %v1156_v15 = vpop.permute.xlu1 %1155  ;;  %vm1272_vm12 = vcmp.eq.s32.totalorder %v7031_v6, %v4022_v63  ;;  %vm1273_vm13 = vcmp.eq.s32.totalorder %v7031_v6, %v4027_v5  ;;  %v7032_v6 = vld [vmem:[#allocation82_spill] sm:$0xff] }
 0x50c   :  { %vm1628_vm4 = vcmp.eq.s32.totalorder %v1156_v15, %v4022_v63  ;;  %vm1629_vm5 = vcmp.eq.s32.totalorder %v1156_v15, %v4027_v5  ;;  %v7030_v15 = vld [vmem:[#allocation11_spill] sm:$0xff]  ;;  %v1722_v31 = vsel %vm1272_vm12, %v4955_v9, 0.0  ;;  %v1723_v37 = vsel %vm1273_vm13, %v4958_v17, 0.0 }
 0x50d   :  { %v2078_v28 = vsel %vm1628_vm4, %v4917_v10, 0.0  ;;  %v2079_v24 = vsel %vm1629_vm5, %v4920_v49, 0.0  ;;  %vm1266_vm10 = vcmp.eq.s32.totalorder %v7030_v15, %v4022_v63  ;;  %vm1267_vm11 = vcmp.eq.s32.totalorder %v7030_v15, %v4027_v5 }
 0x50e   :  { %v2659_v34 = vadd.f32 %v2079_v24, %v2078_v28  ;;  %v2034_v28 = vsel %vm1584_vm8, %v4939_v7, 0.0  ;;  %v4942_v24 = vld [vmem:[#allocation5 + $0x98] sm:$0xff]  ;;  %v1716_v21 = vsel %vm1266_vm10, %v4949_v53, 0.0  ;;  %vm1312_vm14 = vcmp.eq.s32.totalorder %v7032_v6, %v4022_v63 }
 0x50f   :  { %vm1313_vm15 = vcmp.eq.s32.totalorder %v7032_v6, %v4027_v5  ;;  %vm1512_vm4 = vcmp.eq.s32.totalorder %v4641_v32, %v4022_v63  ;;  %vm1513_vm5 = vcmp.eq.s32.totalorder %v4641_v32, %v4027_v5  ;;  %vm1662_vm8 = vcmp.eq.s32.totalorder %v4671_v27, %v4022_v63 }
 0x510   :  { %2660 = vadd.xlane.f32.xlu0 %v2659_v34  ;;  %v2035_v34 = vsel %vm1585_vm9, %v4942_v24, 0.0  ;;  %vm1663_vm9 = vcmp.eq.s32.totalorder %v4671_v27, %v4027_v5 }
 0x511   :  { %v2593_v18 = vadd.f32 %v2035_v34, %v2034_v28  ;;  %v3580_v28 = vld [vmem:[#allocation5 + $0x170] sm:$0xff] }
 0x512   :  { %v1762_v34 = vsel %vm1312_vm14, %v3580_v28, 0.0  ;;  %v1912_v27 = vsel %vm1462_vm2, %v3580_v28, 0.0  ;;  %v1962_v6 = vsel %vm1512_vm4, %v3580_v28, 0.0  ;;  %v2062_v41 = vsel %vm1612_vm6, %v3580_v28, 0.0 }
 0x513   :  { %v2112_v30 = vsel %vm1662_vm8, %v3580_v28, 0.0  ;;  %vm1590_vm6 = vcmp.eq.s32.totalorder %v4793_v19, %v4022_v63 }
 0x518   :  { %2663 = vadd.xlane.f32.xlu0 %v2662_v2  ;;  %v4952_v2 = vld [vmem:[#allocation5 + $0x8] sm:$0xff] }
 0x519   :  { %v1717_v15 = vsel %vm1267_vm11, %v4952_v2, 0.0 }
 0x51a   :  { %v2116_v13 = vadd.f32 %v1717_v15, %v1716_v21  ;;  %v3581_v21 = vld [vmem:[#allocation5 + $0x178] sm:$0xff] }
 0x51b   :  { %v1763_v15 = vsel %vm1313_vm15, %v3581_v21, 0.0  ;;  %v1813_v16 = vsel %vm1363_vm1, %v3581_v21, 0.0  ;;  %v1174_v44 = vpop.permute.xlu1 %1173  ;;  %v1913_v55 = vsel %vm1463_vm3, %v3581_v21, 0.0  ;;  %v1963_v56 = vsel %vm1513_vm5, %v3581_v21, 0.0 }
 0x51c   :  { %v2063_v1 = vsel %vm1613_vm7, %v3581_v21, 0.0  ;;  %v2113_v35 = vsel %vm1663_vm9, %v3581_v21, 0.0  ;;  %vm1634_vm10 = vcmp.eq.s32.totalorder %v1174_v44, %v4022_v63  ;;  %vm1635_vm11 = vcmp.eq.s32.totalorder %v1174_v44, %v4027_v5  ;;  %v5041_v44 = vld [vmem:[#allocation5 + $0x10] sm:$0xff] }
 0x51d   :  { %v5011_v40 = vadd.f32 %v1763_v15, %v1762_v34  ;;  %v5015_v8 = vadd.f32 %v1913_v55, %v1912_v27  ;;  %v5017_v58 = vadd.f32 %v1963_v56, %v1962_v6  ;;  %v5019_v32 = vadd.f32 %v2063_v1, %v2062_v41  ;;  %v5044_v34 = vld [vmem:[#allocation5 + $0x18] sm:$0xff]  ;;  %v7042_v27 = vld [vmem:[#allocation28_spill] sm:$0xff]  ;;  %v7043_v6 = vld [vmem:[#allocation27_spill] sm:$0xff] }
 0x51e   :  { %v5021_v54 = vadd.f32 %v2113_v35, %v2112_v30  ;;  %v2085_v41 = vsel %vm1635_vm11, %v4942_v24, 0.0  ;;  %v5035_v35 = vld [vmem:[#allocation5 + $0x40] sm:$0xff]  ;;  %vm1609_vm1 = vcmp.eq.s32.totalorder %v4899_v20, %v4027_v5  ;;  %vm1278_vm2 = vcmp.eq.s32.totalorder %v7042_v27, %v4022_v63  ;;  %v5059_v1 = vld [vmem:[#allocation5 + $0x150] sm:$0xff] }
 0x51f   :  { %7035 = vst [vmem:[#allocation25_spill] sm:$0xff] %v5015_v8  ;;  %vm1279_vm3 = vcmp.eq.s32.totalorder %v7042_v27, %v4027_v5  ;;  %vm1276_vm4 = vcmp.eq.s32.totalorder %v7043_v6, %v4022_v63  ;;  %vm1277_vm5 = vcmp.eq.s32.totalorder %v7043_v6, %v4027_v5  ;;  %vm1591_vm7 = vcmp.eq.s32.totalorder %v4793_v19, %v4027_v5  ;;  %v5079_v27 = vld [vmem:[#allocation5 + $0xc0] sm:$0xff]  ;;  %v7059_v8 = vld [vmem:[#allocation42_spill] sm:$0xff] }
 0x520   :  { %2594 = vadd.xlane.f32.xlu0 %v2593_v18  ;;  %v4977_v18 = vpop.xlane.xlu0 %2201  ;;  %7036 = vst [vmem:[#allocation82_spill] sm:$0xff] %v5017_v58  ;;  %v2040_v6 = vsel %vm1590_vm6, %v5079_v27, 0.0  ;;  %v5137_v58 = vld [vmem:[#allocation5 + $0x118] sm:$0xff] }
 0x521   :  { %7034 = vst [vmem:[#allocation11_spill] sm:$0xff] %v4977_v18  ;;  %v2125_v18 = vadd.f32 %v1723_v37, %v1722_v31  ;;  %v7040_v37 = vld [vmem:[#allocation12_spill] sm:$0xff] }
 0x522   :  { %2117 = vadd.xlane.f32.xlu2 %v2116_v13  ;;  %v1812_v13 = vsel %vm1362_vm0, %v3580_v28, 0.0  ;;  %7037 = vst [vmem:[#allocation89_spill] sm:$0xff] %v5019_v32  ;;  %v7039_v28 = vld [vmem:[#allocation24_spill] sm:$0xff]  ;;  %vm1268_vm14 = vcmp.eq.s32.totalorder %v7040_v37, %v4022_v63  ;;  %vm1269_vm15 = vcmp.eq.s32.totalorder %v7040_v37, %v4027_v5  ;;  %vm1608_vm0 = vcmp.eq.s32.totalorder %v4899_v20, %v4022_v63 }
 0x523   :  { %v5013_v46 = vadd.f32 %v1813_v16, %v1812_v13  ;;  %7038 = vst [vmem:[#allocation124_spill] sm:$0xff] %v5021_v54  ;;  %vm1274_vm12 = vcmp.eq.s32.totalorder %v7039_v28, %v4022_v63  ;;  %vm1275_vm13 = vcmp.eq.s32.totalorder %v7039_v28, %v4027_v5  ;;  %v5038_v31 = vld [vmem:[#allocation5 + $0x48] sm:$0xff]  ;;  %v1719_v21 = vsel %vm1269_vm15, %v5044_v34, 0.0  ;;  %v5062_v28 = vld [vmem:[#allocation5 + $0x158] sm:$0xff]  ;;  %v5116_v54 = vld [vmem:[#allocation5 + $0xf0] sm:$0xff] }
 0x524   :  { %v1724_v30 = vsel %vm1274_vm12, %v5035_v35, 0.0  ;;  %v1725_v55 = vsel %vm1275_vm13, %v5038_v31, 0.0  ;;  %v2058_v20 = vsel %vm1608_vm0, %v5059_v1, 0.0  ;;  %v2059_v37 = vsel %vm1609_vm1, %v5062_v28, 0.0 }
 0x525   :  { %v2128_v13 = vadd.f32 %v1725_v55, %v1724_v30  ;;  %v1726_v30 = vsel %vm1276_vm4, %v4889_v62, 0.0  ;;  %v1727_v55 = vsel %vm1277_vm5, %v4892_v22, 0.0 }
 0x528   :  { %2696 = vadd.xlane.f32.xlu0 %v4871_v14  ;;  %v2084_v14 = vsel %vm1634_vm10, %v4939_v7, 0.0  ;;  %v5033_v56 = vpop.xlane.xlu0 %2210 }
 0x529   :  { %7041 = vst [vmem:[#allocation24_spill] sm:$0xff] %v5033_v56  ;;  %v2668_v15 = vadd.f32 %v2085_v41, %v2084_v14  ;;  %v1728_v14 = vsel %vm1278_vm2, %v4917_v10, 0.0  ;;  %v1729_v41 = vsel %vm1279_vm3, %v4920_v49, 0.0 }
 0x52a   :  { %2126 = vadd.xlane.f32.xlu2 %v2125_v18  ;;  %v1718_v18 = vsel %vm1268_vm14, %v5041_v44, 0.0 }
 0x52b   :  { %v2119_v16 = vadd.f32 %v1719_v21, %v1718_v18  ;;  %v2629_v21 = vadd.f32 %v2059_v37, %v2058_v20  ;;  %v5082_v20 = vld [vmem:[#allocation5 + $0xc8] sm:$0xff] }
 0x52c   :  { %v2041_v37 = vsel %vm1591_vm7, %v5082_v20, 0.0 }
 0x530   :  { %2669 = vadd.xlane.f32.xlu0 %v2668_v15  ;;  %v5069_v18 = vpop.xlane.xlu0 %2219  ;;  %v2134_v15 = vadd.f32 %v1729_v41, %v1728_v14  ;;  %v2602_v41 = vadd.f32 %v2041_v37, %v2040_v6  ;;  %v5100_v6 = vld [vmem:[#allocation5 + $0xb0] sm:$0xff] }
 0x531   :  { %7044 = vst [vmem:[#allocation12_spill] sm:$0xff] %v5069_v18  ;;  %v5134_v18 = vld [vmem:[#allocation5 + $0x110] sm:$0xff] }
 0x532   :  { %2129 = vadd.xlane.f32.xlu2 %v2128_v13  ;;  %v2131_v13 = vadd.f32 %v1727_v55, %v1726_v30 }
 0x533   :  { %2120 = vadd.xlane.f32.xlu1 %v2119_v16  ;;  %v7045_v16 = vld [vmem:[#allocation30_spill] sm:$0xff] }
 0x534   :  { %vm1284_vm8 = vcmp.eq.s32.totalorder %v7045_v16, %v4022_v63  ;;  %vm1285_vm9 = vcmp.eq.s32.totalorder %v7045_v16, %v4027_v5 }
 0x535   :  { %v1734_v19 = vsel %vm1284_vm8, %v4939_v7, 0.0  ;;  %v1735_v14 = vsel %vm1285_vm9, %v4942_v24, 0.0  ;;  %vm1314_vm8 = vcmp.eq.s32.totalorder %v7059_v8, %v4022_v63  ;;  %vm1315_vm9 = vcmp.eq.s32.totalorder %v7059_v8, %v4027_v5  ;;  %v7064_v8 = vld [vmem:[#allocation43_spill] sm:$0xff] }
 0x536   :  { %v2143_v55 = vadd.f32 %v1735_v14, %v1734_v19  ;;  %v5103_v19 = vld [vmem:[#allocation5 + $0xb8] sm:$0xff]  ;;  %v1765_v26 = vsel %vm1315_vm9, %v5168_v29, 0.0 }
 0x538   :  { %2630 = vadd.xlane.f32.xlu0 %v2629_v21  ;;  %v5087_v30 = vpop.xlane.xlu0 %2228  ;;  %v7047_v21 = vld [vmem:[#allocation33_spill] sm:$0xff] }
 0x539   :  { %7046 = vst [vmem:[#allocation28_spill] sm:$0xff] %v5087_v30  ;;  %vm1290_vm10 = vcmp.eq.s32.totalorder %v7047_v21, %v4022_v63  ;;  %vm1291_vm11 = vcmp.eq.s32.totalorder %v7047_v21, %v4027_v5  ;;  %v7049_v21 = vld [vmem:[#allocation36_spill] sm:$0xff] }
 0x53a   :  { %2135 = vadd.xlane.f32.xlu2 %v2134_v15  ;;  %v7048_v15 = vld [vmem:[#allocation32_spill] sm:$0xff]  ;;  %v1741_v16 = vsel %vm1291_vm11, %v5082_v20, 0.0  ;;  %vm1296_vm14 = vcmp.eq.s32.totalorder %v7049_v21, %v4022_v63  ;;  %vm1297_vm15 = vcmp.eq.s32.totalorder %v7049_v21, %v4027_v5 }
 0x53b   :  { %2132 = vadd.xlane.f32.xlu1 %v2131_v13  ;;  %vm1288_vm12 = vcmp.eq.s32.totalorder %v7048_v15, %v4022_v63  ;;  %vm1289_vm13 = vcmp.eq.s32.totalorder %v7048_v15, %v4027_v5  ;;  %v1740_v13 = vsel %vm1290_vm10, %v5079_v27, 0.0  ;;  %v5114_v15 = vpop.permute.xlu1 %1185  ;;  %v5125_v21 = vld [vmem:[#allocation5 + $0xe8] sm:$0xff] }
 0x53c   :  { %v1738_v37 = vsel %vm1288_vm12, %v5100_v6, 0.0  ;;  %v1739_v14 = vsel %vm1289_vm13, %v5103_v19, 0.0  ;;  %7051 = vst [vmem:[#allocation27_spill] sm:$0xff] %v5114_v15  ;;  %vm1318_vm12 = vcmp.eq.s32.totalorder %v7064_v8, %v4022_v63  ;;  %vm1319_vm13 = vcmp.eq.s32.totalorder %v7064_v8, %v4027_v5 }
 0x53d   :  { %v1769_v8 = vsel %vm1319_vm13, %v5044_v34, 0.0 }
 0x540   :  { %2603 = vadd.xlane.f32.xlu0 %v2602_v41  ;;  %v2152_v41 = vadd.f32 %v1741_v16, %v1740_v13  ;;  %v1746_v13 = vsel %vm1296_vm14, %v5116_v54, 0.0  ;;  %v5119_v16 = vld [vmem:[#allocation5 + $0xf8] sm:$0xff] }
 0x542   :  { %2144 = vadd.xlane.f32.xlu2 %v2143_v55  ;;  %v2149_v55 = vadd.f32 %v1739_v14, %v1738_v37  ;;  %v1747_v37 = vsel %vm1297_vm15, %v5119_v16, 0.0  ;;  %v5122_v14 = vld [vmem:[#allocation5 + $0xe0] sm:$0xff] }
 0x543   :  { %2141 = vadd.xlane.f32.xlu1 %v4739_v48  ;;  %v7050_v48 = vld [vmem:[#allocation35_spill] sm:$0xff]  ;;  %v5132_v15 = vpop.permute.xlu1 %1203 }
 0x544   :  { %vm1294_vm0 = vcmp.eq.s32.totalorder %v7050_v48, %v4022_v63  ;;  %vm1295_vm1 = vcmp.eq.s32.totalorder %v7050_v48, %v4027_v5  ;;  %v2161_v48 = vadd.f32 %v1747_v37, %v1746_v13  ;;  %7053 = vst [vmem:[#allocation30_spill] sm:$0xff] %v5132_v15  ;;  %v7055_v37 = vld [vmem:[#allocation38_spill] sm:$0xff] }
 0x545   :  { %v1745_v32 = vsel %vm1295_vm1, %v5125_v21, 0.0  ;;  %vm1306_vm6 = vcmp.eq.s32.totalorder %v7055_v37, %v4022_v63  ;;  %vm1307_vm7 = vcmp.eq.s32.totalorder %v7055_v37, %v4027_v5  ;;  %v5165_v37 = vld [vmem:[#allocation5 + $0x180] sm:$0xff] }
 0x54a   :  { %2153 = vadd.xlane.f32.xlu2 %v2152_v41  ;;  %v1744_v41 = vsel %vm1294_vm0, %v5122_v14, 0.0 }
 0x54b   :  { %2150 = vadd.xlane.f32.xlu1 %v2149_v55  ;;  %v2158_v30 = vadd.f32 %v1745_v32, %v1744_v41  ;;  %v7052_v55 = vld [vmem:[#allocation37_spill] sm:$0xff]  ;;  %v7054_v32 = vld [vmem:[#allocation40_spill] sm:$0xff] }
 0x54c   :  { %vm1300_vm2 = vcmp.eq.s32.totalorder %v7052_v55, %v4022_v63  ;;  %vm1301_vm3 = vcmp.eq.s32.totalorder %v7052_v55, %v4027_v5  ;;  %vm1308_vm4 = vcmp.eq.s32.totalorder %v7054_v32, %v4022_v63  ;;  %vm1309_vm5 = vcmp.eq.s32.totalorder %v7054_v32, %v4027_v5  ;;  %v5156_v55 = vld [vmem:[#allocation5 + $0x148] sm:$0xff] }
 0x54d   :  { %v1750_v56 = vsel %vm1300_vm2, %v5134_v18, 0.0  ;;  %v1751_v25 = vsel %vm1301_vm3, %v5137_v58, 0.0  ;;  %v1758_v41 = vsel %vm1308_vm4, %v5059_v1, 0.0  ;;  %7058 = vst [vmem:[#allocation36_spill] sm:$0xff] %v5156_v55 }
 0x54e   :  { %v2167_v13 = vadd.f32 %v1751_v25, %v1750_v56  ;;  %v1759_v25 = vsel %vm1309_vm5, %v5062_v28, 0.0  ;;  %v5153_v56 = vld [vmem:[#allocation5 + $0x140] sm:$0xff] }
 0x54f   :  { %7057 = vst [vmem:[#allocation32_spill] sm:$0xff] %v5153_v56  ;;  %v2179_v32 = vadd.f32 %v1759_v25, %v1758_v41  ;;  %v5171_v41 = vpop.permute.xlu2 %1179  ;;  %v5173_v25 = vpop.xlane.xlu0 %2237 }
 0x550   :  { %7061 = vst [vmem:[#allocation37_spill] sm:$0xff] %v5171_v41  ;;  %v1768_v41 = vsel %vm1318_vm12, %v5041_v44, 0.0 }
 0x551   :  { %7062 = vst [vmem:[#allocation40_spill] sm:$0xff] %v5173_v25  ;;  %v7067_v25 = vld [vmem:[#allocation45_spill] sm:$0xff] }
 0x552   :  { %2162 = vadd.xlane.f32.xlu2 %v2161_v48  ;;  %v1756_v48 = vsel %vm1306_vm6, %v5153_v56, 0.0  ;;  %vm1324_vm4 = vcmp.eq.s32.totalorder %v7067_v25, %v4022_v63  ;;  %vm1325_vm5 = vcmp.eq.s32.totalorder %v7067_v25, %v4027_v5  ;;  %vm1614_vm6 = vcmp.eq.s32.totalorder %v4903_v3, %v4022_v63 }
 0x553   :  { %2159 = vadd.xlane.f32.xlu1 %v2158_v30  ;;  %v5149_v30 = vpop.permute.xlu1 %1216 }
 0x554   :  { %7056 = vst [vmem:[#allocation33_spill] sm:$0xff] %v5149_v30  ;;  %v1764_v30 = vsel %vm1314_vm8, %v5165_v37, 0.0 }
 0x55a   :  { %2171 = vadd.xlane.f32.xlu2 %v4873_v36  ;;  %v1757_v36 = vsel %vm1307_vm7, %v5156_v55, 0.0  ;;  %vm1615_vm7 = vcmp.eq.s32.totalorder %v4903_v3, %v4027_v5 }
 0x55b   :  { %2168 = vadd.xlane.f32.xlu1 %v2167_v13  ;;  %v2176_v15 = vadd.f32 %v1757_v36, %v1756_v48  ;;  %v5163_v13 = vpop.permute.xlu1 %1234  ;;  %v2188_v48 = vadd.f32 %v1765_v26, %v1764_v30  ;;  %v7063_v36 = vld [vmem:[#allocation44_spill] sm:$0xff] }
 0x55c   :  { %7060 = vst [vmem:[#allocation35_spill] sm:$0xff] %v5163_v13  ;;  %vm1320_vm10 = vcmp.eq.s32.totalorder %v7063_v36, %v4022_v63  ;;  %vm1321_vm11 = vcmp.eq.s32.totalorder %v7063_v36, %v4027_v5 }
 0x55d   :  { %v1770_v26 = vsel %vm1320_vm10, %v4581_v61, 0.0  ;;  %v1771_v30 = vsel %vm1321_vm11, %v4584_v43, 0.0  ;;  %v7065_v61 = vld [vmem:[#allocation47_spill] sm:$0xff]  ;;  %v5198_v43 = vpop.xlane.xlu0 %2246  ;;  %vm1596_vm10 = vcmp.eq.s32.totalorder %v4797_v33, %v4022_v63  ;;  %vm1597_vm11 = vcmp.eq.s32.totalorder %v4797_v33, %v4027_v5 }
 0x55e   :  { %vm1326_vm2 = vcmp.eq.s32.totalorder %v7065_v61, %v4022_v63  ;;  %vm1327_vm3 = vcmp.eq.s32.totalorder %v7065_v61, %v4027_v5  ;;  %7066 = vst [vmem:[#allocation38_spill] sm:$0xff] %v5198_v43  ;;  %v2064_v61 = vsel %vm1614_vm6, %v5165_v37, 0.0  ;;  %v2047_v33 = vsel %vm1597_vm11, %v5119_v16, 0.0 }
 0x562   :  { %2180 = vadd.xlane.f32.xlu2 %v2179_v32  ;;  %v1192_v32 = vpop.permute.xlu2 %1191 }
 0x563   :  { %2177 = vadd.xlane.f32.xlu1 %v2176_v15  ;;  %vm1640_vm0 = vcmp.eq.s32.totalorder %v1192_v32, %v4022_v63  ;;  %vm1641_vm1 = vcmp.eq.s32.totalorder %v1192_v32, %v4027_v5 }
 0x564   :  { %v2090_v32 = vsel %vm1640_vm0, %v5079_v27, 0.0 }
 0x56a   :  { %2189 = vadd.xlane.f32.xlu2 %v2188_v48 }
 0x56b   :  { %v1247_v15 = vpop.permute.xlu1 %1246  ;;  %2186 = vadd.xlane.f32.xlu1 %v5011_v40  ;;  %v2197_v40 = vadd.f32 %v1771_v30, %v1770_v26  ;;  %v1777_v26 = vsel %vm1327_vm3, %v4892_v22, 0.0  ;;  %v1210_v30 = vpop.permute.xlu2 %1209 }
 0x56c   :  { %vm1658_vm14 = vcmp.eq.s32.totalorder %v1247_v15, %v4022_v63  ;;  %vm1659_vm15 = vcmp.eq.s32.totalorder %v1247_v15, %v4027_v5  ;;  %v2194_v15 = vadd.f32 %v1769_v8, %v1768_v41  ;;  %v1776_v41 = vsel %vm1326_vm2, %v4889_v62, 0.0 }
 0x56d   :  { %v2108_v48 = vsel %vm1658_vm14, %v5059_v1, 0.0  ;;  %v2109_v36 = vsel %vm1659_vm15, %v5062_v28, 0.0  ;;  %v2206_v25 = vadd.f32 %v1777_v26, %v1776_v41  ;;  %vm1646_vm0 = vcmp.eq.s32.totalorder %v1210_v30, %v4022_v63 }
 0x56e   :  { %v2704_v13 = vadd.f32 %v2109_v36, %v2108_v48  ;;  %v1774_v48 = vsel %vm1324_vm4, %v5035_v35, 0.0  ;;  %v1775_v36 = vsel %vm1325_vm5, %v5038_v31, 0.0 }
 0x570   :  { %2705 = vadd.xlane.f32.xlu0 %v2704_v13  ;;  %v2091_v13 = vsel %vm1641_vm1, %v5082_v20, 0.0  ;;  %vm1647_vm1 = vcmp.eq.s32.totalorder %v1210_v30, %v4027_v5 }
 0x571   :  { %v2677_v8 = vadd.f32 %v2091_v13, %v2090_v32  ;;  %v2065_v32 = vsel %vm1615_vm7, %v5168_v29, 0.0  ;;  %v5220_v13 = vpop.xlane.xlu0 %2255  ;;  %v2097_v30 = vsel %vm1647_vm1, %v5119_v16, 0.0 }
 0x572   :  { %2198 = vadd.xlane.f32.xlu2 %v2197_v40  ;;  %v2203_v40 = vadd.f32 %v1775_v36, %v1774_v48  ;;  %7069 = vst [vmem:[#allocation42_spill] sm:$0xff] %v5220_v13  ;;  %v2638_v26 = vadd.f32 %v2065_v32, %v2064_v61  ;;  %v7071_v36 = vld [vmem:[#allocation52_spill] sm:$0xff]  ;;  %v5245_v32 = vld [vmem:[#allocation5 + $0xa0] sm:$0xff]  ;;  %v7079_v13 = vld [vmem:[#allocation57_spill] sm:$0xff] }
 0x573   :  { %2195 = vadd.xlane.f32.xlu1 %v2194_v15  ;;  %v7068_v15 = vld [vmem:[#allocation48_spill] sm:$0xff]  ;;  %v5222_v43 = vpop.permute.xlu2 %1222  ;;  %vm1338_vm12 = vcmp.eq.s32.totalorder %v7071_v36, %v4022_v63  ;;  %vm1339_vm13 = vcmp.eq.s32.totalorder %v7071_v36, %v4027_v5  ;;  %vm1350_vm6 = vcmp.eq.s32.totalorder %v7079_v13, %v4022_v63  ;;  %vm1351_vm7 = vcmp.eq.s32.totalorder %v7079_v13, %v4027_v5 }
 0x574   :  { %vm1330_vm8 = vcmp.eq.s32.totalorder %v7068_v15, %v4022_v63  ;;  %vm1331_vm9 = vcmp.eq.s32.totalorder %v7068_v15, %v4027_v5  ;;  %7070 = vst [vmem:[#allocation44_spill] sm:$0xff] %v5222_v43  ;;  %v1789_v15 = vsel %vm1339_vm13, %v5103_v19, 0.0  ;;  %v7076_v43 = vld [vmem:[#allocation39_spill] sm:$0xff] }
 0x575   :  { %v1780_v3 = vsel %vm1330_vm8, %v4767_v39, 0.0  ;;  %v1781_v41 = vsel %vm1331_vm9, %v4770_v60, 0.0  ;;  %vm1342_vm4 = vcmp.eq.s32.totalorder %v7076_v43, %v4022_v63  ;;  %vm1343_vm5 = vcmp.eq.s32.totalorder %v7076_v43, %v4027_v5 }
 0x576   :  { %v2212_v48 = vadd.f32 %v1781_v41, %v1780_v3  ;;  %v5248_v3 = vld [vmem:[#allocation5 + $0xa8] sm:$0xff] }
 0x578   :  { %2678 = vadd.xlane.f32.xlu0 %v2677_v8  ;;  %v7072_v8 = vld [vmem:[#allocation50_spill] sm:$0xff] }
 0x579   :  { %vm1336_vm14 = vcmp.eq.s32.totalorder %v7072_v8, %v4022_v63  ;;  %vm1337_vm15 = vcmp.eq.s32.totalorder %v7072_v8, %v4027_v5 }
 0x57a   :  { %2207 = vadd.xlane.f32.xlu2 %v2206_v25  ;;  %v2046_v25 = vsel %vm1596_vm10, %v5116_v54, 0.0  ;;  %v1787_v41 = vsel %vm1337_vm15, %v5248_v3, 0.0 }
 0x57b   :  { %2204 = vadd.xlane.f32.xlu1 %v2203_v40  ;;  %v1788_v40 = vsel %vm1338_vm12, %v5100_v6, 0.0  ;;  %v5243_v61 = vpop.permute.xlu2 %1240  ;;  %v2611_v36 = vadd.f32 %v2047_v33, %v2046_v25  ;;  %v2096_v25 = vsel %vm1646_vm0, %v5116_v54, 0.0 }
 0x57c   :  { %7073 = vst [vmem:[#allocation43_spill] sm:$0xff] %v5243_v61  ;;  %v7075_v61 = vld [vmem:[#allocation54_spill] sm:$0xff]  ;;  %v2686_v43 = vadd.f32 %v2097_v30, %v2096_v25  ;;  %v1800_v25 = vsel %vm1350_vm6, %v5134_v18, 0.0  ;;  %v1801_v30 = vsel %vm1351_vm7, %v5137_v58, 0.0 }
 0x57d   :  { %vm1344_vm2 = vcmp.eq.s32.totalorder %v7075_v61, %v4022_v63  ;;  %vm1345_vm3 = vcmp.eq.s32.totalorder %v7075_v61, %v4027_v5 }
 0x57e   :  { %v1794_v33 = vsel %vm1344_vm2, %v5122_v14, 0.0 }
 0x580   :  { %2639 = vadd.xlane.f32.xlu0 %v2638_v26  ;;  %v5251_v26 = vpop.xlane.xlu0 %2264 }
 0x581   :  { %7074 = vst [vmem:[#allocation47_spill] sm:$0xff] %v5251_v26 }
 0x582   :  { %2216 = vadd.xlane.f32.xlu2 %v4741_v51  ;;  %v1786_v51 = vsel %vm1336_vm14, %v5245_v32, 0.0 }
 0x583   :  { %2213 = vadd.xlane.f32.xlu1 %v2212_v48  ;;  %v2224_v48 = vadd.f32 %v1789_v15, %v1788_v40  ;;  %v2221_v8 = vadd.f32 %v1787_v41, %v1786_v51  ;;  %v1795_v40 = vsel %vm1345_vm3, %v5125_v21, 0.0  ;;  %v5267_v15 = vpop.permute.xlu2 %1252  ;;  %v5269_v51 = vld [vmem:[#allocation5 + $0xd0] sm:$0xff]  ;;  %v5272_v41 = vld [vmem:[#allocation5 + $0xd8] sm:$0xff] }
 0x584   :  { %7077 = vst [vmem:[#allocation45_spill] sm:$0xff] %v5267_v15  ;;  %v1792_v61 = vsel %vm1342_vm4, %v5269_v51, 0.0  ;;  %v2233_v26 = vadd.f32 %v1795_v40, %v1794_v33  ;;  %v7080_v15 = vld [vmem:[#allocation55_spill] sm:$0xff] }
 0x585   :  { %vm1348_vm8 = vcmp.eq.s32.totalorder %v7080_v15, %v4022_v63  ;;  %vm1349_vm9 = vcmp.eq.s32.totalorder %v7080_v15, %v4027_v5  ;;  %v5289_v40 = vld [vmem:[#allocation5 + $0x100] sm:$0xff]  ;;  %v7083_v15 = vld [vmem:[#allocation58_spill] sm:$0xff] }
 0x586   :  { %vm1354_vm12 = vcmp.eq.s32.totalorder %v7083_v15, %v4022_v63  ;;  %vm1355_vm13 = vcmp.eq.s32.totalorder %v7083_v15, %v4027_v5 }
 0x588   :  { %2612 = vadd.xlane.f32.xlu0 %v2611_v36  ;;  %v1793_v36 = vsel %vm1343_vm5, %v5272_v41, 0.0 }
 0x58a   :  { %2225 = vadd.xlane.f32.xlu2 %v2224_v48  ;;  %v5275_v48 = vpop.xlane.xlu0 %2273 }
 0x58b   :  { %2222 = vadd.xlane.f32.xlu1 %v2221_v8  ;;  %7078 = vst [vmem:[#allocation48_spill] sm:$0xff] %v5275_v48  ;;  %v2230_v8 = vadd.f32 %v1793_v36, %v1792_v61  ;;  %v1798_v61 = vsel %vm1348_vm8, %v5289_v40, 0.0  ;;  %v5292_v36 = vld [vmem:[#allocation5 + $0x108] sm:$0xff]  ;;  %v7082_v48 = vld [vmem:[#allocation59_spill] sm:$0xff] }
 0x58c   :  { %v1799_v13 = vsel %vm1349_vm9, %v5292_v36, 0.0  ;;  %vm1356_vm10 = vcmp.eq.s32.totalorder %v7082_v48, %v4022_v63  ;;  %vm1357_vm11 = vcmp.eq.s32.totalorder %v7082_v48, %v4027_v5 }
 0x590   :  { %2687 = vadd.xlane.f32.xlu0 %v2686_v43  ;;  %v2239_v43 = vadd.f32 %v1799_v13, %v1798_v61  ;;  %v5310_v13 = vld [vmem:[#allocation5 + $0x138] sm:$0xff] }
 0x591   :  { %v1805_v48 = vsel %vm1355_vm13, %v5310_v13, 0.0 }
 0x592   :  { %2234 = vadd.xlane.f32.xlu2 %v2233_v26  ;;  %v2242_v26 = vadd.f32 %v1801_v30, %v1800_v25  ;;  %v5307_v30 = vld [vmem:[#allocation5 + $0x130] sm:$0xff] }
 0x593   :  { %2231 = vadd.xlane.f32.xlu1 %v2230_v8  ;;  %v1806_v8 = vsel %vm1356_vm10, %v5153_v56, 0.0  ;;  %v1804_v61 = vsel %vm1354_vm12, %v5307_v30, 0.0  ;;  %v5324_v56 = vld [vmem:[#allocation5 + $0x168] sm:$0xff] }
 0x594   :  { %v2248_v45 = vadd.f32 %v1805_v48, %v1804_v61 }
 0x595   :  { %v5287_v33 = vpop.xlane.xlu2 %2117 }
 0x596   :  { %7081 = vst [vmem:[#allocation52_spill] sm:$0xff] %v5287_v33  ;;  %v1807_v33 = vsel %vm1357_vm11, %v5156_v55, 0.0 }
 0x597   :  { %v2251_v38 = vadd.f32 %v1807_v33, %v1806_v8  ;;  %v7089_v8 = vld [vmem:[#allocation64_spill] sm:$0xff] }
 0x598   :  { %vm1368_vm0 = vcmp.eq.s32.totalorder %v7089_v8, %v4022_v63  ;;  %vm1369_vm1 = vcmp.eq.s32.totalorder %v7089_v8, %v4027_v5 }
 0x599   :  { %v1818_v61 = vsel %vm1368_vm0, %v5041_v44, 0.0  ;;  %v1819_v48 = vsel %vm1369_vm1, %v5044_v34, 0.0 }
 0x59a   :  { %2243 = vadd.xlane.f32.xlu2 %v2242_v26  ;;  %v5313_v26 = vpop.permute.xlu1 %1264 }
 0x59b   :  { %2240 = vadd.xlane.f32.xlu1 %v2239_v43  ;;  %7085 = vst [vmem:[#allocation54_spill] sm:$0xff] %v5313_v26  ;;  %v7086_v43 = vld [vmem:[#allocation60_spill] sm:$0xff] }
 0x59c   :  { %vm1360_vm14 = vcmp.eq.s32.totalorder %v7086_v43, %v4022_v63  ;;  %vm1361_vm15 = vcmp.eq.s32.totalorder %v7086_v43, %v4027_v5 }
 0x59d   :  { %v5305_v25 = vpop.xlane.xlu2 %2126  ;;  %v1811_v26 = vsel %vm1361_vm15, %v5324_v56, 0.0 }
 0x59e   :  { %7084 = vst [vmem:[#allocation50_spill] sm:$0xff] %v5305_v25  ;;  %v5321_v25 = vld [vmem:[#allocation5 + $0x160] sm:$0xff] }
 0x59f   :  { %v1810_v55 = vsel %vm1360_vm14, %v5321_v25, 0.0 }
 0x5a2   :  { %2252 = vadd.xlane.f32.xlu2 %v2251_v38  ;;  %v2257_v38 = vadd.f32 %v1811_v26, %v1810_v55 }
 0x5a3   :  { %2249 = vadd.xlane.f32.xlu1 %v2248_v45  ;;  %v7090_v45 = vld [vmem:[#allocation62_spill] sm:$0xff] }
 0x5a4   :  { %vm1366_vm2 = vcmp.eq.s32.totalorder %v7090_v45, %v4022_v63  ;;  %vm1367_vm3 = vcmp.eq.s32.totalorder %v7090_v45, %v4027_v5 }
 0x5a5   :  { %v5319_v15 = vpop.xlane.xlu2 %2129  ;;  %v1816_v26 = vsel %vm1366_vm2, %v4949_v53, 0.0  ;;  %v1817_v43 = vsel %vm1367_vm3, %v4952_v2, 0.0 }
 0x5a6   :  { %7087 = vst [vmem:[#allocation39_spill] sm:$0xff] %v5319_v15  ;;  %v5327_v33 = vpop.xlane.xlu1 %2120  ;;  %v2266_v15 = vadd.f32 %v1817_v43, %v1816_v26 }
 0x5a7   :  { %7088 = vst [vmem:[#allocation57_spill] sm:$0xff] %v5327_v33  ;;  %v7093_v33 = vld [vmem:[#allocation67_spill] sm:$0xff] }
 0x5a8   :  { %vm1374_vm4 = vcmp.eq.s32.totalorder %v7093_v33, %v4022_v63  ;;  %vm1375_vm5 = vcmp.eq.s32.totalorder %v7093_v33, %v4027_v5 }
 0x5a9   :  { %v1824_v45 = vsel %vm1374_vm4, %v5035_v35, 0.0  ;;  %v7097_v35 = vld [vmem:[#allocation70_spill] sm:$0xff] }
 0x5aa   :  { %2261 = vadd.xlane.f32.xlu2 %v5013_v46  ;;  %v2269_v46 = vadd.f32 %v1819_v48, %v1818_v61  ;;  %vm1378_vm10 = vcmp.eq.s32.totalorder %v7097_v35, %v4022_v63  ;;  %vm1379_vm11 = vcmp.eq.s32.totalorder %v7097_v35, %v4027_v5 }
 0x5ab   :  { %2258 = vadd.xlane.f32.xlu1 %v2257_v38  ;;  %v7094_v38 = vld [vmem:[#allocation13_spill] sm:$0xff] }
 0x5ac   :  { %vm1372_vm6 = vcmp.eq.s32.totalorder %v7094_v38, %v4022_v63  ;;  %vm1373_vm7 = vcmp.eq.s32.totalorder %v7094_v38, %v4027_v5  ;;  %v1828_v38 = vsel %vm1378_vm10, %v4917_v10, 0.0 }
 0x5ad   :  { %v5340_v55 = vpop.xlane.xlu2 %2135  ;;  %v1822_v48 = vsel %vm1372_vm6, %v4955_v9, 0.0  ;;  %v1823_v26 = vsel %vm1373_vm7, %v4958_v17, 0.0 }
 0x5ae   :  { %7091 = vst [vmem:[#allocation55_spill] sm:$0xff] %v5340_v55  ;;  %v5344_v8 = vpop.xlane.xlu1 %2132  ;;  %v1825_v55 = vsel %vm1375_vm5, %v5038_v31, 0.0 }
 0x5af   :  { %7092 = vst [vmem:[#allocation59_spill] sm:$0xff] %v5344_v8  ;;  %v2278_v33 = vadd.f32 %v1825_v55, %v1824_v45  ;;  %v7096_v8 = vld [vmem:[#allocation72_spill] sm:$0xff]  ;;  %v1829_v45 = vsel %vm1379_vm11, %v4920_v49, 0.0 }
 0x5b0   :  { %vm1380_vm8 = vcmp.eq.s32.totalorder %v7096_v8, %v4022_v63  ;;  %vm1381_vm9 = vcmp.eq.s32.totalorder %v7096_v8, %v4027_v5 }
 0x5b1   :  { %v1830_v31 = vsel %vm1380_vm8, %v4767_v39, 0.0  ;;  %v7101_v39 = vld [vmem:[#allocation73_spill] sm:$0xff] }
 0x5b2   :  { %2270 = vadd.xlane.f32.xlu2 %v2269_v46  ;;  %v2275_v46 = vadd.f32 %v1823_v26, %v1822_v48  ;;  %v2284_v26 = vadd.f32 %v1829_v45, %v1828_v38  ;;  %vm1384_vm14 = vcmp.eq.s32.totalorder %v7101_v39, %v4022_v63  ;;  %vm1385_vm15 = vcmp.eq.s32.totalorder %v7101_v39, %v4027_v5 }
 0x5b3   :  { %2267 = vadd.xlane.f32.xlu1 %v2266_v15  ;;  %v1831_v15 = vsel %vm1381_vm9, %v4770_v60, 0.0 }
 0x5b4   :  { %v2287_v8 = vadd.f32 %v1831_v15, %v1830_v31  ;;  %v1834_v31 = vsel %vm1384_vm14, %v4939_v7, 0.0  ;;  %v1835_v15 = vsel %vm1385_vm15, %v4942_v24, 0.0 }
 0x5b5   :  { %v5356_v61 = vpop.xlane.xlu2 %2144 }
 0x5b6   :  { %7095 = vst [vmem:[#allocation58_spill] sm:$0xff] %v5356_v61  ;;  %v5360_v43 = vpop.xlane.xlu1 %2141  ;;  %v7119_v61 = vld [vmem:[#allocation14_spill] sm:$0xff] }
 0x5ba   :  { %2279 = vadd.xlane.f32.xlu2 %v2278_v33  ;;  %v7100_v33 = vld [vmem:[#allocation75_spill] sm:$0xff] }
 0x5bb   :  { %2276 = vadd.xlane.f32.xlu1 %v2275_v46  ;;  %vm1386_vm12 = vcmp.eq.s32.totalorder %v7100_v33, %v4022_v63  ;;  %vm1387_vm13 = vcmp.eq.s32.totalorder %v7100_v33, %v4027_v5  ;;  %v7104_v33 = vld [vmem:[#allocation41_spill] sm:$0xff] }
 0x5bc   :  { %v1836_v60 = vsel %vm1386_vm12, %v5245_v32, 0.0  ;;  %v1837_v46 = vsel %vm1387_vm13, %v5248_v3, 0.0  ;;  %vm1392_vm0 = vcmp.eq.s32.totalorder %v7104_v33, %v4022_v63  ;;  %vm1393_vm1 = vcmp.eq.s32.totalorder %v7104_v33, %v4027_v5 }
 0x5bd   :  { %v5372_v55 = vpop.xlane.xlu2 %2153  ;;  %v2296_v45 = vadd.f32 %v1837_v46, %v1836_v60  ;;  %v1842_v39 = vsel %vm1392_vm0, %v5269_v51, 0.0 }
 0x5be   :  { %7098 = vst [vmem:[#allocation60_spill] sm:$0xff] %v5372_v55  ;;  %v5376_v48 = vpop.xlane.xlu1 %2150 }
 0x5bf   :  { %7099 = vst [vmem:[#allocation64_spill] sm:$0xff] %v5376_v48 }
 0x5c2   :  { %2288 = vadd.xlane.f32.xlu2 %v2287_v8  ;;  %v2293_v8 = vadd.f32 %v1835_v15, %v1834_v31 }
 0x5c3   :  { %2285 = vadd.xlane.f32.xlu1 %v2284_v26  ;;  %v7105_v26 = vld [vmem:[#allocation77_spill] sm:$0xff] }
 0x5c4   :  { %vm1390_vm2 = vcmp.eq.s32.totalorder %v7105_v26, %v4022_v63  ;;  %vm1391_vm3 = vcmp.eq.s32.totalorder %v7105_v26, %v4027_v5 }
 0x5c5   :  { %v5388_v35 = vpop.xlane.xlu2 %2162  ;;  %v1840_v46 = vsel %vm1390_vm2, %v5079_v27, 0.0  ;;  %v1841_v31 = vsel %vm1391_vm3, %v5082_v20, 0.0  ;;  %vm1422_vm2 = vcmp.eq.s32.totalorder %v7119_v61, %v4022_v63  ;;  %vm1423_vm3 = vcmp.eq.s32.totalorder %v7119_v61, %v4027_v5 }
 0x5c6   :  { %7102 = vst [vmem:[#allocation62_spill] sm:$0xff] %v5388_v35  ;;  %v5392_v38 = vpop.xlane.xlu1 %2159  ;;  %v1843_v35 = vsel %vm1393_vm1, %v5272_v41, 0.0  ;;  %v2302_v33 = vadd.f32 %v1841_v31, %v1840_v46 }
 0x5c7   :  { %7103 = vst [vmem:[#allocation67_spill] sm:$0xff] %v5392_v38  ;;  %v7108_v38 = vld [vmem:[#allocation83_spill] sm:$0xff] }
 0x5c8   :  { %vm1398_vm4 = vcmp.eq.s32.totalorder %v7108_v38, %v4022_v63  ;;  %vm1399_vm5 = vcmp.eq.s32.totalorder %v7108_v38, %v4027_v5 }
 0x5c9   :  { %v1848_v26 = vsel %vm1398_vm4, %v5289_v40, 0.0 }
 0x5ca   :  { %2297 = vadd.xlane.f32.xlu2 %v2296_v45  ;;  %v2305_v45 = vadd.f32 %v1843_v35, %v1842_v39 }
 0x5cb   :  { %2294 = vadd.xlane.f32.xlu1 %v2293_v8  ;;  %v7109_v8 = vld [vmem:[#allocation81_spill] sm:$0xff] }
 0x5cc   :  { %vm1396_vm6 = vcmp.eq.s32.totalorder %v7109_v8, %v4022_v63  ;;  %vm1397_vm7 = vcmp.eq.s32.totalorder %v7109_v8, %v4027_v5 }
 0x5cd   :  { %v5404_v60 = vpop.xlane.xlu2 %2171  ;;  %v1846_v39 = vsel %vm1396_vm6, %v5116_v54, 0.0  ;;  %v1847_v46 = vsel %vm1397_vm7, %v5119_v16, 0.0  ;;  %vm1428_vm6 = vcmp.eq.s32.totalorder %v4417_v12, %v4022_v63  ;;  %vm1429_vm7 = vcmp.eq.s32.totalorder %v4417_v12, %v4027_v5 }
 0x5ce   :  { %7106 = vst [vmem:[#allocation13_spill] sm:$0xff] %v5404_v60  ;;  %v5408_v15 = vpop.xlane.xlu1 %2168  ;;  %v1849_v60 = vsel %vm1399_vm5, %v5292_v36, 0.0 }
 0x5cf   :  { %7107 = vst [vmem:[#allocation72_spill] sm:$0xff] %v5408_v15  ;;  %v2314_v38 = vadd.f32 %v1849_v60, %v1848_v26  ;;  %v7112_v15 = vld [vmem:[#allocation86_spill] sm:$0xff]  ;;  %v7115_v60 = vld [vmem:[#allocation93_spill] sm:$0xff]  ;;  %v5445_v26 = vpop.xlane.xlu0 %2282 }
 0x5d0   :  { %vm1404_vm8 = vcmp.eq.s32.totalorder %v7112_v15, %v4022_v63  ;;  %vm1405_vm9 = vcmp.eq.s32.totalorder %v7112_v15, %v4027_v5  ;;  %vm1410_vm10 = vcmp.eq.s32.totalorder %v7115_v60, %v4022_v63  ;;  %vm1411_vm11 = vcmp.eq.s32.totalorder %v7115_v60, %v4027_v5  ;;  %v7116_v15 = vld [vmem:[#allocation90_spill] sm:$0xff] }
 0x5d1   :  { %v1855_v8 = vsel %vm1405_vm9, %v5310_v13, 0.0  ;;  %vm1408_vm12 = vcmp.eq.s32.totalorder %v7116_v15, %v4022_v63  ;;  %vm1409_vm13 = vcmp.eq.s32.totalorder %v7116_v15, %v4027_v5  ;;  %v7117_v15 = vld [vmem:[#allocation96_spill] sm:$0xff] }
 0x5d2   :  { %2306 = vadd.xlane.f32.xlu2 %v2305_v45  ;;  %v2311_v45 = vadd.f32 %v1847_v46, %v1846_v39  ;;  %v1860_v39 = vsel %vm1410_vm10, %v5321_v25, 0.0  ;;  %v1861_v46 = vsel %vm1411_vm11, %v5324_v56, 0.0  ;;  %vm1416_vm14 = vcmp.eq.s32.totalorder %v7117_v15, %v4022_v63 }
 0x5d3   :  { %2303 = vadd.xlane.f32.xlu1 %v2302_v33  ;;  %v1854_v33 = vsel %vm1404_vm8, %v5307_v30, 0.0  ;;  %vm1417_vm15 = vcmp.eq.s32.totalorder %v7117_v15, %v4027_v5  ;;  %vm1434_vm10 = vcmp.eq.s32.totalorder %v4421_v52, %v4022_v63  ;;  %vm1435_vm11 = vcmp.eq.s32.totalorder %v4421_v52, %v4027_v5 }
 0x5d4   :  { %v2323_v48 = vadd.f32 %v1855_v8, %v1854_v33  ;;  %v2332_v8 = vadd.f32 %v1861_v46, %v1860_v39 }
 0x5d5   :  { %v5420_v35 = vpop.xlane.xlu2 %2180 }
 0x5d6   :  { %7110 = vst [vmem:[#allocation70_spill] sm:$0xff] %v5420_v35  ;;  %v5424_v31 = vpop.xlane.xlu1 %2177 }
 0x5d7   :  { %7111 = vst [vmem:[#allocation75_spill] sm:$0xff] %v5424_v31 }
 0x5da   :  { %2315 = vadd.xlane.f32.xlu2 %v2314_v38 }
 0x5db   :  { %2312 = vadd.xlane.f32.xlu1 %v2311_v45  ;;  %v1858_v45 = vsel %vm1408_vm12, %v5059_v1, 0.0  ;;  %vm1440_vm12 = vcmp.eq.s32.totalorder %v4427_v59, %v4022_v63 }
 0x5dd   :  { %v5432_v35 = vpop.xlane.xlu2 %2189 }
 0x5de   :  { %7113 = vst [vmem:[#allocation73_spill] sm:$0xff] %v5432_v35  ;;  %v5434_v55 = vpop.xlane.xlu1 %2186  ;;  %v1866_v35 = vsel %vm1416_vm14, %v4949_v53, 0.0  ;;  %v7120_v53 = vld [vmem:[#allocation99_spill] sm:$0xff]  ;;  %vm1438_vm14 = vcmp.eq.s32.totalorder %v4425_v4, %v4022_v63 }
 0x5df   :  { %7114 = vst [vmem:[#allocation41_spill] sm:$0xff] %v5434_v55  ;;  %v1867_v55 = vsel %vm1417_vm15, %v4952_v2, 0.0  ;;  %vm1420_vm4 = vcmp.eq.s32.totalorder %v7120_v53, %v4022_v63  ;;  %vm1421_vm5 = vcmp.eq.s32.totalorder %v7120_v53, %v4027_v5  ;;  %v1872_v2 = vsel %vm1422_vm2, %v4955_v9, 0.0  ;;  %v7122_v9 = vld [vmem:[#allocation100_spill] sm:$0xff] }
 0x5e0   :  { %v2341_v15 = vadd.f32 %v1867_v55, %v1866_v35  ;;  %v5485_v35 = vld [vmem:[#allocation5 + $0x20] sm:$0xff]  ;;  %vm1426_vm8 = vcmp.eq.s32.totalorder %v7122_v9, %v4022_v63  ;;  %vm1427_vm9 = vcmp.eq.s32.totalorder %v7122_v9, %v4027_v5  ;;  %vm1439_vm15 = vcmp.eq.s32.totalorder %v4425_v4, %v4027_v5 }
 0x5e1   :  { %vm1444_vm2 = vcmp.eq.s32.totalorder %v4431_v42, %v4022_v63 }
 0x5e2   :  { %2324 = vadd.xlane.f32.xlu2 %v2323_v48  ;;  %v1859_v48 = vsel %vm1409_vm13, %v5062_v28, 0.0  ;;  %vm1441_vm13 = vcmp.eq.s32.totalorder %v4427_v59, %v4027_v5  ;;  %v1889_v59 = vsel %vm1439_vm15, %v5103_v19, 0.0  ;;  %vm2931_vm15 = vcmask 326912  }
 0x5e3   :  { %2321 = vadd.xlane.f32.xlu1 %v4875_v50  ;;  %v2329_v60 = vadd.f32 %v1859_v48, %v1858_v45  ;;  %v7118_v50 = vld [vmem:[#allocation95_spill] sm:$0xff]  ;;  %v5469_v48 = vpop.xlane.xlu0 %2291 }
 0x5e4   :  { %vm1414_vm0 = vcmp.eq.s32.totalorder %v7118_v50, %v4022_v63  ;;  %vm1415_vm1 = vcmp.eq.s32.totalorder %v7118_v50, %v4027_v5  ;;  %v1870_v50 = vsel %vm1420_vm4, %v5485_v35, 0.0  ;;  %vm1450_vm4 = vcmp.eq.s32.totalorder %v4439_v47, %v4022_v63 }
 0x5e5   :  { %v5449_v38 = vpop.xlane.xlu2 %2198  ;;  %v1864_v46 = vsel %vm1414_vm0, %v5165_v37, 0.0  ;;  %v1865_v45 = vsel %vm1415_vm1, %v5168_v29, 0.0  ;;  %vm1446_vm0 = vcmp.eq.s32.totalorder %v4433_v11, %v4022_v63  ;;  %vm1447_vm1 = vcmp.eq.s32.totalorder %v4433_v11, %v4027_v5 }
 0x5e6   :  { %v5453_v33 = vpop.xlane.xlu1 %2195  ;;  %v2338_v31 = vadd.f32 %v1865_v45, %v1864_v46  ;;  %v5488_v46 = vld [vmem:[#allocation5 + $0x28] sm:$0xff]  ;;  %v1896_v4 = vsel %vm1446_vm0, %v5116_v54, 0.0  ;;  %v1900_v54 = vsel %vm1450_vm4, %v5134_v18, 0.0 }
 0x5e7   :  { %v1871_v61 = vsel %vm1421_vm5, %v5488_v46, 0.0  ;;  %vm1451_vm5 = vcmp.eq.s32.totalorder %v4439_v47, %v4027_v5  ;;  %v7128_v47 = vld [vmem:[#allocation101_spill] sm:$0xff] }
 0x5ea   :  { %2333 = vadd.xlane.f32.xlu2 %v2332_v8 }
 0x5eb   :  { %2330 = vadd.xlane.f32.xlu1 %v2329_v60  ;;  %v1873_v60 = vsel %vm1423_vm3, %v4958_v17, 0.0  ;;  %v1878_v17 = vsel %vm1428_vm6, %v4917_v10, 0.0  ;;  %v1884_v10 = vsel %vm1434_vm10, %v4939_v7, 0.0  ;;  %v1890_v7 = vsel %vm1440_vm12, %v5079_v27, 0.0 }
 0x5ec   :  { %v2350_v53 = vadd.f32 %v1873_v60, %v1872_v2  ;;  %v1876_v60 = vsel %vm1426_vm8, %v4889_v62, 0.0  ;;  %v1885_v62 = vsel %vm1435_vm11, %v4942_v24, 0.0  ;;  %v1891_v24 = vsel %vm1441_vm13, %v5082_v20, 0.0 }
 0x5ed   :  { %v5465_v39 = vpop.xlane.xlu2 %2207  ;;  %vm1445_vm3 = vcmp.eq.s32.totalorder %v4431_v42, %v4027_v5  ;;  %v1894_v20 = vsel %vm1444_vm2, %v5122_v14, 0.0  ;;  %vm1458_vm6 = vcmp.eq.s32.totalorder %v4479_v57, %v4022_v63  ;;  %vm1456_vm8 = vcmp.eq.s32.totalorder %v7128_v47, %v4022_v63 }
 0x5ee   :  { %v5471_v8 = vpop.xlane.xlu1 %2204  ;;  %vm2919_vm12 = vcmask 130112   ;;  %vm2923_vm13 = vcmask 195712   ;;  %vm2935_vm2 = vcmask 392512  }
 0x5f2   :  { %2342 = vadd.xlane.f32.xlu2 %v2341_v15  ;;  %v5493_v15 = vpop.xlane.xlu0 %2300 }
 0x5f3   :  { %2339 = vadd.xlane.f32.xlu1 %v2338_v31  ;;  %v2347_v31 = vadd.f32 %v1871_v61, %v1870_v50  ;;  %v1877_v50 = vsel %vm1427_vm9, %v4892_v22, 0.0  ;;  %vm1457_vm9 = vcmp.eq.s32.totalorder %v7128_v47, %v4027_v5 }
 0x5f5   :  { %v5483_v55 = vpop.xlane.xlu2 %2216 }
 0x5f6   :  { %7121 = vst [vmem:[#allocation77_spill] sm:$0xff] %v5483_v55  ;;  %v5491_v45 = vpop.xlane.xlu1 %2213  ;;  %v1879_v55 = vsel %vm1429_vm7, %v4920_v49, 0.0  ;;  %vm1459_vm7 = vcmp.eq.s32.totalorder %v4479_v57, %v4027_v5  ;;  %v5586_v57 = vadd.s32 4294967288, %v4022_v63 }
 0x5f7   :  { %v2359_v12 = vadd.f32 %v1879_v55, %v1878_v17  ;;  %v2368_v55 = vadd.f32 %v1885_v62, %v1884_v10  ;;  %v1888_v17 = vsel %vm1438_vm14, %v5100_v6, 0.0  ;;  %v1909_v18 = vsel %vm1459_vm7, %v5062_v28, 0.0 }
 0x5f8   :  { %v5597_v28 = vadd.s32 4294967280, %v4022_v63  ;;  %vm2927_vm14 = vcmask 261312  }
 0x5fa   :  { %2351 = vadd.xlane.f32.xlu2 %v2350_v53  ;;  %v2356_v53 = vadd.f32 %v1877_v50, %v1876_v60  ;;  %v2377_v50 = vadd.f32 %v1891_v24, %v1890_v7 }
 0x5fb   :  { %2348 = vadd.xlane.f32.xlu1 %v2347_v31  ;;  %v5515_v31 = vpop.xlane.xlu0 %2309 }
 0x5fd   :  { %v5505_v2 = vpop.xlane.xlu2 %2225 }
 0x5fe   :  { %v5509_v61 = vpop.xlane.xlu1 %2222 }
 0x602   :  { %2360 = vadd.xlane.f32.xlu2 %v2359_v12  ;;  %v2374_v12 = vadd.f32 %v1889_v59, %v1888_v17  ;;  %v7129_v17 = vld [vmem:[#allocation32_spill] sm:$0xff] }
 0x603   :  { %2357 = vadd.xlane.f32.xlu1 %v2356_v53  ;;  %v5532_v52 = vpop.xlane.xlu0 %2318  ;;  %v1895_v53 = vsel %vm1445_vm3, %v5125_v21, 0.0  ;;  %v1906_v59 = vsel %vm1456_vm8, %v7129_v17, 0.0 }
 0x605   :  { %v5519_v49 = vpop.xlane.xlu2 %2234 }
 0x606   :  { %v5521_v22 = vpop.xlane.xlu1 %2231 }
 0x60a   :  { %2369 = vadd.xlane.f32.xlu2 %v2368_v55  ;;  %v2383_v55 = vadd.f32 %v1895_v53, %v1894_v20 }
 0x60b   :  { %2366 = vadd.xlane.f32.xlu1 %v4743_v0  ;;  %v1897_v0 = vsel %vm1447_vm1, %v5119_v16, 0.0  ;;  %v5556_v10 = vpop.xlane.xlu0 %2327  ;;  %v1901_v16 = vsel %vm1451_vm5, %v5137_v58, 0.0  ;;  %v1908_v58 = vsel %vm1458_vm6, %v5059_v1, 0.0  ;;  %v7131_v1 = vld [vmem:[#allocation102_spill] sm:$0xff]  ;;  %vm2939_vm5 = vcmask 458112  }
 0x60c   :  { %v2386_v62 = vadd.f32 %v1897_v0, %v1896_v4  ;;  %v2392_v7 = vadd.f32 %v1901_v16, %v1900_v54  ;;  %vm1464_vm10 = vcmp.eq.s32.totalorder %v7131_v1, %v4022_v63  ;;  %vm1465_vm11 = vcmp.eq.s32.totalorder %v7131_v1, %v4027_v5  ;;  %v7134_v1 = vld [vmem:[#allocation103_spill] sm:$0xff] }
 0x60d   :  { %v5536_v9 = vpop.xlane.xlu2 %2243  ;;  %v1914_v54 = vsel %vm1464_vm10, %v5165_v37, 0.0  ;;  %v1915_v16 = vsel %vm1465_vm11, %v5168_v29, 0.0  ;;  %vm1468_vm3 = vcmp.eq.s32.totalorder %v7134_v1, %v4022_v63  ;;  %vm1469_vm4 = vcmp.eq.s32.totalorder %v7134_v1, %v4027_v5 }
 0x60e   :  { %v5540_v60 = vpop.xlane.xlu1 %2240  ;;  %vm6839_vm6 = vcmask 523712  }
 0x60f   :  { %7123 = vst [vmem:[#allocation83_spill] sm:$0xff] %v5540_v60 }
 0x612   :  { %2378 = vadd.xlane.f32.xlu2 %v2377_v50  ;;  %v7130_v50 = vld [vmem:[#allocation36_spill] sm:$0xff] }
 0x613   :  { %2375 = vadd.xlane.f32.xlu1 %v2374_v12  ;;  %v5570_v21 = vpop.xlane.xlu0 %2336  ;;  %v1907_v12 = vsel %vm1457_vm9, %v7130_v50, 0.0  ;;  %vm6840_vm9 = vcmask 589312  }
 0x614   :  { %v2401_v53 = vadd.f32 %v1907_v12, %v1906_v59  ;;  %v5611_v59 = vadd.s32 4294967256, %v4022_v63  ;;  %v2413_v12 = vadd.f32 %v1915_v16, %v1914_v54  ;;  %v5633_v16 = vadd.s32 4294967248, %v4022_v63 }
 0x615   :  { %v5552_v27 = vpop.xlane.xlu2 %2252 }
 0x616   :  { %7124 = vst [vmem:[#allocation81_spill] sm:$0xff] %v5552_v27  ;;  %v5558_v11 = vpop.xlane.xlu1 %2249  ;;  %v7141_v27 = vld [vmem:[#allocation109_spill] sm:$0xff] }
 0x617   :  { %7125 = vst [vmem:[#allocation86_spill] sm:$0xff] %v5558_v11 }
 0x61a   :  { %2387 = vadd.xlane.f32.xlu2 %v2386_v62 }
 0x61b   :  { %2384 = vadd.xlane.f32.xlu1 %v2383_v55  ;;  %v5590_v62 = vpop.xlane.xlu0 %2345  ;;  %v5600_v55 = vadd.s32 4294967272, %v4022_v63 }
 0x61d   :  { %v5564_v42 = vpop.xlane.xlu2 %2261 }
 0x61e   :  { %7126 = vst [vmem:[#allocation93_spill] sm:$0xff] %v5564_v42  ;;  %v5568_v14 = vpop.xlane.xlu1 %2258 }
 0x61f   :  { %7127 = vst [vmem:[#allocation90_spill] sm:$0xff] %v5568_v14  ;;  %v7140_v14 = vld [vmem:[#allocation107_spill] sm:$0xff] }
 0x622   :  { %2396 = vadd.xlane.f32.xlu2 %v4877_v23  ;;  %v2404_v23 = vadd.f32 %v1909_v18, %v1908_v58  ;;  %v7132_v58 = vld [vmem:[#allocation48_spill] sm:$0xff] }
 0x623   :  { %2393 = vadd.xlane.f32.xlu1 %v2392_v7  ;;  %v3045_v18 = vperm.slane %v7132_v58, %v5597_v28 }
 0x625   :  { %v2271_v24 = vpop.xlane.xlu2 %2270 }
 0x626   :  { %v2268_v4 = vpop.xlane.xlu1 %2267  ;;  %v3043_v0 = vperm.slane %v2271_v24, %v5586_v57  ;;  %v5608_v24 = vadd.s32 4294967264, %v4022_v63 }
 0x627   :  { %v3042_v20 = vperm.slane %v2268_v4, %v4022_v63  ;;  %v3051_v4 = vperm.slane %v5445_v26, %v5611_v59  ;;  %v7135_v26 = vld [vmem:[#allocation25_spill] sm:$0xff] }
 0x629   :  { %v3044_v7 = vsel %vm2919_vm12, %v3043_v0, %v3042_v20  ;;  %v5619_v0 = vpop.xlane.xlu0 %2354  ;;  %v7133_v20 = vld [vmem:[#allocation104_spill] sm:$0xff] }
 0x62a   :  { %2405 = vadd.xlane.f32.xlu2 %v2404_v23  ;;  %v3046_v29 = vsel %vm2923_vm13, %v3045_v18, %v3044_v7  ;;  %vm1470_vm0 = vcmp.eq.s32.totalorder %v7133_v20, %v4022_v63  ;;  %vm1471_vm1 = vcmp.eq.s32.totalorder %v7133_v20, %v4027_v5  ;;  %v5638_v18 = vadd.s32 4294967240, %v4022_v63 }
 0x62b   :  { %2402 = vadd.xlane.f32.xlu1 %v2401_v53  ;;  %v1920_v7 = vsel %vm1470_vm0, %v5485_v35, 0.0  ;;  %vm2951_vm0 = vcmask 654912  }
 0x62d   :  { %v2280_v47 = vpop.xlane.xlu2 %2279 }
 0x62e   :  { %v2277_v17 = vpop.xlane.xlu1 %2276  ;;  %v3049_v37 = vperm.slane %v2280_v47, %v5608_v24  ;;  %v1921_v47 = vsel %vm1471_vm1, %v5488_v46, 0.0  ;;  %vm6833_vm1 = vcmask 720512  }
 0x62f   :  { %v3047_v50 = vperm.slane %v2277_v17, %v5600_v55  ;;  %v1918_v17 = vsel %vm1468_vm3, %v5041_v44, 0.0  ;;  %v2422_v35 = vadd.f32 %v1921_v47, %v1920_v7  ;;  %v7136_v44 = vld [vmem:[#allocation106_spill] sm:$0xff]  ;;  %v5668_v7 = vld [vmem:[#allocation5 + $0x50] sm:$0xff]  ;;  %vm6832_vm3 = vcmask 786112  }
 0x630   :  { %vm1476_vm7 = vcmp.eq.s32.totalorder %v7136_v44, %v4022_v63  ;;  %vm1477_vm8 = vcmp.eq.s32.totalorder %v7136_v44, %v4027_v5  ;;  %7138 = vst [vmem:[#allocation96_spill] sm:$0xff] %v5668_v7 }
 0x631   :  { %v3048_v23 = vsel %vm2927_vm14, %v3047_v50, %v3046_v29  ;;  %v1919_v50 = vsel %vm1469_vm4, %v5044_v34, 0.0  ;;  %v5643_v29 = vadd.s32 4294967232, %v4022_v63  ;;  %v5660_v1 = vpop.xlane.xlu0 %2363  ;;  %v1926_v47 = vsel %vm1476_vm7, %v5668_v7, 0.0 }
 0x632   :  { %v3050_v53 = vsel %vm2931_vm15, %v3049_v37, %v3048_v23  ;;  %2414 = vadd.xlane.f32.xlu2 %v2413_v12  ;;  %v2419_v20 = vadd.f32 %v1919_v50, %v1918_v17  ;;  %vm1480_vm4 = vcmp.eq.s32.totalorder %v7140_v14, %v4022_v63  ;;  %vm1481_vm7 = vcmp.eq.s32.totalorder %v7140_v14, %v4027_v5  ;;  %v5708_v14 = vld [vmem:[#allocation5 + $0x78] sm:$0xff] }
 0x633   :  { %2411 = vadd.xlane.f32.xlu1 %v7135_v26  ;;  %v3052_v54 = vsel %vm2935_vm2, %v3051_v4, %v3050_v53  ;;  %v3057_v46 = vperm.slane %v5469_v48, %v5643_v29  ;;  %v7137_v53 = vld [vmem:[#allocation105_spill] sm:$0xff]  ;;  %v5663_v26 = vadd.s32 4294967224, %v4022_v63 }
 0x634   :  { %vm1474_vm10 = vcmp.eq.s32.totalorder %v7137_v53, %v4022_v63  ;;  %vm1475_vm11 = vcmp.eq.s32.totalorder %v7137_v53, %v4027_v5 }
 0x635   :  { %v2289_v58 = vpop.xlane.xlu2 %2288 }
 0x636   :  { %v2286_v37 = vpop.xlane.xlu1 %2285  ;;  %v3055_v4 = vperm.slane %v2289_v58, %v5638_v18  ;;  %v5671_v58 = vld [vmem:[#allocation5 + $0x58] sm:$0xff] }
 0x637   :  { %v3053_v12 = vperm.slane %v2286_v37, %v5633_v16  ;;  %7139 = vst [vmem:[#allocation95_spill] sm:$0xff] %v5671_v58  ;;  %v1927_v17 = vsel %vm1477_vm8, %v5671_v58, 0.0  ;;  %v5675_v37 = vadd.s32 4294967216, %v4022_v63  ;;  %vm6842_vm8 = vcmask 851712  }
 0x639   :  { %v3054_v23 = vsel %vm2939_vm5, %v3053_v12, %v3052_v54  ;;  %v5666_v54 = vadd.s32 4294967208, %v4022_v63  ;;  %v5677_v12 = vld [vmem:[#allocation5 + $0x40] sm:$0xff] }
 0x63a   :  { %v3056_v34 = vsel %vm6839_vm6, %v3055_v4, %v3054_v23  ;;  %2423 = vadd.xlane.f32.xlu2 %v2422_v35  ;;  %v1924_v4 = vsel %vm1474_vm10, %v5677_v12, 0.0  ;;  %v5680_v35 = vld [vmem:[#allocation5 + $0x48] sm:$0xff]  ;;  %vm6841_vm10 = vcmask 917312  }
 0x63b   :  { %2420 = vadd.xlane.f32.xlu1 %v2419_v20  ;;  %v3058_v48 = vsel %vm6840_vm9, %v3057_v46, %v3056_v34  ;;  %v1925_v46 = vsel %vm1475_vm11, %v5680_v35, 0.0  ;;  %v2431_v34 = vadd.f32 %v1927_v17, %v1926_v47  ;;  %v3063_v53 = vperm.slane %v5493_v15, %v5666_v54 }
 0x63c   :  { %v2428_v7 = vadd.f32 %v1925_v46, %v1924_v4  ;;  %v5695_v17 = vadd.s32 4294967200, %v4022_v63  ;;  %v5698_v15 = vadd.s32 4294967184, %v4022_v63  ;;  %v5705_v4 = vld [vmem:[#allocation5 + $0x70] sm:$0xff]  ;;  %vm1488_vm11 = vcmp.eq.s32.totalorder %v7141_v27, %v4022_v63 }
 0x63d   :  { %v2298_v50 = vpop.xlane.xlu2 %2297  ;;  %v1930_v46 = vsel %vm1480_vm4, %v5705_v4, 0.0  ;;  %vm1489_vm4 = vcmp.eq.s32.totalorder %v7141_v27, %v4027_v5 }
 0x63e   :  { %v2295_v23 = vpop.xlane.xlu1 %2294  ;;  %v3061_v44 = vperm.slane %v2298_v50, %v5675_v37  ;;  %v5701_v50 = vadd.s32 4294967192, %v4022_v63  ;;  %v1939_v27 = vsel %vm1489_vm4, %v5103_v19, 0.0 }
 0x63f   :  { %v3059_v20 = vperm.slane %v2295_v23, %v5663_v26 }
 0x641   :  { %v3060_v58 = vsel %vm2951_vm0, %v3059_v20, %v3058_v48 }
 0x642   :  { %v3062_v42 = vsel %vm6833_vm1, %v3061_v44, %v3060_v58  ;;  %2432 = vadd.xlane.f32.xlu2 %v2431_v34  ;;  %v5703_v58 = vpop.xlane.xlu0 %2372  ;;  %v3069_v44 = vperm.slane %v5515_v31, %v5698_v15 }
 0x643   :  { %2429 = vadd.xlane.f32.xlu1 %v2428_v7  ;;  %v3064_v47 = vsel %vm6832_vm3, %v3063_v53, %v3062_v42  ;;  %v1931_v42 = vsel %vm1481_vm7, %v5708_v14, 0.0  ;;  %vm6834_vm7 = vcmask 982912  }
 0x644   :  { %v2437_v53 = vadd.f32 %v1931_v42, %v1930_v46  ;;  %v1938_v46 = vsel %vm1488_vm11, %v5100_v6, 0.0 }
 0x645   :  { %v2307_v48 = vpop.xlane.xlu2 %2306 }
 0x646   :  { %v2304_v7 = vpop.xlane.xlu1 %2303  ;;  %v3067_v20 = vperm.slane %v2307_v48, %v5701_v50  ;;  %v7143_v48 = vld [vmem:[#allocation108_spill] sm:$0xff] }
 0x647   :  { %v3065_v23 = vperm.slane %v2304_v7, %v5695_v17  ;;  %v7142_v7 = vld [vmem:[#allocation16_spill] sm:$0xff]  ;;  %vm1486_vm3 = vcmp.eq.s32.totalorder %v7143_v48, %v4022_v63  ;;  %vm1487_vm1 = vcmp.eq.s32.totalorder %v7143_v48, %v4027_v5  ;;  %v2449_v48 = vadd.f32 %v1939_v27, %v1938_v46 }
 0x648   :  { %v3621_v27 = vld [vmem:[#allocation5 + $0xe8] sm:$0xff] }
 0x649   :  { %v3066_v34 = vsel %vm6842_vm8, %v3065_v23, %v3064_v47  ;;  %v5728_v47 = vadd.s32 4294967176, %v4022_v63  ;;  %v3074_v23 = vperm.slane %v5532_v52, %v5586_v57  ;;  %v7144_v52 = vld [vmem:[#allocation110_spill] sm:$0xff] }
 0x64a   :  { %v3068_v11 = vsel %vm6841_vm10, %v3067_v20, %v3066_v34  ;;  %2441 = vadd.xlane.f32.xlu2 %v7142_v7  ;;  %v1936_v20 = vsel %vm1486_vm3, %v5245_v32, 0.0  ;;  %v1937_v34 = vsel %vm1487_vm1, %v5248_v3, 0.0  ;;  %v5736_v7 = vpop.xlane.xlu0 %2381  ;;  %vm1494_vm3 = vcmp.eq.s32.totalorder %v7144_v52, %v4022_v63  ;;  %v7145_v32 = vld [vmem:[#allocation46_spill] sm:$0xff]  ;;  %v3620_v3 = vld [vmem:[#allocation5 + $0xe0] sm:$0xff] }
 0x64b   :  { %2438 = vadd.xlane.f32.xlu1 %v2437_v53  ;;  %v3070_v31 = vsel %vm6834_vm7, %v3069_v44, %v3068_v11  ;;  %vm2975_vm7 = vcmask 1048512   ;;  %v2446_v60 = vadd.f32 %v1937_v34, %v1936_v20  ;;  %vm1495_vm1 = vcmp.eq.s32.totalorder %v7144_v52, %v4027_v5 }
 0x64c   :  { %vm1492_vm11 = vcmp.eq.s32.totalorder %v7145_v32, %v4022_v63  ;;  %vm1493_vm4 = vcmp.eq.s32.totalorder %v7145_v32, %v4027_v5  ;;  %v1944_v46 = vsel %vm1494_vm3, %v3620_v3, 0.0  ;;  %v7146_v3 = vld [vmem:[#allocation112_spill] sm:$0xff] }
 0x64d   :  { %v2316_v42 = vpop.xlane.xlu2 %2315  ;;  %v1943_v20 = vsel %vm1493_vm4, %v5272_v41, 0.0  ;;  %vm1500_vm3 = vcmp.eq.s32.totalorder %v7146_v3, %v4022_v63  ;;  %v7147_v41 = vld [vmem:[#allocation111_spill] sm:$0xff] }
 0x64e   :  { %v3073_v53 = vperm.slane %v2316_v42, %v4022_v63  ;;  %v2313_v11 = vpop.xlane.xlu1 %2312  ;;  %vm1499_vm4 = vcmp.eq.s32.totalorder %v7147_v41, %v4027_v5 }
 0x64f   :  { %v3071_v44 = vperm.slane %v2313_v11, %v5728_v47 }
 0x650   :  { %v3075_v6 = vsel %vm2919_vm12, %v3074_v23, %v3073_v53  ;;  %v1942_v23 = vsel %vm1492_vm11, %v5269_v51, 0.0  ;;  %vm1498_vm11 = vcmp.eq.s32.totalorder %v7147_v41, %v4022_v63  ;;  %v5796_v41 = vld [vmem:[#allocation5 + $0x140] sm:$0xff] }
 0x651   :  { %v5742_v19 = vsel %vm2975_vm7, %v3071_v44, %v3070_v31  ;;  %v1945_v31 = vsel %vm1495_vm1, %v3621_v27, 0.0  ;;  %v2455_v32 = vadd.f32 %v1943_v20, %v1942_v23  ;;  %vm1501_vm1 = vcmp.eq.s32.totalorder %v7146_v3, %v4027_v5  ;;  %v5774_v27 = vld [vmem:[#allocation5 + $0x118] sm:$0xff]  ;;  %7151 = vst [vmem:[#allocation99_spill] sm:$0xff] %v5796_v41 }
 0x652   :  { %2450 = vadd.xlane.f32.xlu2 %v2449_v48  ;;  %v5755_v11 = vpop.xlane.xlu0 %2390  ;;  %v2458_v48 = vadd.f32 %v1945_v31, %v1944_v46  ;;  %7148 = vst [vmem:[#allocation14_spill] sm:$0xff] %v5774_v27  ;;  %v1951_v31 = vsel %vm1501_vm1, %v5774_v27, 0.0  ;;  %v1948_v23 = vsel %vm1498_vm11, %v5289_v40, 0.0  ;;  %v1949_v20 = vsel %vm1499_vm4, %v5292_v36, 0.0  ;;  %v7150_v36 = vld [vmem:[#allocation113_spill] sm:$0xff] }
 0x653   :  { %2447 = vadd.xlane.f32.xlu1 %v2446_v60  ;;  %v3080_v60 = vperm.slane %v5556_v10, %v5608_v24  ;;  %v2464_v3 = vadd.f32 %v1949_v20, %v1948_v23  ;;  %vm1504_vm11 = vcmp.eq.s32.totalorder %v7150_v36, %v4022_v63  ;;  %vm1505_vm4 = vcmp.eq.s32.totalorder %v7150_v36, %v4027_v5 }
 0x654   :  { %v3091_v23 = vperm.slane %v5590_v62, %v5586_v57  ;;  %v1954_v20 = vsel %vm1504_vm11, %v5307_v30, 0.0  ;;  %v7153_v62 = vld [vmem:[#allocation123_spill] sm:$0xff] }
 0x655   :  { %v2325_v42 = vpop.xlane.xlu2 %2324  ;;  %v2994_v30 = vperm.slane %v7153_v62, %v4022_v63 }
 0x656   :  { %v2322_v34 = vpop.xlane.xlu1 %2321  ;;  %v3078_v44 = vperm.slane %v2325_v42, %v5600_v55 }
 0x657   :  { %v3076_v53 = vperm.slane %v2322_v34, %v5597_v28 }
 0x659   :  { %v3077_v52 = vsel %vm2923_vm13, %v3076_v53, %v3075_v6  ;;  %v5771_v6 = vld [vmem:[#allocation5 + $0x110] sm:$0xff] }
 0x65a   :  { %v3079_v51 = vsel %vm2927_vm14, %v3078_v44, %v3077_v52  ;;  %2459 = vadd.xlane.f32.xlu2 %v2458_v48  ;;  %v1950_v46 = vsel %vm1500_vm3, %v5771_v6, 0.0  ;;  %v5780_v44 = vpop.xlane.xlu0 %2399  ;;  %v3086_v52 = vperm.slane %v5570_v21, %v5638_v18 }
 0x65b   :  { %2456 = vadd.xlane.f32.xlu1 %v2455_v32  ;;  %v3081_v10 = vsel %vm2931_vm15, %v3080_v60, %v3079_v51  ;;  %v2467_v60 = vadd.f32 %v1951_v31, %v1950_v46  ;;  %v7149_v51 = vld [vmem:[#allocation114_spill] sm:$0xff]  ;;  %v5799_v46 = vld [vmem:[#allocation5 + $0x148] sm:$0xff] }
 0x65c   :  { %vm1506_vm3 = vcmp.eq.s32.totalorder %v7149_v51, %v4022_v63  ;;  %vm1507_vm1 = vcmp.eq.s32.totalorder %v7149_v51, %v4027_v5  ;;  %7152 = vst [vmem:[#allocation100_spill] sm:$0xff] %v5799_v46 }
 0x65d   :  { %v2334_v42 = vpop.xlane.xlu2 %2333  ;;  %v1957_v31 = vsel %vm1507_vm1, %v5799_v46, 0.0 }
 0x65e   :  { %v2331_v34 = vpop.xlane.xlu1 %2330  ;;  %v3084_v48 = vperm.slane %v2334_v42, %v5633_v16 }
 0x65f   :  { %v3082_v53 = vperm.slane %v2331_v34, %v5611_v59  ;;  %v1955_v34 = vsel %vm1505_vm4, %v5310_v13, 0.0  ;;  %v7154_v13 = vld [vmem:[#allocation115_spill] sm:$0xff] }
 0x660   :  { %vm1511_vm1 = vcmp.eq.s32.totalorder %v7154_v13, %v4027_v5 }
 0x661   :  { %v3083_v32 = vsel %vm2935_vm2, %v3082_v53, %v3081_v10  ;;  %v1956_v10 = vsel %vm1506_vm3, %v5796_v41, 0.0  ;;  %vm1510_vm3 = vcmp.eq.s32.totalorder %v7154_v13, %v4022_v63 }
 0x662   :  { %v3085_v40 = vsel %vm2939_vm5, %v3084_v48, %v3083_v32  ;;  %2468 = vadd.xlane.f32.xlu2 %v2467_v60  ;;  %v5816_v36 = vpop.xlane.xlu0 %2408 }
 0x663   :  { %2465 = vadd.xlane.f32.xlu1 %v2464_v3  ;;  %v3087_v21 = vsel %vm6839_vm6, %v3086_v52, %v3085_v40  ;;  %v2995_v52 = vperm.slane %v5453_v33, %v5586_v57  ;;  %v2476_v3 = vadd.f32 %v1957_v31, %v1956_v10  ;;  %v2473_v40 = vadd.f32 %v1955_v34, %v1954_v20  ;;  %v7155_v33 = vld [vmem:[#allocation57_spill] sm:$0xff] }
 0x664   :  { %v1961_v20 = vsel %vm1511_vm1, %v5324_v56, 0.0  ;;  %v2997_v34 = vperm.slane %v5449_v38, %v5597_v28  ;;  %v3097_v38 = vperm.slane %v5619_v0, %v5608_v24  ;;  %v7161_v0 = vld [vmem:[#allocation50_spill] sm:$0xff] }
 0x665   :  { %v2343_v42 = vpop.xlane.xlu2 %2342  ;;  %v2996_v31 = vsel %vm2919_vm12, %v2995_v52, %v2994_v30  ;;  %v7159_v52 = vld [vmem:[#allocation65_spill] sm:$0xff] }
 0x666   :  { %v3090_v53 = vperm.slane %v2343_v42, %v4022_v63  ;;  %v2340_v48 = vpop.xlane.xlu1 %2339  ;;  %v2918_v42 = vperm.slane %v7155_v33, %v5586_v57  ;;  %v2998_v33 = vsel %vm2923_vm13, %v2997_v34, %v2996_v31  ;;  %vm1516_vm11 = vcmp.eq.s32.totalorder %v7159_v52, %v4022_v63 }
 0x667   :  { %v3088_v60 = vperm.slane %v2340_v48, %v5643_v29  ;;  %v7157_v48 = vld [vmem:[#allocation94_spill] sm:$0xff]  ;;  %vm1517_vm4 = vcmp.eq.s32.totalorder %v7159_v52, %v4027_v5  ;;  %v2926_v31 = vperm.slane %v7161_v0, %v5600_v55 }
 0x668   :  { %v3092_v32 = vsel %vm2919_vm12, %v3091_v23, %v3090_v53  ;;  %v1960_v23 = vsel %vm1510_vm3, %v5321_v25, 0.0  ;;  %v3001_v25 = vperm.slane %v5471_v8, %v5608_v24 }
 0x669   :  { %v5812_v51 = vsel %vm6840_vm9, %v3088_v60, %v3087_v21  ;;  %v7156_v21 = vld [vmem:[#allocation52_spill] sm:$0xff]  ;;  %v2922_v60 = vperm.slane %v7157_v48, %v5597_v28 }
 0x66a   :  { %2477 = vadd.xlane.f32.xlu2 %v2476_v3  ;;  %v2916_v10 = vperm.slane %v7156_v21, %v4022_v63  ;;  %v7160_v21 = vld [vmem:[#allocation66_spill] sm:$0xff] }
 0x66b   :  { %2474 = vadd.xlane.f32.xlu1 %v2473_v40  ;;  %v7158_v40 = vld [vmem:[#allocation11_spill] sm:$0xff]  ;;  %vm1518_vm3 = vcmp.eq.s32.totalorder %v7160_v21, %v4022_v63  ;;  %vm1519_vm1 = vcmp.eq.s32.totalorder %v7160_v21, %v4027_v5 }
 0x66c   :  { %v2920_v62 = vsel %vm2919_vm12, %v2918_v42, %v2916_v10  ;;  %v2999_v13 = vperm.slane %v7158_v40, %v5600_v55  ;;  %v2482_v42 = vadd.f32 %v1961_v20, %v1960_v23  ;;  %v7162_v20 = vld [vmem:[#allocation82_spill] sm:$0xff] }
 0x66d   :  { %v2352_v53 = vpop.xlane.xlu2 %2351  ;;  %v2924_v10 = vsel %vm2923_vm13, %v2922_v60, %v2920_v62  ;;  %v5863_v62 = vpop.xlane.xlu0 %2417 }
 0x66e   :  { %v2349_v3 = vpop.xlane.xlu1 %2348  ;;  %v3095_v30 = vperm.slane %v2352_v53, %v5600_v55  ;;  %v3000_v34 = vsel %vm2927_vm14, %v2999_v13, %v2998_v33  ;;  %v5858_v53 = vld [vmem:[#allocation5] sm:$0xff]  ;;  %v2928_v13 = vsel %vm2927_vm14, %v2926_v31, %v2924_v10 }
 0x66f   :  { %v3093_v56 = vperm.slane %v2349_v3, %v5597_v28  ;;  %v1966_v48 = vsel %vm1516_vm11, %v5858_v53, 0.0  ;;  %v3002_v60 = vsel %vm2931_vm15, %v3001_v25, %v3000_v34  ;;  %v5865_v3 = vld [vmem:[#allocation5 + $0x8] sm:$0xff]  ;;  %v7163_v33 = vld [vmem:[#allocation59_spill] sm:$0xff]  ;;  %v3003_v25 = vperm.slane %v5465_v39, %v5611_v59 }
 0x670   :  { %v1967_v40 = vsel %vm1517_vm4, %v5865_v3, 0.0  ;;  %v7164_v10 = vld [vmem:[#allocation39_spill] sm:$0xff]  ;;  %v7165_v39 = vld [vmem:[#allocation24_spill] sm:$0xff] }
 0x671   :  { %v3094_v8 = vsel %vm2923_vm13, %v3093_v56, %v3092_v32  ;;  %v2934_v56 = vperm.slane %v7163_v33, %v5611_v59  ;;  %v3005_v31 = vperm.slane %v7165_v39, %v5633_v16  ;;  %v3004_v34 = vsel %vm2935_vm2, %v3003_v25, %v3002_v60 }
 0x672   :  { %v3096_v23 = vsel %vm2927_vm14, %v3095_v30, %v3094_v8  ;;  %2486 = vadd.xlane.f32.xlu2 %v7162_v20  ;;  %v5876_v30 = vld [vmem:[#allocation5 + $0x10] sm:$0xff]  ;;  %v2930_v8 = vperm.slane %v7164_v10, %v5608_v24  ;;  %v3103_v33 = vperm.slane %v5660_v1, %v5638_v18  ;;  %v2491_v41 = vadd.f32 %v1967_v40, %v1966_v48  ;;  %v7166_v10 = vld [vmem:[#allocation15_spill] sm:$0xff]  ;;  %v7168_v48 = vld [vmem:[#allocation18_spill] sm:$0xff] }
 0x673   :  { %2483 = vadd.xlane.f32.xlu1 %v2482_v42  ;;  %v3098_v32 = vsel %vm2931_vm15, %v3097_v38, %v3096_v23  ;;  %v1968_v38 = vsel %vm1518_vm3, %v5876_v30, 0.0  ;;  %v5882_v42 = vld [vmem:[#allocation5 + $0x18] sm:$0xff]  ;;  %v3007_v23 = vperm.slane %v5491_v45, %v5638_v18  ;;  %vm1524_vm11 = vcmp.eq.s32.totalorder %v7166_v10, %v4022_v63  ;;  %v7167_v45 = vld [vmem:[#allocation55_spill] sm:$0xff] }
 0x674   :  { %v1969_v52 = vsel %vm1519_vm1, %v5882_v42, 0.0  ;;  %v2932_v46 = vsel %vm2931_vm15, %v2930_v8, %v2928_v13  ;;  %vm1525_vm4 = vcmp.eq.s32.totalorder %v7166_v10, %v4027_v5  ;;  %v2938_v25 = vperm.slane %v7167_v45, %v5633_v16  ;;  %v7171_v10 = vld [vmem:[#allocation12_spill] sm:$0xff] }
 0x675   :  { %v2361_v0 = vpop.xlane.xlu2 %2360  ;;  %v2936_v27 = vsel %vm2935_vm2, %v2934_v56, %v2932_v46  ;;  %v2494_v60 = vadd.f32 %v1969_v52, %v1968_v38  ;;  %v3006_v1 = vsel %vm2939_vm5, %v3005_v31, %v3004_v34  ;;  %vm1522_vm3 = vcmp.eq.s32.totalorder %v7168_v48, %v4022_v63  ;;  %v7169_v52 = vld [vmem:[#allocation77_spill] sm:$0xff]  ;;  %v5923_v34 = vpop.xlane.xlu0 %2426 }
 0x676   :  { %v2358_v20 = vpop.xlane.xlu1 %2357  ;;  %v3101_v39 = vperm.slane %v2361_v0, %v5633_v16  ;;  %vm1523_vm1 = vcmp.eq.s32.totalorder %v7168_v48, %v4027_v5  ;;  %v3008_v46 = vsel %vm6839_vm6, %v3007_v23, %v3006_v1  ;;  %v2940_v56 = vsel %vm2939_vm5, %v2938_v25, %v2936_v27  ;;  %v7170_v0 = vld [vmem:[#allocation26_spill] sm:$0xff]  ;;  %v5933_v27 = vld [vmem:[#allocation5 + $0x30] sm:$0xff] }
 0x677   :  { %v3099_v21 = vperm.slane %v2358_v20, %v5611_v59  ;;  %v2946_v38 = vperm.slane %v5360_v43, %v5643_v29  ;;  %v3009_v8 = vperm.slane %v7169_v52, %v5643_v29  ;;  %v2942_v31 = vperm.slane %v7170_v0, %v5638_v18  ;;  %v5936_v20 = vld [vmem:[#allocation5 + $0x38] sm:$0xff]  ;;  %v7172_v1 = vld [vmem:[#allocation69_spill] sm:$0xff]  ;;  %v7173_v52 = vld [vmem:[#allocation68_spill] sm:$0xff] }
 0x678   :  { %v1974_v23 = vsel %vm1524_vm11, %v5677_v12, 0.0  ;;  %v1975_v43 = vsel %vm1525_vm4, %v5680_v35, 0.0  ;;  %v3011_v45 = vperm.slane %v7171_v10, %v5663_v26  ;;  %v3109_v25 = vperm.slane %v5703_v58, %v5675_v37 }
 0x679   :  { %v3100_v13 = vsel %vm2935_vm2, %v3099_v21, %v3098_v32  ;;  %v3010_v21 = vsel %vm6840_vm9, %v3009_v8, %v3008_v46  ;;  %vm1530_vm11 = vcmp.eq.s32.totalorder %v7172_v1, %v4022_v63  ;;  %vm1531_vm4 = vcmp.eq.s32.totalorder %v7172_v1, %v4027_v5  ;;  %v7174_v8 = vld [vmem:[#allocation58_spill] sm:$0xff]  ;;  %v5994_v1 = vld [vmem:[#allocation5 + $0x68] sm:$0xff] }
 0x67a   :  { %v3102_v40 = vsel %vm2939_vm5, %v3101_v39, %v3100_v13  ;;  %2495 = vadd.xlane.f32.xlu2 %v2494_v60  ;;  %v3013_v39 = vperm.slane %v5509_v61, %v5675_v37  ;;  %v2944_v13 = vsel %vm6839_vm6, %v2942_v31, %v2940_v56  ;;  %v2503_v46 = vadd.f32 %v1975_v43, %v1974_v23  ;;  %v7176_v43 = vld [vmem:[#allocation64_spill] sm:$0xff] }
 0x67b   :  { %2492 = vadd.xlane.f32.xlu1 %v2491_v41  ;;  %v3104_v32 = vsel %vm6839_vm6, %v3103_v33, %v3102_v40  ;;  %v1972_v41 = vsel %vm1522_vm3, %v5933_v27, 0.0  ;;  %v1973_v33 = vsel %vm1523_vm1, %v5936_v20, 0.0  ;;  %v2948_v48 = vsel %vm6840_vm9, %v2946_v38, %v2944_v13 }
 0x67c   :  { %vm1528_vm3 = vcmp.eq.s32.totalorder %v7173_v52, %v4022_v63  ;;  %v2950_v58 = vperm.slane %v7174_v8, %v5663_v26  ;;  %v3012_v0 = vsel %vm2951_vm0, %v3011_v45, %v3010_v21  ;;  %vm1529_vm1 = vcmp.eq.s32.totalorder %v7173_v52, %v4027_v5 }
 0x67d   :  { %v2370_v60 = vpop.xlane.xlu2 %2369  ;;  %vm7175_vm6 = vcmask 720512   ;;  %v2500_v31 = vadd.f32 %v1973_v33, %v1972_v41  ;;  %v2958_v13 = vperm.slane %v7176_v43, %v5666_v54  ;;  %v1981_v41 = vsel %vm1531_vm4, %v5708_v14, 0.0 }
 0x67e   :  { %v2367_v40 = vpop.xlane.xlu1 %2366  ;;  %v3107_v10 = vperm.slane %v2370_v60, %v5663_v26  ;;  %v3014_v56 = vsel %vm7175_vm6, %v3013_v39, %v3012_v0  ;;  %v2952_v23 = vsel %vm2951_vm0, %v2950_v58, %v2948_v48  ;;  %v7177_v60 = vld [vmem:[#allocation31_spill] sm:$0xff]  ;;  %v3019_v39 = vperm.slane %v5521_v22, %v5701_v50  ;;  %v7179_v48 = vld [vmem:[#allocation28_spill] sm:$0xff]  ;;  %v6003_v58 = vpop.xlane.xlu0 %2435 }
 0x67f   :  { %v3105_v61 = vperm.slane %v2367_v40, %v5643_v29  ;;  %v3015_v40 = vperm.slane %v5505_v2, %v5666_v54  ;;  %v2954_v45 = vperm.slane %v7177_v60, %v5675_v37  ;;  %v1979_v14 = vsel %vm1529_vm1, %v5994_v1, 0.0  ;;  %v7184_v60 = vld [vmem:[#allocation67_spill] sm:$0xff] }
 0x680   :  { %v3115_v8 = vperm.slane %v5736_v7, %v5701_v50 }
 0x681   :  { %v3106_v38 = vsel %vm6840_vm9, %v3105_v61, %v3104_v32  ;;  %v1980_v32 = vsel %vm1530_vm11, %v5705_v4, 0.0  ;;  %vm7178_vm9 = vcmask 786112   ;;  %v3017_v61 = vperm.slane %v7179_v48, %v5695_v17 }
 0x682   :  { %v3108_v21 = vsel %vm2951_vm0, %v3107_v10, %v3106_v38  ;;  %2504 = vadd.xlane.f32.xlu2 %v2503_v46  ;;  %v3016_v2 = vsel %vm7178_vm9, %v3015_v40, %v3014_v56  ;;  %v5988_v46 = vld [vmem:[#allocation5 + $0x60] sm:$0xff]  ;;  %vm7180_vm9 = vmmov %vm7175_vm6  ;;  %vm7181_vm11 = vcmask 786112   ;;  %v2512_v56 = vadd.f32 %v1981_v41, %v1980_v32  ;;  %v7182_v38 = vld [vmem:[#allocation29_spill] sm:$0xff] }
 0x683   :  { %2501 = vadd.xlane.f32.xlu1 %v2500_v31  ;;  %v3110_v33 = vsel %vm7175_vm6, %v3109_v25, %v3108_v21  ;;  %v1978_v4 = vsel %vm1528_vm3, %v5988_v46, 0.0  ;;  %v2956_v25 = vsel %vm7180_vm9, %v2954_v45, %v2952_v23  ;;  %vm1536_vm4 = vcmp.eq.s32.totalorder %v7182_v38, %v4022_v63  ;;  %v7183_v31 = vld [vmem:[#allocation60_spill] sm:$0xff]  ;;  %vm7185_vm1 = vmmov %vm7181_vm11 }
 0x684   :  { %v2960_v0 = vsel %vm7181_vm11, %v2958_v13, %v2956_v25  ;;  %v2962_v43 = vperm.slane %v7183_v31, %v5695_v17  ;;  %v3018_v52 = vsel %vm6842_vm8, %v3017_v61, %v3016_v2  ;;  %vm1537_vm3 = vcmp.eq.s32.totalorder %v7182_v38, %v4027_v5  ;;  %v7186_v2 = vld [vmem:[#allocation56_spill] sm:$0xff]  ;;  %v7187_v61 = vld [vmem:[#allocation74_spill] sm:$0xff]  ;;  %v7190_v31 = vld [vmem:[#allocation49_spill] sm:$0xff] }
 0x685   :  { %v2379_v22 = vpop.xlane.xlu2 %2378  ;;  %v3020_v7 = vsel %vm6841_vm10, %v3019_v39, %v3018_v52  ;;  %v2509_v13 = vadd.f32 %v1979_v14, %v1978_v4  ;;  %v2970_v45 = vperm.slane %v7184_v60, %v5698_v15  ;;  %v3021_v32 = vperm.slane %v5519_v49, %v5698_v15  ;;  %v6029_v4 = vld [vmem:[#allocation5 + $0xa0] sm:$0xff] }
 0x686   :  { %v2376_v10 = vpop.xlane.xlu1 %2375  ;;  %v3113_v40 = vperm.slane %v2379_v22, %v5695_v17  ;;  %v2964_v21 = vsel %vm6842_vm8, %v2962_v43, %v2960_v0  ;;  %v2966_v48 = vperm.slane %v7186_v2, %v5701_v50  ;;  %vm1534_vm6 = vcmp.eq.s32.totalorder %v7187_v61, %v4022_v63  ;;  %v7189_v0 = vld [vmem:[#allocation40_spill] sm:$0xff]  ;;  %v3636_v43 = vld [vmem:[#allocation5 + $0x90] sm:$0xff] }
 0x687   :  { %v3111_v23 = vperm.slane %v2376_v10, %v5666_v54  ;;  %vm1535_vm9 = vcmp.eq.s32.totalorder %v7187_v61, %v4027_v5  ;;  %v1986_v49 = vsel %vm1536_vm4, %v6029_v4, 0.0  ;;  %vm7188_vm11 = vcmask 982912   ;;  %v7193_v2 = vld [vmem:[#allocation9_spill] sm:$0xff] }
 0x688   :  { %v3022_v25 = vsel %vm7188_vm11, %v3021_v32, %v3020_v7  ;;  %v3023_v10 = vperm.slane %v7189_v0, %v5728_v47  ;;  %vm1542_vm4 = vcmp.eq.s32.totalorder %v7190_v31, %v4022_v63  ;;  %v1984_v52 = vsel %vm1534_vm6, %v3636_v43, 0.0 }
 0x689   :  { %v3112_v41 = vsel %vm7185_vm1, %v3111_v23, %v3110_v33  ;;  %v6035_v33 = vld [vmem:[#allocation5 + $0xa8] sm:$0xff]  ;;  %v3637_v23 = vld [vmem:[#allocation5 + $0x98] sm:$0xff]  ;;  %vm3330_vm1 = vcmask 1041409   ;;  %vm1540_vm6 = vcmp.eq.s32.totalorder %v7193_v2, %v4022_v63 }
 0x68a   :  { %v3114_v39 = vsel %vm6842_vm8, %v3113_v40, %v3112_v41  ;;  %2513 = vadd.xlane.f32.xlu2 %v2512_v56  ;;  %v1987_v14 = vsel %vm1537_vm3, %v6035_v33, 0.0  ;;  %v2968_v56 = vsel %vm6841_vm10, %v2966_v48, %v2964_v21  ;;  %v1985_v38 = vsel %vm1535_vm9, %v3637_v23, 0.0  ;;  %vm7191_vm3 = vmmov %vm7188_vm11  ;;  %v3639_v23 = vld [vmem:[#allocation5 + $0xc8] sm:$0xff] }
 0x68b   :  { %2510 = vadd.xlane.f32.xlu1 %v2509_v13  ;;  %v3116_v22 = vsel %vm6841_vm10, %v3115_v8, %v3114_v39  ;;  %v2972_v7 = vsel %vm7191_vm3, %v2970_v45, %v2968_v56  ;;  %v6052_v13 = vpop.xlane.xlu0 %2444  ;;  %v7192_v8 = vld [vmem:[#allocation62_spill] sm:$0xff]  ;;  %v3024_v21 = vsel %vm2975_vm7, %v3023_v10, %v3022_v25  ;;  %v2521_v41 = vadd.f32 %v1987_v14, %v1986_v49  ;;  %v7194_v49 = vld [vmem:[#allocation83_spill] sm:$0xff] }
 0x68c   :  { %v2974_v60 = vperm.slane %v7192_v8, %v5728_v47  ;;  %vm1541_vm11 = vcmp.eq.s32.totalorder %v7193_v2, %v4027_v5  ;;  %vm3332_vm9 = vcmask 1042434   ;;  %vm3334_vm3 = vcmask 1043459  }
 0x68d   :  { %v2388_v40 = vpop.xlane.xlu2 %2387  ;;  %v2518_v39 = vadd.f32 %v1985_v38, %v1984_v52  ;;  %v3026_v25 = vperm.slane %v5536_v9, %v5586_v57  ;;  %v3025_v14 = vperm.slane %v7194_v49, %v4022_v63  ;;  %vm7195_vm10 = vcmask 982912   ;;  %v3638_v52 = vld [vmem:[#allocation5 + $0xc0] sm:$0xff] }
 0x68e   :  { %v2385_v32 = vpop.xlane.xlu1 %2384  ;;  %v2976_v48 = vsel %vm2975_vm7, %v2974_v60, %v2972_v7  ;;  %v3119_v61 = vperm.slane %v2388_v40, %v5728_v47  ;;  %vm1543_vm8 = vcmp.eq.s32.totalorder %v7190_v31, %v4027_v5  ;;  %v1990_v9 = vsel %vm1540_vm6, %v3638_v52, 0.0  ;;  %v6092_v60 = vld [vmem:[#allocation5 + $0xd8] sm:$0xff] }
 0x68f   :  { %v3117_v45 = vperm.slane %v2385_v32, %v5698_v15  ;;  %v3331_v0 = vsel %vm3330_vm1, %v3024_v21, %v2976_v48  ;;  %v1991_v38 = vsel %vm1541_vm11, %v3639_v23, 0.0  ;;  %7198 = vst [vmem:[#allocation32_spill] sm:$0xff] %v6092_v60  ;;  %v1993_v21 = vsel %vm1543_vm8, %v6092_v60, 0.0  ;;  %v7199_v32 = vld [vmem:[#allocation71_spill] sm:$0xff]  ;;  %v7203_v23 = vld [vmem:[#allocation13_spill] sm:$0xff] }
 0x690   :  { %v3333_v56 = vsel %vm3332_vm9, %v5742_v19, %v3331_v0  ;;  %v6086_v19 = vld [vmem:[#allocation5 + $0xd0] sm:$0xff]  ;;  %v3027_v2 = vsel %vm2919_vm12, %v3026_v25, %v3025_v14  ;;  %v3121_v31 = vperm.slane %v5755_v11, %v4022_v63  ;;  %v3126_v0 = vperm.slane %v5780_v44, %v5600_v55 }
 0x691   :  { %v3118_v10 = vsel %vm7195_vm10, %v3117_v45, %v3116_v22  ;;  %v7196_v22 = vld [vmem:[#allocation72_spill] sm:$0xff]  ;;  %7197 = vst [vmem:[#allocation101_spill] sm:$0xff] %v6086_v19  ;;  %v1992_v8 = vsel %vm1542_vm4, %v6086_v19, 0.0  ;;  %v7200_v45 = vld [vmem:[#allocation86_spill] sm:$0xff]  ;;  %v2980_v11 = vperm.slane %v7203_v23, %v5597_v28 }
 0x692   :  { %v3120_v43 = vsel %vm2975_vm7, %v3119_v61, %v3118_v10  ;;  %2522 = vadd.xlane.f32.xlu2 %v2521_v41  ;;  %v2978_v7 = vperm.slane %v7196_v22, %v5586_v57  ;;  %v2977_v41 = vperm.slane %v7199_v32, %v4022_v63  ;;  %v3030_v48 = vperm.slane %v7200_v45, %v5600_v55  ;;  %v7205_v45 = vld [vmem:[#allocation75_spill] sm:$0xff] }
 0x693   :  { %v6084_v40 = vsel %vm3334_vm3, %v3120_v43, %v3333_v56  ;;  %2519 = vadd.xlane.f32.xlu1 %v2518_v39  ;;  %v7201_v39 = vld [vmem:[#allocation38_spill] sm:$0xff]  ;;  %v2527_v56 = vadd.f32 %v1991_v38, %v1990_v9  ;;  %v7202_v43 = vld [vmem:[#allocation79_spill] sm:$0xff]  ;;  %v6112_v52 = vpop.xlane.xlu0 %2453  ;;  %v2530_v9 = vadd.f32 %v1993_v21, %v1992_v8  ;;  %v7204_v38 = vld [vmem:[#allocation80_spill] sm:$0xff] }
 0x694   :  { %v3028_v49 = vperm.slane %v7201_v39, %v5597_v28  ;;  %vm1546_vm8 = vcmp.eq.s32.totalorder %v7202_v43, %v4022_v63  ;;  %vm1547_vm10 = vcmp.eq.s32.totalorder %v7202_v43, %v4027_v5  ;;  %v2979_v25 = vsel %vm2919_vm12, %v2978_v7, %v2977_v41  ;;  %v7207_v21 = vld [vmem:[#allocation121_spill] sm:$0xff] }
 0x695   :  { %v2397_v61 = vpop.xlane.xlu2 %2396  ;;  %vm1548_vm4 = vcmp.eq.s32.totalorder %v7204_v38, %v4022_v63  ;;  %vm1549_vm6 = vcmp.eq.s32.totalorder %v7204_v38, %v4027_v5  ;;  %v2981_v41 = vsel %vm2923_vm13, %v2980_v11, %v2979_v25  ;;  %v2984_v39 = vperm.slane %v7205_v45, %v5608_v24  ;;  %v7209_v11 = vld [vmem:[#allocation90_spill] sm:$0xff] }
 0x696   :  { %v2394_v10 = vpop.xlane.xlu1 %2393  ;;  %v3029_v22 = vsel %vm2923_vm13, %v3028_v49, %v3027_v2  ;;  %v3124_v44 = vperm.slane %v2397_v61, %v5597_v28  ;;  %v7206_v2 = vld [vmem:[#allocation81_spill] sm:$0xff]  ;;  %v2982_v61 = vperm.slane %v7207_v21, %v5600_v55  ;;  %v7210_v21 = vld [vmem:[#allocation70_spill] sm:$0xff] }
 0x697   :  { %v3122_v14 = vperm.slane %v2394_v10, %v5586_v57  ;;  %v3031_v7 = vsel %vm2927_vm14, %v3030_v48, %v3029_v22  ;;  %v3032_v49 = vperm.slane %v7206_v2, %v5608_v24  ;;  %v7208_v48 = vld [vmem:[#allocation42_spill] sm:$0xff]  ;;  %v3036_v22 = vperm.slane %v7209_v11, %v5633_v16 }
 0x698   :  { %v2983_v45 = vsel %vm2927_vm14, %v2982_v61, %v2981_v41 }
 0x699   :  { %v3123_v32 = vsel %vm2919_vm12, %v3122_v14, %v3121_v31  ;;  %v3034_v31 = vperm.slane %v7208_v48, %v5611_v59  ;;  %v3642_v14 = vld [vmem:[#allocation5 + $0xf0] sm:$0xff]  ;;  %v3033_v23 = vsel %vm2931_vm15, %v3032_v49, %v3031_v7  ;;  %v2985_v43 = vsel %vm2931_vm15, %v2984_v39, %v2983_v45 }
 0x69a   :  { %v3125_v8 = vsel %vm2923_vm13, %v3124_v44, %v3123_v32  ;;  %2531 = vadd.xlane.f32.xlu2 %v2530_v9  ;;  %v1996_v25 = vsel %vm1546_vm8, %v3642_v14, 0.0  ;;  %v3643_v44 = vld [vmem:[#allocation5 + $0xf8] sm:$0xff]  ;;  %v6144_v9 = vld [vmem:[#allocation5 + $0x100] sm:$0xff]  ;;  %v6150_v32 = vld [vmem:[#allocation5 + $0x108] sm:$0xff]  ;;  %v2986_v48 = vperm.slane %v7210_v21, %v5611_v59 }
 0x69b   :  { %2528 = vadd.xlane.f32.xlu1 %v2527_v56  ;;  %v3127_v10 = vsel %vm2927_vm14, %v3126_v0, %v3125_v8  ;;  %v1997_v56 = vsel %vm1547_vm10, %v3643_v44, 0.0  ;;  %v1998_v0 = vsel %vm1548_vm4, %v6144_v9, 0.0  ;;  %v1999_v7 = vsel %vm1549_vm6, %v6150_v32, 0.0  ;;  %v7211_v39 = vld [vmem:[#allocation41_spill] sm:$0xff] }
 0x69c   :  { %v3132_v8 = vperm.slane %v5816_v36, %v5633_v16  ;;  %v3035_v14 = vsel %vm2935_vm2, %v3034_v31, %v3033_v23  ;;  %v2539_v60 = vadd.f32 %v1999_v7, %v1998_v0  ;;  %v2536_v41 = vadd.f32 %v1997_v56, %v1996_v25  ;;  %v7212_v36 = vld [vmem:[#allocation93_spill] sm:$0xff]  ;;  %v7213_v31 = vld [vmem:[#allocation122_spill] sm:$0xff] }
 0x69d   :  { %v2406_v2 = vpop.xlane.xlu2 %2405  ;;  %v3037_v44 = vsel %vm2939_vm5, %v3036_v22, %v3035_v14  ;;  %v2987_v61 = vsel %vm2935_vm2, %v2986_v48, %v2985_v43  ;;  %v2990_v45 = vperm.slane %v7211_v39, %v5638_v18  ;;  %v3038_v19 = vperm.slane %v7212_v36, %v5638_v18  ;;  %v7214_v22 = vld [vmem:[#allocation84_spill] sm:$0xff]  ;;  %v6186_v43 = vld [vmem:[#allocation5 + $0x130] sm:$0xff]  ;;  %v6189_v14 = vld [vmem:[#allocation5 + $0x138] sm:$0xff] }
 0x69e   :  { %v2403_v49 = vpop.xlane.xlu1 %2402  ;;  %v3130_v38 = vperm.slane %v2406_v2, %v5611_v59  ;;  %v2988_v23 = vperm.slane %v7213_v31, %v5633_v16  ;;  %vm1554_vm11 = vcmp.eq.s32.totalorder %v7214_v22, %v4022_v63  ;;  %vm1555_vm8 = vcmp.eq.s32.totalorder %v7214_v22, %v4027_v5 }
 0x69f   :  { %v3128_v11 = vperm.slane %v2403_v49, %v5608_v24  ;;  %v6174_v49 = vpop.xlane.xlu0 %2462  ;;  %vm7215_vm10 = vcmask 523712   ;;  %v2004_v48 = vsel %vm1554_vm11, %v6186_v43, 0.0  ;;  %vm7219_vm6 = vcmask 589312  }
 0x6a0   :  { %v3039_v56 = vsel %vm7215_vm10, %v3038_v19, %v3037_v44  ;;  %v2989_v2 = vsel %vm2939_vm5, %v2988_v23, %v2987_v61  ;;  %vm7217_vm4 = vmmov %vm7215_vm10  ;;  %v7218_v19 = vld [vmem:[#allocation73_spill] sm:$0xff] }
 0x6a1   :  { %v3129_v21 = vsel %vm2931_vm15, %v3128_v11, %v3127_v10  ;;  %v7216_v10 = vld [vmem:[#allocation47_spill] sm:$0xff]  ;;  %v2005_v11 = vsel %vm1555_vm8, %v6189_v14, 0.0  ;;  %v2992_v44 = vperm.slane %v7218_v19, %v5643_v29  ;;  %vm7220_vm10 = vmmov %vm7219_vm6 }
 0x6a2   :  { %v3131_v25 = vsel %vm2935_vm2, %v3130_v38, %v3129_v21  ;;  %2540 = vadd.xlane.f32.xlu2 %v2539_v60  ;;  %v3040_v7 = vperm.slane %v7216_v10, %v5643_v29  ;;  %v2991_v60 = vsel %vm7217_vm4, %v2990_v45, %v2989_v2  ;;  %v2548_v21 = vadd.f32 %v2005_v11, %v2004_v48  ;;  %vm7221_vm11 = vmmov %vm7217_vm4  ;;  %v7222_v45 = vld [vmem:[#allocation87_spill] sm:$0xff]  ;;  %v7223_v10 = vld [vmem:[#allocation85_spill] sm:$0xff] }
 0x6a3   :  { %2537 = vadd.xlane.f32.xlu1 %v2536_v41  ;;  %v3133_v0 = vsel %vm2939_vm5, %v3132_v8, %v3131_v25  ;;  %v2993_v61 = vsel %vm7220_vm10, %v2992_v44, %v2991_v60  ;;  %vm1560_vm8 = vcmp.eq.s32.totalorder %v7222_v45, %v4022_v63  ;;  %vm1561_vm4 = vcmp.eq.s32.totalorder %v7222_v45, %v4027_v5  ;;  %v6218_v2 = vld [vmem:[#allocation5 + $0x160] sm:$0xff]  ;;  %v6221_v11 = vld [vmem:[#allocation5 + $0x168] sm:$0xff]  ;;  %v3651_v44 = vld [vmem:[#allocation5 + $0x158] sm:$0xff] }
 0x6a4   :  { %v3041_v8 = vsel %vm7219_vm6, %v3040_v7, %v3039_v56  ;;  %vm1558_vm10 = vcmp.eq.s32.totalorder %v7223_v10, %v4022_v63  ;;  %v7224_v7 = vld [vmem:[#allocation17_spill] sm:$0xff]  ;;  %v2010_v48 = vsel %vm1560_vm8, %v6218_v2, 0.0 }
 0x6a5   :  { %v2415_v38 = vpop.xlane.xlu2 %2414  ;;  %v3344_v31 = vsel %vm3330_vm1, %v3041_v8, %v2993_v61  ;;  %vm1559_vm1 = vcmp.eq.s32.totalorder %v7223_v10, %v4027_v5 }
 0x6a6   :  { %v2412_v41 = vpop.xlane.xlu1 %2411  ;;  %v3136_v36 = vperm.slane %v2415_v38, %v5643_v29  ;;  %v3345_v25 = vsel %vm3332_vm9, %v5812_v51, %v3344_v31  ;;  %v2011_v51 = vsel %vm1561_vm4, %v6221_v11, 0.0  ;;  %v3650_v38 = vld [vmem:[#allocation5 + $0x150] sm:$0xff]  ;;  %v2009_v8 = vsel %vm1559_vm1, %v3651_v44, 0.0 }
 0x6a7   :  { %v3134_v39 = vperm.slane %v2412_v41, %v5638_v18  ;;  %v6201_v22 = vpop.xlane.xlu0 %2471  ;;  %v2008_v19 = vsel %vm1558_vm10, %v3650_v38, 0.0  ;;  %v3143_v31 = vperm.slane %v5923_v34, %v5600_v55 }
 0x6a8   :  { %v2554_v45 = vadd.f32 %v2009_v8, %v2008_v19  ;;  %v6248_v19 = vld [vmem:[#allocation5 + $0x188] sm:$0xff] }
 0x6a9   :  { %v3135_v23 = vsel %vm7221_vm11, %v3134_v39, %v3133_v0  ;;  %v3138_v39 = vperm.slane %v5863_v62, %v4022_v63  ;;  %v7226_v62 = vld [vmem:[#allocation88_spill] sm:$0xff] }
 0x6aa   :  { %v3137_v56 = vsel %vm7219_vm6, %v3136_v36, %v3135_v23  ;;  %2549 = vadd.xlane.f32.xlu2 %v2548_v21  ;;  %v2557_v21 = vadd.f32 %v2011_v51, %v2010_v48  ;;  %vm1564_vm11 = vcmp.eq.s32.totalorder %v7226_v62, %v4022_v63  ;;  %vm1565_vm8 = vcmp.eq.s32.totalorder %v7226_v62, %v4027_v5 }
 0x6ab   :  { %v6215_v0 = vsel %vm3334_vm3, %v3137_v56, %v3345_v25  ;;  %2546 = vadd.xlane.f32.xlu1 %v7224_v7  ;;  %v7225_v25 = vld [vmem:[#allocation91_spill] sm:$0xff]  ;;  %v2015_v44 = vsel %vm1565_vm8, %v6248_v19, 0.0  ;;  %vm7231_vm8 = vcmask 589312  }
 0x6ac   :  { %vm1566_vm9 = vcmp.eq.s32.totalorder %v7225_v25, %v4022_v63  ;;  %vm1567_vm3 = vcmp.eq.s32.totalorder %v7225_v25, %v4027_v5  ;;  %v7228_v25 = vld [vmem:[#allocation92_spill] sm:$0xff] }
 0x6ad   :  { %v2424_v60 = vpop.xlane.xlu2 %2423  ;;  %v2016_v7 = vsel %vm1566_vm9, %v5858_v53, 0.0  ;;  %v2017_v48 = vsel %vm1567_vm3, %v5865_v3, 0.0  ;;  %vm1570_vm10 = vcmp.eq.s32.totalorder %v7228_v25, %v4022_v63  ;;  %vm1571_vm1 = vcmp.eq.s32.totalorder %v7228_v25, %v4027_v5  ;;  %v7232_v25 = vld [vmem:[#allocation23_spill] sm:$0xff] }
 0x6ae   :  { %v2421_v41 = vpop.xlane.xlu1 %2420  ;;  %v3141_v36 = vperm.slane %v2424_v60, %v5597_v28  ;;  %v6245_v60 = vld [vmem:[#allocation5 + $0x180] sm:$0xff]  ;;  %vm7229_vm9 = vcmask 523712  }
 0x6af   :  { %v3139_v61 = vperm.slane %v2421_v41, %v5586_v57  ;;  %v6241_v10 = vpop.xlane.xlu0 %2480  ;;  %v2014_v38 = vsel %vm1564_vm11, %v6245_v60, 0.0 }
 0x6b1   :  { %v3140_v23 = vsel %vm2919_vm12, %v3139_v61, %v3138_v39  ;;  %v2566_v61 = vadd.f32 %v2017_v48, %v2016_v7  ;;  %v3654_v48 = vld [vmem:[#allocation5 + $0x20] sm:$0xff] }
 0x6b2   :  { %v3142_v56 = vsel %vm2923_vm13, %v3141_v36, %v3140_v23  ;;  %2558 = vadd.xlane.f32.xlu2 %v2557_v21  ;;  %v3149_v36 = vperm.slane %v6003_v58, %v5633_v16  ;;  %v7227_v23 = vld [vmem:[#allocation19_spill] sm:$0xff] }
 0x6b3   :  { %2555 = vadd.xlane.f32.xlu1 %v2554_v45  ;;  %v3144_v34 = vsel %vm2927_vm14, %v3143_v31, %v3142_v56  ;;  %v2563_v31 = vadd.f32 %v2015_v44, %v2014_v38  ;;  %vm1572_vm4 = vcmp.eq.s32.totalorder %v7227_v23, %v4022_v63  ;;  %vm1573_vm6 = vcmp.eq.s32.totalorder %v7227_v23, %v4027_v5  ;;  %v3655_v38 = vld [vmem:[#allocation5 + $0x28] sm:$0xff]  ;;  %v7230_v23 = vld [vmem:[#allocation98_spill] sm:$0xff] }
 0x6b4   :  { %v2022_v62 = vsel %vm1572_vm4, %v5933_v27, 0.0  ;;  %v2021_v44 = vsel %vm1571_vm1, %v3655_v38, 0.0  ;;  %vm1578_vm3 = vcmp.eq.s32.totalorder %v7230_v23, %v4022_v63  ;;  %vm1579_vm11 = vcmp.eq.s32.totalorder %v7230_v23, %v4027_v5  ;;  %v7234_v38 = vld [vmem:[#allocation95_spill] sm:$0xff]  ;;  %v7238_v23 = vld [vmem:[#allocation118_spill] sm:$0xff] }
 0x6b5   :  { %v2433_v51 = vpop.xlane.xlu2 %2432  ;;  %vm1576_vm4 = vcmp.eq.s32.totalorder %v7232_v25, %v4022_v63 }
 0x6b6   :  { %v2430_v8 = vpop.xlane.xlu1 %2429  ;;  %v3147_v39 = vperm.slane %v2433_v51, %v5611_v59  ;;  %v2020_v51 = vsel %vm1570_vm10, %v3654_v48, 0.0  ;;  %v7233_v48 = vld [vmem:[#allocation96_spill] sm:$0xff]  ;;  %vm7235_vm10 = vcmask 720512  }
 0x6b7   :  { %v3145_v41 = vperm.slane %v2430_v8, %v5608_v24  ;;  %v6266_v56 = vpop.xlane.xlu0 %2489 }
 0x6b9   :  { %v3146_v21 = vsel %vm2931_vm15, %v3145_v41, %v3144_v34  ;;  %v2023_v34 = vsel %vm1573_vm6, %v5936_v20, 0.0  ;;  %vm1577_vm6 = vcmp.eq.s32.totalorder %v7232_v25, %v4027_v5 }
 0x6ba   :  { %v3148_v45 = vsel %vm2935_vm2, %v3147_v39, %v3146_v21  ;;  %2567 = vadd.xlane.f32.xlu2 %v2566_v61  ;;  %v2575_v61 = vadd.f32 %v2023_v34, %v2022_v62  ;;  %v2029_v62 = vsel %vm1579_vm11, %v5994_v1, 0.0  ;;  %v7236_v1 = vld [vmem:[#allocation76_spill] sm:$0xff]  ;;  %vm1616_vm11 = vcmp.eq.s32.totalorder %v7238_v23, %v4022_v63 }
 0x6bb   :  { %2564 = vadd.xlane.f32.xlu1 %v2563_v31  ;;  %v3150_v58 = vsel %vm2939_vm5, %v3149_v36, %v3148_v45  ;;  %v3155_v36 = vperm.slane %v6052_v13, %v5663_v26  ;;  %v2572_v31 = vadd.f32 %v2021_v44, %v2020_v51  ;;  %v2026_v51 = vsel %vm1576_vm4, %v7233_v48, 0.0 }
 0x6bc   :  { %v2027_v44 = vsel %vm1577_vm6, %v7234_v38, 0.0  ;;  %vm1618_vm1 = vcmp.eq.s32.totalorder %v7236_v1, %v4022_v63  ;;  %vm7239_vm4 = vcmask 851712   ;;  %vm7240_vm6 = vcmask 917312  }
 0x6bd   :  { %v2442_v7 = vpop.xlane.xlu2 %2441 }
 0x6be   :  { %v2439_v8 = vpop.xlane.xlu1 %2438  ;;  %v3153_v39 = vperm.slane %v2442_v7, %v5643_v29 }
 0x6bf   :  { %v3151_v41 = vperm.slane %v2439_v8, %v5638_v18  ;;  %v6287_v7 = vpop.xlane.xlu0 %2498 }
 0x6c1   :  { %v3152_v21 = vsel %vm7229_vm9, %v3151_v41, %v3150_v58  ;;  %v2028_v58 = vsel %vm1578_vm3, %v5988_v46, 0.0  ;;  %vm1619_vm9 = vcmp.eq.s32.totalorder %v7236_v1, %v4027_v5  ;;  %vm7237_vm3 = vcmask 786112  }
 0x6c2   :  { %v3154_v45 = vsel %vm7231_vm8, %v3153_v39, %v3152_v21  ;;  %2576 = vadd.xlane.f32.xlu2 %v2575_v61  ;;  %v2584_v61 = vadd.f32 %v2029_v62, %v2028_v58  ;;  %v2581_v21 = vadd.f32 %v2027_v44, %v2026_v51  ;;  %vm1617_vm8 = vcmp.eq.s32.totalorder %v7238_v23, %v4027_v5 }
 0x6c3   :  { %2573 = vadd.xlane.f32.xlu1 %v2572_v31  ;;  %v3156_v13 = vsel %vm2951_vm0, %v3155_v36, %v3154_v45  ;;  %v3161_v36 = vperm.slane %v6112_v52, %v5695_v17  ;;  %v2068_v45 = vsel %vm1618_vm1, %v5876_v30, 0.0  ;;  %v2069_v25 = vsel %vm1619_vm9, %v5882_v42, 0.0  ;;  %v7241_v42 = vld [vmem:[#allocation120_spill] sm:$0xff] }
 0x6c4   :  { %v2066_v58 = vsel %vm1616_vm11, %v5858_v53, 0.0  ;;  %v2067_v62 = vsel %vm1617_vm8, %v5865_v3, 0.0  ;;  %v2644_v44 = vadd.f32 %v2069_v25, %v2068_v45  ;;  %vm1624_vm1 = vcmp.eq.s32.totalorder %v7241_v42, %v4022_v63  ;;  %v7243_v3 = vld [vmem:[#allocation20_spill] sm:$0xff] }
 0x6c5   :  { %v2451_v34 = vpop.xlane.xlu2 %2450  ;;  %vm1625_vm9 = vcmp.eq.s32.totalorder %v7241_v42, %v4027_v5  ;;  %vm1622_vm11 = vcmp.eq.s32.totalorder %v7243_v3, %v4022_v63  ;;  %vm1623_vm8 = vcmp.eq.s32.totalorder %v7243_v3, %v4027_v5  ;;  %v3172_v45 = vperm.slane %v6201_v22, %v5597_v28 }
 0x6c6   :  { %v2448_v8 = vpop.xlane.xlu1 %2447  ;;  %v3159_v39 = vperm.slane %v2451_v34, %v5666_v54  ;;  %v2073_v1 = vsel %vm1623_vm8, %v5936_v20, 0.0  ;;  %v7245_v20 = vld [vmem:[#allocation61_spill] sm:$0xff]  ;;  %v3178_v42 = vperm.slane %v6241_v10, %v5611_v59  ;;  %v3184_v10 = vperm.slane %v6266_v56, %v5643_v29 }
 0x6c7   :  { %v3157_v41 = vperm.slane %v2448_v8, %v5675_v37  ;;  %v6311_v51 = vpop.xlane.xlu0 %2507  ;;  %v3167_v8 = vperm.slane %v6174_v49, %v5728_v47  ;;  %vm7248_vm8 = vcmask 523712  }
 0x6c9   :  { %v3158_v46 = vsel %vm7235_vm10, %v3157_v41, %v3156_v13  ;;  %v2641_v41 = vadd.f32 %v2067_v62, %v2066_v58  ;;  %vm3336_vm10 = vcmask 1044484   ;;  %v7246_v58 = vld [vmem:[#allocation14_spill] sm:$0xff] }
 0x6ca   :  { %v3160_v31 = vsel %vm7237_vm3, %v3159_v39, %v3158_v46  ;;  %2585 = vadd.xlane.f32.xlu2 %v2584_v61  ;;  %vm7242_vm3 = vcmask 982912   ;;  %v2074_v61 = vsel %vm1624_vm1, %v5677_v12, 0.0  ;;  %vm1598_vm1 = vcmp.eq.s32.totalorder %v7245_v20, %v4022_v63 }
 0x6cb   :  { %2582 = vadd.xlane.f32.xlu1 %v2581_v21  ;;  %v3162_v52 = vsel %vm7239_vm4, %v3161_v36, %v3160_v31  ;;  %v2075_v36 = vsel %vm1625_vm9, %v5680_v35, 0.0  ;;  %v2072_v21 = vsel %vm1622_vm11, %v5933_v27, 0.0  ;;  %v7244_v35 = vld [vmem:[#allocation97_spill] sm:$0xff]  ;;  %vm1599_vm9 = vcmp.eq.s32.totalorder %v7245_v20, %v4027_v5 }
 0x6cc   :  { %vm1600_vm4 = vcmp.eq.s32.totalorder %v7244_v35, %v4022_v63 }
 0x6cd   :  { %v2460_v13 = vpop.xlane.xlu2 %2459  ;;  %v2050_v22 = vsel %vm1600_vm4, %v5771_v6, 0.0 }
 0x6ce   :  { %v2457_v34 = vpop.xlane.xlu1 %2456  ;;  %v3165_v38 = vperm.slane %v2460_v13, %v5698_v15  ;;  %v2650_v13 = vadd.f32 %v2073_v1, %v2072_v21 }
 0x6cf   :  { %v3163_v48 = vperm.slane %v2457_v34, %v5701_v50  ;;  %v6339_v25 = vpop.xlane.xlu0 %2516 }
 0x6d1   :  { %v3164_v30 = vsel %vm7240_vm6, %v3163_v48, %v3162_v52  ;;  %vm1601_vm6 = vcmp.eq.s32.totalorder %v7244_v35, %v4027_v5  ;;  %v2048_v48 = vsel %vm1598_vm1, %v6144_v9, 0.0  ;;  %vm7251_vm1 = vcmask 589312   ;;  %v7252_v35 = vld [vmem:[#allocation21_spill] sm:$0xff] }
 0x6d2   :  { %v3166_v53 = vsel %vm7242_vm3, %v3165_v38, %v3164_v30  ;;  %2645 = vadd.xlane.f32.xlu2 %v2644_v44  ;;  %v2051_v62 = vsel %vm1601_vm6, %v7246_v58, 0.0  ;;  %v2049_v38 = vsel %vm1599_vm9, %v6150_v32, 0.0 }
 0x6d3   :  { %v3168_v49 = vsel %vm2975_vm7, %v3167_v8, %v3166_v53  ;;  %2642 = vadd.xlane.f32.xlu1 %v2641_v41  ;;  %v2617_v41 = vadd.f32 %v2051_v62, %v2050_v22  ;;  %v2614_v3 = vadd.f32 %v2049_v38, %v2048_v48 }
 0x6d4   :  { %v6329_v39 = vsel %vm3336_vm10, %v3168_v49, %v6084_v40  ;;  %v2653_v40 = vadd.f32 %v2075_v36, %v2074_v61 }
 0x6d5   :  { %v2469_v46 = vpop.xlane.xlu2 %2468 }
 0x6d6   :  { %v3170_v31 = vperm.slane %v2469_v46, %v5586_v57  ;;  %v2466_v23 = vpop.xlane.xlu1 %2465 }
 0x6d7   :  { %v3169_v52 = vperm.slane %v2466_v23, %v4022_v63  ;;  %v6360_v49 = vpop.xlane.xlu0 %2525 }
 0x6d9   :  { %v3171_v12 = vsel %vm2919_vm12, %v3170_v31, %v3169_v52 }
 0x6da   :  { %2654 = vadd.xlane.f32.xlu2 %v2653_v40  ;;  %v3173_v27 = vsel %vm2923_vm13, %v3172_v45, %v3171_v12  ;;  %v7247_v45 = vld [vmem:[#allocation44_spill] sm:$0xff]  ;;  %v7249_v12 = vld [vmem:[#allocation63_spill] sm:$0xff] }
 0x6db   :  { %2651 = vadd.xlane.f32.xlu1 %v2650_v13  ;;  %vm1650_vm3 = vcmp.eq.s32.totalorder %v7247_v45, %v4022_v63  ;;  %vm1651_vm11 = vcmp.eq.s32.totalorder %v7247_v45, %v4027_v5  ;;  %v7250_v13 = vld [vmem:[#allocation33_spill] sm:$0xff]  ;;  %v7256_v45 = vld [vmem:[#allocation34_spill] sm:$0xff] }
 0x6dc   :  { %vm1648_vm4 = vcmp.eq.s32.totalorder %v7250_v13, %v4022_v63  ;;  %vm1649_vm6 = vcmp.eq.s32.totalorder %v7250_v13, %v4027_v5  ;;  %v2100_v20 = vsel %vm1650_vm3, %v5771_v6, 0.0  ;;  %v2101_v22 = vsel %vm1651_vm11, %v7246_v58, 0.0  ;;  %v7253_v58 = vld [vmem:[#allocation78_spill] sm:$0xff]  ;;  %v7258_v13 = vld [vmem:[#allocation100_spill] sm:$0xff] }
 0x6dd   :  { %v2478_v34 = vpop.xlane.xlu2 %2477  ;;  %v2099_v48 = vsel %vm1649_vm6, %v6150_v32, 0.0  ;;  %vm1605_vm9 = vcmp.eq.s32.totalorder %v7253_v58, %v4027_v5 }
 0x6de   :  { %v2475_v44 = vpop.xlane.xlu1 %2474  ;;  %v3176_v30 = vperm.slane %v2478_v34, %v5608_v24  ;;  %v2098_v34 = vsel %vm1648_vm4, %v6144_v9, 0.0  ;;  %vm1587_vm4 = vcmp.eq.s32.totalorder %v7256_v45, %v4027_v5 }
 0x6df   :  { %v3174_v8 = vperm.slane %v2475_v44, %v5600_v55  ;;  %v6369_v52 = vpop.xlane.xlu0 %2534 }
 0x6e1   :  { %v3175_v53 = vsel %vm2927_vm14, %v3174_v8, %v3173_v27 }
 0x6e2   :  { %v3177_v61 = vsel %vm2931_vm15, %v3176_v30, %v3175_v53  ;;  %2618 = vadd.xlane.f32.xlu2 %v2617_v41  ;;  %v3189_v30 = vperm.slane %v6287_v7, %v5597_v28  ;;  %v2692_v41 = vadd.f32 %v2101_v22, %v2100_v20  ;;  %v2055_v7 = vsel %vm1605_vm9, %v6189_v14, 0.0 }
 0x6e3   :  { %2615 = vadd.xlane.f32.xlu1 %v2614_v3  ;;  %v3179_v36 = vsel %vm2935_vm2, %v3178_v42, %v3177_v61  ;;  %v2689_v42 = vadd.f32 %v2099_v48, %v2098_v34  ;;  %v2037_v22 = vsel %vm1587_vm4, %v6035_v33, 0.0 }
 0x6e5   :  { %v2487_v46 = vpop.xlane.xlu2 %2486 }
 0x6e6   :  { %v2484_v21 = vpop.xlane.xlu1 %2483  ;;  %v3182_v31 = vperm.slane %v2487_v46, %v5638_v18  ;;  %v3195_v46 = vperm.slane %v6311_v51, %v5611_v59 }
 0x6e7   :  { %v3180_v1 = vperm.slane %v2484_v21, %v5633_v16  ;;  %v6401_v9 = vpop.xlane.xlu0 %2543 }
 0x6e9   :  { %v3181_v23 = vsel %vm2939_vm5, %v3180_v1, %v3179_v36 }
 0x6ea   :  { %v3183_v40 = vsel %vm7248_vm8, %v3182_v31, %v3181_v23  ;;  %2621 = vadd.xlane.f32.xlu2 %v7249_v12  ;;  %v7254_v31 = vld [vmem:[#allocation10_spill] sm:$0xff]  ;;  %vm1586_vm8 = vcmp.eq.s32.totalorder %v7256_v45, %v4022_v63 }
 0x6eb   :  { %v3185_v56 = vsel %vm7251_vm1, %v3184_v10, %v3183_v40  ;;  %2591 = vadd.xlane.f32.xlu1 %v7252_v35  ;;  %vm1606_vm3 = vcmp.eq.s32.totalorder %v7254_v31, %v4022_v63  ;;  %vm1607_vm11 = vcmp.eq.s32.totalorder %v7254_v31, %v4027_v5  ;;  %v7255_v23 = vld [vmem:[#allocation22_spill] sm:$0xff]  ;;  %v7257_v40 = vld [vmem:[#allocation99_spill] sm:$0xff]  ;;  %v2036_v20 = vsel %vm1586_vm8, %v6029_v4, 0.0 }
 0x6ec   :  { %v6385_v27 = vsel %vm3336_vm10, %v3185_v56, %v6215_v0  ;;  %vm1604_vm10 = vcmp.eq.s32.totalorder %v7253_v58, %v4022_v63  ;;  %v2056_v12 = vsel %vm1606_vm3, %v7257_v40, 0.0  ;;  %v2057_v56 = vsel %vm1607_vm11, %v7258_v13, 0.0  ;;  %v3656_v58 = vld [vmem:[#allocation5 + $0xb0] sm:$0xff]  ;;  %v7263_v40 = vld [vmem:[#allocation43_spill] sm:$0xff] }
 0x6ed   :  { %v2496_v62 = vpop.xlane.xlu2 %2495  ;;  %v2054_v53 = vsel %vm1604_vm10, %v6186_v43, 0.0  ;;  %vm7260_vm10 = vcmask 523712   ;;  %vm7262_vm11 = vcmask 589312   ;;  %vm1656_vm8 = vcmp.eq.s32.totalorder %v7263_v40, %v4022_v63 }
 0x6ee   :  { %v3187_v38 = vperm.slane %v2496_v62, %v5586_v57  ;;  %v2493_v44 = vpop.xlane.xlu1 %2492  ;;  %v2623_v1 = vadd.f32 %v2055_v7, %v2054_v53  ;;  %v3657_v53 = vld [vmem:[#allocation5 + $0xb8] sm:$0xff]  ;;  %vm1657_vm4 = vcmp.eq.s32.totalorder %v7263_v40, %v4027_v5 }
 0x6ef   :  { %v3186_v8 = vperm.slane %v2493_v44, %v4022_v63  ;;  %v6425_v62 = vpop.xlane.xlu0 %2552  ;;  %v2626_v44 = vadd.f32 %v2057_v56, %v2056_v12  ;;  %v3658_v12 = vld [vmem:[#allocation5 + $0x140] sm:$0xff]  ;;  %v3659_v56 = vld [vmem:[#allocation5 + $0x148] sm:$0xff] }
 0x6f0   :  { %v2106_v13 = vsel %vm1656_vm8, %v3658_v12, 0.0 }
 0x6f1   :  { %v3188_v0 = vsel %vm2919_vm12, %v3187_v38, %v3186_v8  ;;  %v3201_v8 = vperm.slane %v6339_v25, %v5643_v29 }
 0x6f2   :  { %2693 = vadd.xlane.f32.xlu2 %v2692_v41  ;;  %v3190_v6 = vsel %vm2923_vm13, %v3189_v30, %v3188_v0  ;;  %v2596_v41 = vadd.f32 %v2037_v22, %v2036_v20  ;;  %v7259_v0 = vld [vmem:[#allocation117_spill] sm:$0xff] }
 0x6f3   :  { %2690 = vadd.xlane.f32.xlu1 %v2689_v42  ;;  %vm1588_vm6 = vcmp.eq.s32.totalorder %v7259_v0, %v4022_v63  ;;  %vm1589_vm1 = vcmp.eq.s32.totalorder %v7259_v0, %v4027_v5 }
 0x6f4   :  { %v2039_v7 = vsel %vm1589_vm1, %v3657_v53, 0.0 }
 0x6f5   :  { %v2505_v32 = vpop.xlane.xlu2 %2504 }
 0x6f6   :  { %v2502_v3 = vpop.xlane.xlu1 %2501  ;;  %v3193_v36 = vperm.slane %v2505_v32, %v5608_v24  ;;  %v2038_v32 = vsel %vm1588_vm6, %v3656_v58, 0.0  ;;  %vm7264_vm6 = vcmask 720512  }
 0x6f7   :  { %v3191_v61 = vperm.slane %v2502_v3, %v5600_v55 }
 0x6f9   :  { %v3192_v21 = vsel %vm2927_vm14, %v3191_v61, %v3190_v6  ;;  %v7261_v6 = vld [vmem:[#allocation35_spill] sm:$0xff]  ;;  %v6442_v61 = vpop.xlane.xlu0 %2561 }
 0x6fa   :  { %v3194_v10 = vsel %vm2931_vm15, %v3193_v36, %v3192_v21  ;;  %2666 = vadd.xlane.f32.xlu2 %v7255_v23  ;;  %vm1654_vm9 = vcmp.eq.s32.totalorder %v7261_v6, %v4022_v63  ;;  %vm1655_vm3 = vcmp.eq.s32.totalorder %v7261_v6, %v4027_v5  ;;  %v3207_v23 = vperm.slane %v6360_v49, %v5666_v54  ;;  %v7268_v6 = vld [vmem:[#allocation27_spill] sm:$0xff] }
 0x6fb   :  { %2624 = vadd.xlane.f32.xlu1 %v2623_v1  ;;  %v3196_v51 = vsel %vm2935_vm2, %v3195_v46, %v3194_v10  ;;  %v2104_v36 = vsel %vm1654_vm9, %v6186_v43, 0.0  ;;  %v2105_v46 = vsel %vm1655_vm3, %v6189_v14, 0.0  ;;  %v2599_v10 = vadd.f32 %v2039_v7, %v2038_v32  ;;  %v7265_v14 = vld [vmem:[#allocation37_spill] sm:$0xff] }
 0x6fc   :  { %vm1636_vm1 = vcmp.eq.s32.totalorder %v7265_v14, %v4022_v63  ;;  %vm7266_vm9 = vcmask 786112   ;;  %vm7267_vm3 = vcmask 851712   ;;  %vm1639_vm8 = vcmp.eq.s32.totalorder %v7268_v6, %v4027_v5 }
 0x6fd   :  { %v2514_v35 = vpop.xlane.xlu2 %2513  ;;  %v2086_v22 = vsel %vm1636_vm1, %v6029_v4, 0.0  ;;  %v2089_v32 = vsel %vm1639_vm8, %v3657_v53, 0.0 }
 0x6fe   :  { %v2511_v34 = vpop.xlane.xlu1 %2510  ;;  %v3199_v38 = vperm.slane %v2514_v35, %v5638_v18  ;;  %v2107_v35 = vsel %vm1657_vm4, %v3659_v56, 0.0  ;;  %vm7269_vm4 = vcmask 917312  }
 0x6ff   :  { %v3197_v48 = vperm.slane %v2511_v34, %v5633_v16 }
 0x701   :  { %v3198_v30 = vsel %vm2939_vm5, %v3197_v48, %v3196_v51  ;;  %v2698_v51 = vadd.f32 %v2105_v46, %v2104_v36 }
 0x702   :  { %v3200_v42 = vsel %vm7260_vm10, %v3199_v38, %v3198_v30  ;;  %2627 = vadd.xlane.f32.xlu2 %v2626_v44  ;;  %vm1637_vm10 = vcmp.eq.s32.totalorder %v7265_v14, %v4027_v5  ;;  %v6464_v44 = vpop.xlane.xlu0 %2570  ;;  %v2701_v30 = vadd.f32 %v2107_v35, %v2106_v13 }
 0x703   :  { %2597 = vadd.xlane.f32.xlu1 %v2596_v41  ;;  %v3202_v25 = vsel %vm7262_vm11, %v3201_v8, %v3200_v42  ;;  %v2087_v34 = vsel %vm1637_vm10, %v6035_v33, 0.0  ;;  %v3213_v41 = vperm.slane %v6369_v52, %v5698_v15  ;;  %vm1638_vm11 = vcmp.eq.s32.totalorder %v7268_v6, %v4022_v63  ;;  %v7270_v33 = vld [vmem:[#allocation116_spill] sm:$0xff] }
 0x704   :  { %v2671_v42 = vadd.f32 %v2087_v34, %v2086_v22  ;;  %vm1611_vm1 = vcmp.eq.s32.totalorder %v7270_v33, %v4027_v5  ;;  %vm7271_vm10 = vcmask 982912   ;;  %v7275_v34 = vld [vmem:[#allocation119_spill] sm:$0xff] }
 0x705   :  { %v2523_v3 = vpop.xlane.xlu2 %2522  ;;  %v2061_v46 = vsel %vm1611_vm1, %v6221_v11, 0.0  ;;  %vm1594_vm8 = vcmp.eq.s32.totalorder %v7275_v34, %v4022_v63 }
 0x706   :  { %v2520_v21 = vpop.xlane.xlu1 %2519  ;;  %v3205_v31 = vperm.slane %v2523_v3, %v5675_v37  ;;  %v3218_v3 = vperm.slane %v6401_v9, %v5586_v57 }
 0x707   :  { %v3203_v1 = vperm.slane %v2520_v21, %v5663_v26 }
 0x709   :  { %v3204_v45 = vsel %vm2951_vm0, %v3203_v1, %v3202_v25  ;;  %v2088_v25 = vsel %vm1638_vm11, %v3656_v58, 0.0 }
 0x70a   :  { %v3206_v43 = vsel %vm7264_vm6, %v3205_v31, %v3204_v45  ;;  %2600 = vadd.xlane.f32.xlu2 %v2599_v10  ;;  %vm1610_vm6 = vcmp.eq.s32.totalorder %v7270_v33, %v4022_v63  ;;  %v6486_v10 = vpop.xlane.xlu0 %2579  ;;  %v2674_v58 = vadd.f32 %v2089_v32, %v2088_v25 }
 0x70b   :  { %2699 = vadd.xlane.f32.xlu1 %v2698_v51  ;;  %v3208_v49 = vsel %vm7266_vm9, %v3207_v23, %v3206_v43  ;;  %v2060_v36 = vsel %vm1610_vm6, %v6218_v2, 0.0  ;;  %vm3338_vm9 = vcmask 1045509   ;;  %v7272_v51 = vld [vmem:[#allocation51_spill] sm:$0xff]  ;;  %v7273_v43 = vld [vmem:[#allocation101_spill] sm:$0xff] }
 0x70c   :  { %v2632_v45 = vadd.f32 %v2061_v46, %v2060_v36  ;;  %vm1593_vm11 = vcmp.eq.s32.totalorder %v7272_v51, %v4027_v5  ;;  %v3230_v36 = vperm.slane %v6442_v61, %v5638_v18 }
 0x70d   :  { %v2532_v20 = vpop.xlane.xlu2 %2531 }
 0x70e   :  { %v2529_v48 = vpop.xlane.xlu1 %2528  ;;  %v3211_v8 = vperm.slane %v2532_v20, %v5701_v50 }
 0x70f   :  { %v3209_v38 = vperm.slane %v2529_v48, %v5695_v17 }
 0x711   :  { %v3210_v0 = vsel %vm7267_vm3, %v3209_v38, %v3208_v49  ;;  %vm1592_vm3 = vcmp.eq.s32.totalorder %v7272_v51, %v4022_v63  ;;  %v7274_v49 = vld [vmem:[#allocation32_spill] sm:$0xff] }
 0x712   :  { %v3212_v4 = vsel %vm7269_vm4, %v3211_v8, %v3210_v0  ;;  %2702 = vadd.xlane.f32.xlu2 %v2701_v30  ;;  %v2042_v14 = vsel %vm1592_vm3, %v7273_v43, 0.0  ;;  %v2043_v12 = vsel %vm1593_vm11, %v7274_v49, 0.0  ;;  %vm1595_vm4 = vcmp.eq.s32.totalorder %v7275_v34, %v4027_v5  ;;  %v6509_v48 = vpop.xlane.xlu0 %2588  ;;  %v7276_v8 = vld [vmem:[#allocation89_spill] sm:$0xff] }
 0x713   :  { %2672 = vadd.xlane.f32.xlu1 %v2671_v42  ;;  %v3214_v52 = vsel %vm7271_vm10, %v3213_v41, %v3212_v4  ;;  %v2605_v22 = vadd.f32 %v2043_v12, %v2042_v14  ;;  %v7277_v30 = vld [vmem:[#allocation45_spill] sm:$0xff]  ;;  %v3660_v41 = vld [vmem:[#allocation5 + $0xe0] sm:$0xff]  ;;  %v3661_v42 = vld [vmem:[#allocation5 + $0xe8] sm:$0xff]  ;;  %vm7279_vm11 = vcmask 523712  }
 0x714   :  { %vm1660_vm6 = vcmp.eq.s32.totalorder %v7277_v30, %v4022_v63  ;;  %vm1661_vm1 = vcmp.eq.s32.totalorder %v7277_v30, %v4027_v5  ;;  %v2044_v0 = vsel %vm1594_vm8, %v3660_v41, 0.0  ;;  %v2045_v6 = vsel %vm1595_vm4, %v3661_v42, 0.0 }
 0x715   :  { %v2541_v7 = vpop.xlane.xlu2 %2540  ;;  %v2110_v33 = vsel %vm1660_vm6, %v6218_v2, 0.0  ;;  %v7278_v2 = vld [vmem:[#allocation53_spill] sm:$0xff]  ;;  %vm7280_vm8 = vcmask 589312  }
 0x716   :  { %v3217_v21 = vperm.slane %v2541_v7, %v4022_v63  ;;  %v2538_v1 = vpop.xlane.xlu1 %2537  ;;  %vm1642_vm10 = vcmp.eq.s32.totalorder %v7278_v2, %v4022_v63  ;;  %vm1643_vm3 = vcmp.eq.s32.totalorder %v7278_v2, %v4027_v5 }
 0x717   :  { %v3215_v31 = vperm.slane %v2538_v1, %v5728_v47  ;;  %v2093_v61 = vsel %vm1643_vm3, %v7274_v49, 0.0  ;;  %v7283_v49 = vld [vmem:[#allocation30_spill] sm:$0xff] }
 0x718   :  { %v3219_v23 = vsel %vm2919_vm12, %v3218_v3, %v3217_v21  ;;  %v2608_v3 = vadd.f32 %v2045_v6, %v2044_v0  ;;  %v3241_v0 = vperm.slane %v6486_v10, %v5608_v24 }
 0x719   :  { %v3216_v53 = vsel %vm2975_vm7, %v3215_v31, %v3214_v52  ;;  %v2111_v52 = vsel %vm1661_vm1, %v6221_v11, 0.0  ;;  %vm1644_vm1 = vcmp.eq.s32.totalorder %v7283_v49, %v4022_v63 }
 0x71a   :  { %v6492_v9 = vsel %vm3338_vm9, %v3216_v53, %v6329_v39  ;;  %2675 = vadd.xlane.f32.xlu2 %v2674_v58  ;;  %v3224_v39 = vperm.slane %v6425_v62, %v5608_v24  ;;  %v2707_v21 = vadd.f32 %v2111_v52, %v2110_v33  ;;  %v2649_v1 = vpop.xlane.xlu0 %2648  ;;  %v2092_v58 = vsel %vm1642_vm10, %v7273_v43, 0.0  ;;  %v7282_v43 = vld [vmem:[#allocation124_spill] sm:$0xff] }
 0x71b   :  { %2633 = vadd.xlane.f32.xlu1 %v2632_v45  ;;  %v3235_v53 = vperm.slane %v6464_v44, %v5586_v57  ;;  %vm1645_vm10 = vcmp.eq.s32.totalorder %v7283_v49, %v4027_v5  ;;  %v2094_v34 = vsel %vm1644_vm1, %v3660_v41, 0.0  ;;  %vm7290_vm1 = vcmask 786112  }
 0x71d   :  { %v2550_v40 = vpop.xlane.xlu2 %2549 }
 0x71e   :  { %v2547_v13 = vpop.xlane.xlu1 %2546  ;;  %v3222_v35 = vperm.slane %v2550_v40, %v5600_v55 }
 0x71f   :  { %v3220_v56 = vperm.slane %v2547_v13, %v5597_v28  ;;  %v2680_v13 = vadd.f32 %v2093_v61, %v2092_v58 }
 0x721   :  { %v3221_v20 = vsel %vm2923_vm13, %v3220_v56, %v3219_v23 }
 0x722   :  { %v3223_v38 = vsel %vm2927_vm14, %v3222_v35, %v3221_v20  ;;  %2636 = vadd.xlane.f32.xlu2 %v7276_v8  ;;  %v2658_v56 = vpop.xlane.xlu0 %2657  ;;  %v7281_v35 = vld [vmem:[#allocation54_spill] sm:$0xff] }
 0x723   :  { %2606 = vadd.xlane.f32.xlu1 %v2605_v22  ;;  %v3225_v62 = vsel %vm2931_vm15, %v3224_v39, %v3223_v38  ;;  %vm1664_vm4 = vcmp.eq.s32.totalorder %v7281_v35, %v4022_v63  ;;  %vm1665_vm6 = vcmp.eq.s32.totalorder %v7281_v35, %v4027_v5  ;;  %v2095_v38 = vsel %vm1645_vm10, %v3661_v42, 0.0 }
 0x724   :  { %v2114_v39 = vsel %vm1664_vm4, %v6245_v60, 0.0  ;;  %v2115_v20 = vsel %vm1665_vm6, %v6248_v19, 0.0  ;;  %v2683_v5 = vadd.f32 %v2095_v38, %v2094_v34  ;;  %v3247_v38 = vperm.slane %v6509_v48, %v5638_v18 }
 0x725   :  { %v2559_v4 = vpop.xlane.xlu2 %2558  ;;  %vm7289_vm6 = vcmask 720512   ;;  %vm7291_vm10 = vcmask 851712  }
 0x726   :  { %v2556_v25 = vpop.xlane.xlu1 %2555  ;;  %v3228_v7 = vperm.slane %v2559_v4, %v5633_v16 }
 0x727   :  { %v3226_v32 = vperm.slane %v2556_v25, %v5611_v59 }
 0x729   :  { %v3227_v46 = vsel %vm2935_vm2, %v3226_v32, %v3225_v62  ;;  %v2713_v62 = vadd.f32 %v2115_v20, %v2114_v39 }
 0x72a   :  { %v3229_v31 = vsel %vm2939_vm5, %v3228_v7, %v3227_v46  ;;  %2609 = vadd.xlane.f32.xlu2 %v2608_v3  ;;  %v2661_v4 = vpop.xlane.xlu0 %2660 }
 0x72b   :  { %2708 = vadd.xlane.f32.xlu1 %v2707_v21  ;;  %v3231_v11 = vsel %vm7279_vm11, %v3230_v36, %v3229_v31  ;;  %v3285_v21 = vperm.slane %v2649_v1, %v5597_v28 }
 0x72d   :  { %v2568_v23 = vpop.xlane.xlu2 %2567 }
 0x72e   :  { %v3234_v45 = vperm.slane %v2568_v23, %v4022_v63  ;;  %v2565_v51 = vpop.xlane.xlu1 %2564 }
 0x72f   :  { %v3232_v40 = vperm.slane %v2565_v51, %v5643_v29 }
 0x730   :  { %v3236_v14 = vsel %vm2919_vm12, %v3235_v53, %v3234_v45  ;;  %v3291_v45 = vperm.slane %v2658_v56, %v5611_v59 }
 0x731   :  { %v3233_v12 = vsel %vm7280_vm8, %v3232_v40, %v3231_v11  ;;  %v3293_v40 = vperm.slane %v2661_v4, %v5633_v16 }
 0x732   :  { %v6545_v44 = vsel %vm3338_vm9, %v3233_v12, %v6385_v27  ;;  %2711 = vadd.xlane.f32.xlu2 %v7282_v43  ;;  %v2664_v32 = vpop.xlane.xlu0 %2663  ;;  %vm7284_vm9 = vmmov %vm7279_vm11 }
 0x733   :  { %2681 = vadd.xlane.f32.xlu1 %v2680_v13  ;;  %v3295_v1 = vperm.slane %v2664_v32, %v5638_v18  ;;  %vm7285_vm3 = vmmov %vm7284_vm9 }
 0x734   :  { %vm7286_vm11 = vmmov %vm7280_vm8 }
 0x735   :  { %v2577_v22 = vpop.xlane.xlu2 %2576  ;;  %vm7287_vm8 = vmmov %vm7285_vm3 }
 0x736   :  { %v2574_v8 = vpop.xlane.xlu1 %2573  ;;  %v3239_v30 = vperm.slane %v2577_v22, %v5600_v55  ;;  %vm7288_vm4 = vmmov %vm7286_vm11 }
 0x737   :  { %v3237_v27 = vperm.slane %v2574_v8, %v5597_v28 }
 0x739   :  { %v3238_v6 = vsel %vm2923_vm13, %v3237_v27, %v3236_v14 }
 0x73a   :  { %v3240_v60 = vsel %vm2927_vm14, %v3239_v30, %v3238_v6  ;;  %2714 = vadd.xlane.f32.xlu2 %v2713_v62  ;;  %v2595_v23 = vpop.xlane.xlu0 %2594 }
 0x73b   :  { %2684 = vadd.xlane.f32.xlu1 %v2683_v5  ;;  %v3242_v19 = vsel %vm2931_vm15, %v3241_v0, %v3240_v60  ;;  %v3251_v62 = vperm.slane %v2595_v23, %v5663_v26 }
 0x73d   :  { %v2586_v41 = vpop.xlane.xlu2 %2585 }
 0x73e   :  { %v2583_v42 = vpop.xlane.xlu1 %2582  ;;  %v3245_v52 = vperm.slane %v2586_v41, %v5633_v16 }
 0x73f   :  { %v3243_v33 = vperm.slane %v2583_v42, %v5611_v59 }
 0x741   :  { %v3244_v25 = vsel %vm2935_vm2, %v3243_v33, %v3242_v19 }
 0x742   :  { %v3246_v10 = vsel %vm2939_vm5, %v3245_v52, %v3244_v25  ;;  %v6584_v20 = vpop.xlane.xlu0 %2696 }
 0x743   :  { %v3248_v6 = vsel %vm7285_vm3, %v3247_v38, %v3246_v10  ;;  %vm7293_vm3 = vcmask 982912  }
 0x745   :  { %v2646_v7 = vpop.xlane.xlu2 %2645 }
 0x746   :  { %v3283_v3 = vperm.slane %v2646_v7, %v5586_v57  ;;  %v2643_v36 = vpop.xlane.xlu1 %2642 }
 0x747   :  { %v3282_v46 = vperm.slane %v2643_v36, %v4022_v63 }
 0x749   :  { %v3284_v31 = vsel %vm2919_vm12, %v3283_v3, %v3282_v46 }
 0x74a   :  { %v3286_v2 = vsel %vm2923_vm13, %v3285_v21, %v3284_v31  ;;  %v6595_v4 = vpop.xlane.xlu0 %2669 }
 0x74d   :  { %v2655_v11 = vpop.xlane.xlu2 %2654 }
 0x74e   :  { %v2652_v58 = vpop.xlane.xlu1 %2651  ;;  %v3289_v53 = vperm.slane %v2655_v11, %v5608_v24 }
 0x74f   :  { %v3287_v61 = vperm.slane %v2652_v58, %v5600_v55 }
 0x751   :  { %v3288_v51 = vsel %vm2927_vm14, %v3287_v61, %v3286_v2 }
 0x752   :  { %v3290_v14 = vsel %vm2931_vm15, %v3289_v53, %v3288_v51  ;;  %v2631_v52 = vpop.xlane.xlu0 %2630 }
 0x753   :  { %v3292_v12 = vsel %vm2935_vm2, %v3291_v45, %v3290_v14 }
 0x754   :  { %v3294_v13 = vsel %vm2939_vm5, %v3293_v40, %v3292_v12  ;;  %v3274_v40 = vperm.slane %v2631_v52, %v5611_v59 }
 0x755   :  { %v2619_v35 = vpop.xlane.xlu2 %2618  ;;  %v6580_v43 = vsel %vm7284_vm9, %v3295_v1, %v3294_v13  ;;  %vm7292_vm9 = vcmask 917312  }
 0x756   :  { %v3266_v49 = vperm.slane %v2619_v35, %v5586_v57  ;;  %v2616_v39 = vpop.xlane.xlu1 %2615 }
 0x757   :  { %v3265_v56 = vperm.slane %v2616_v39, %v4022_v63 }
 0x759   :  { %v3267_v22 = vsel %vm2919_vm12, %v3266_v49, %v3265_v56 }
 0x75a   :  { %v2604_v3 = vpop.xlane.xlu0 %2603 }
 0x75d   :  { %v2622_v34 = vpop.xlane.xlu2 %2621 }
 0x75e   :  { %v3268_v8 = vperm.slane %v2622_v34, %v5597_v28  ;;  %v2592_v27 = vpop.xlane.xlu1 %2591 }
 0x75f   :  { %v3249_v30 = vperm.slane %v2592_v27, %v5643_v29 }
 0x760   :  { %v3269_v0 = vsel %vm2923_vm13, %v3268_v8, %v3267_v22 }
 0x761   :  { %v3250_v5 = vsel %vm7286_vm11, %v3249_v30, %v3248_v6  ;;  %vm7294_vm11 = vmmov %vm7288_vm4 }
 0x762   :  { %v3252_v60 = vsel %vm2951_vm0, %v3251_v62, %v3250_v5  ;;  %v6601_v46 = vpop.xlane.xlu0 %2705  ;;  %v3257_v62 = vperm.slane %v2604_v3, %v5695_v17 }
 0x765   :  { %v2694_v19 = vpop.xlane.xlu2 %2693 }
 0x766   :  { %v3314_v48 = vperm.slane %v2694_v19, %v5586_v57  ;;  %v2691_v41 = vpop.xlane.xlu1 %2690 }
 0x767   :  { %v3313_v42 = vperm.slane %v2691_v41, %v4022_v63 }
 0x769   :  { %v3315_v33 = vsel %vm2919_vm12, %v3314_v48, %v3313_v42  ;;  %vm3340_vm12 = vcmask 1046534  }
 0x76a   :  { %v6603_v11 = vpop.xlane.xlu0 %2678 }
 0x76d   :  { %v2667_v25 = vpop.xlane.xlu2 %2666 }
 0x76e   :  { %v2625_v32 = vpop.xlane.xlu1 %2624 }
 0x76f   :  { %v3270_v23 = vperm.slane %v2625_v32, %v5600_v55  ;;  %v3297_v32 = vperm.slane %v2667_v25, %v5643_v29 }
 0x771   :  { %v3271_v53 = vsel %vm2927_vm14, %v3270_v23, %v3269_v0 }
 0x772   :  { %v2640_v61 = vpop.xlane.xlu0 %2639 }
 0x773   :  { %v3280_v49 = vperm.slane %v2640_v61, %v5643_v29  ;;  %v3299_v61 = vperm.slane %v6595_v4, %v5663_v26 }
 0x775   :  { %v2628_v7 = vpop.xlane.xlu2 %2627 }
 0x776   :  { %v2598_v10 = vpop.xlane.xlu1 %2597  ;;  %v3272_v58 = vperm.slane %v2628_v7, %v5608_v24 }
 0x777   :  { %v3253_v1 = vperm.slane %v2598_v10, %v5675_v37  ;;  %v3316_v10 = vperm.slane %v6584_v20, %v5597_v28 }
 0x778   :  { %v3273_v45 = vsel %vm2931_vm15, %v3272_v58, %v3271_v53 }
 0x779   :  { %v3275_v12 = vsel %vm2935_vm2, %v3274_v40, %v3273_v45  ;;  %v3254_v38 = vsel %vm7289_vm6, %v3253_v1, %v3252_v60 }
 0x77a   :  { %v2613_v0 = vpop.xlane.xlu0 %2612 }
 0x77b   :  { %v3263_v41 = vperm.slane %v2613_v0, %v5728_v47 }
 0x77d   :  { %v2601_v36 = vpop.xlane.xlu2 %2600 }
 0x77e   :  { %v2700_v21 = vpop.xlane.xlu1 %2699  ;;  %v3255_v39 = vperm.slane %v2601_v36, %v5666_v54 }
 0x77f   :  { %v3318_v7 = vperm.slane %v2700_v21, %v5600_v55 }
 0x780   :  { %v3256_v27 = vsel %vm7290_vm1, %v3255_v39, %v3254_v38 }
 0x781   :  { %v3258_v5 = vsel %vm7291_vm10, %v3257_v62, %v3256_v27 }
 0x785   :  { %v2703_v31 = vpop.xlane.xlu2 %2702 }
 0x786   :  { %v2673_v2 = vpop.xlane.xlu1 %2672  ;;  %v3320_v36 = vperm.slane %v2703_v31, %v5608_v24 }
 0x787   :  { %v3301_v58 = vperm.slane %v2673_v2, %v5675_v37 }
 0x78d   :  { %v2676_v57 = vpop.xlane.xlu2 %2675 }
 0x78e   :  { %v2634_v63 = vpop.xlane.xlu1 %2633  ;;  %v3303_v25 = vperm.slane %v2676_v57, %v5666_v54  ;;  %v3305_v54 = vperm.slane %v6603_v11, %v5695_v17 }
 0x78f   :  { %v3276_v51 = vperm.slane %v2634_v63, %v5633_v16  ;;  %v3298_v63 = vsel %vm7294_vm11, %v3297_v32, %v6580_v43  ;;  %v3322_v43 = vperm.slane %v6601_v46, %v5611_v59 }
 0x790   :  { %v3300_v28 = vsel %vm2951_vm0, %v3299_v61, %v3298_v63  ;;  %vm3353_vm0 = vcmask 588800  }
 0x791   :  { %v3277_v56 = vsel %vm2939_vm5, %v3276_v51, %v3275_v12 }
 0x795   :  { %v2637_v14 = vpop.xlane.xlu2 %2636 }
 0x796   :  { %v3278_v13 = vperm.slane %v2637_v14, %v5638_v18  ;;  %v2607_v35 = vpop.xlane.xlu1 %2606 }
 0x797   :  { %v3259_v30 = vperm.slane %v2607_v35, %v5701_v50 }
 0x798   :  { %v3279_v22 = vsel %vm7287_vm8, %v3278_v13, %v3277_v56  ;;  %vm7296_vm8 = vmmov %vm7290_vm1  ;;  %vm3380_vm1 = vcmask 7168  }
 0x799   :  { %v3281_v34 = vsel %vm7288_vm4, %v3280_v49, %v3279_v22  ;;  %v3260_v60 = vsel %vm7292_vm9, %v3259_v30, %v3258_v5  ;;  %vm7299_vm4 = vmmov %vm7292_vm9 }
 0x79a   :  { %v3349_v8 = vsel %vm3340_vm12, %v3281_v34, %v6545_v44 }
 0x79d   :  { %v2610_v6 = vpop.xlane.xlu2 %2609 }
 0x79e   :  { %v3261_v19 = vperm.slane %v2610_v6, %v5698_v15  ;;  %v2709_v48 = vpop.xlane.xlu1 %2708 }
 0x79f   :  { %v3324_v24 = vperm.slane %v2709_v48, %v5633_v16 }
 0x7a0   :  { %v3262_v42 = vsel %vm7293_vm3, %v3261_v19, %v3260_v60 }
 0x7a1   :  { %v3264_v44 = vsel %vm2975_vm7, %v3263_v41, %v3262_v42 }
 0x7a2   :  { %v3341_v52 = vsel %vm3340_vm12, %v3264_v44, %v6492_v9  ;;  %v3317_v9 = vsel %vm2923_vm13, %v3316_v10, %v3315_v33  ;;  %vm7295_vm12 = vmmov %vm7289_vm6  ;;  %v2688_v33 = vpop.xlane.xlu0 %2687  ;;  %vm3342_vm13 = vcmask 1047559  }
 0x7a3   :  { %v3319_v55 = vsel %vm2927_vm14, %v3318_v7, %v3317_v9  ;;  %v3302_v37 = vsel %vm7295_vm12, %v3301_v58, %v3300_v28  ;;  %vm7297_vm14 = vcmask 523712   ;;  %vm7300_vm6 = vmmov %vm7294_vm11 }
 0x7a4   :  { %v3321_v21 = vsel %vm2931_vm15, %v3320_v36, %v3319_v55  ;;  %v3304_v26 = vsel %vm7296_vm8, %v3303_v25, %v3302_v37  ;;  %vm7298_vm15 = vmmov %vm7291_vm10 }
 0x7a5   :  { %v2712_v3 = vpop.xlane.xlu2 %2711  ;;  %v3323_v31 = vsel %vm2935_vm2, %v3322_v43, %v3321_v21  ;;  %vm7301_vm2 = vmmov %vm7293_vm3 }
 0x7a6   :  { %v2682_v23 = vpop.xlane.xlu1 %2681  ;;  %v3326_v20 = vperm.slane %v2712_v3, %v5638_v18  ;;  %v3325_v16 = vsel %vm2939_vm5, %v3324_v24, %v3323_v31  ;;  %v3306_v18 = vsel %vm7298_vm15, %v3305_v54, %v3304_v26 }
 0x7a7   :  { %v3307_v4 = vperm.slane %v2682_v23, %v5701_v50  ;;  %v3311_v50 = vperm.slane %v2688_v33, %v5728_v47 }
 0x7a8   :  { %v3327_v46 = vsel %vm7297_vm14, %v3326_v20, %v3325_v16 }
 0x7a9   :  { %v3308_v17 = vsel %vm7299_vm4, %v3307_v4, %v3306_v18 }
 0x7ad   :  { %v2715_v2 = vpop.xlane.xlu2 %2714 }
 0x7ae   :  { %v3328_v57 = vperm.slane %v2715_v2, %v5643_v29  ;;  %v2685_v59 = vpop.xlane.xlu1 %2684 }
 0x7af   :  { %v3309_v53 = vperm.slane %v2685_v59, %v5698_v15  ;;  %v3359_v15 = vstv %s6676_s2 }
 0x7b0   :  { %v3329_v11 = vsel %vm7300_vm6, %v3328_v57, %v3327_v46 }
 0x7b1   :  { %v3310_v45 = vsel %vm7301_vm2, %v3309_v53, %v3308_v17  ;;  %v3350_v51 = vsel %vm3342_vm13, %v3329_v11, %v3349_v8 }
 0x7b2   :  { %v3312_v29 = vsel %vm2975_vm7, %v3311_v50, %v3310_v45  ;;  %v3354_v40 = vsel %vm3353_vm0, %v3350_v51, 0.0 }
 0x7b3   :  { %v3343_v14 = vsel %vm3342_vm13, %v3312_v29, %v3341_v52 }
 0x7b4   :  { %v3355_v1 = vadd.f32 %v3354_v40, %v3343_v14 }
 0x7b6   :  { %3356 = vadd.xlane.f32.xlu1 %v3355_v1 }
 0x829   :  { %v3357_v12 = vpop.xlane.xlu1 %3356 }
 0x82a   :  { %v3360_v13 = vadd.f32 %v3359_v15, %v3357_v12 }
 0x82c   :  { %v3388_v47 = vmul.f32 -1.442695, %v3360_v13 }
 0x82e   :  { %3560 = vpow2.f32 %v3388_v47 }
 0x834   :  { %v3561_v35 = vpop.eup %3560 }
 0x835   :  { %v3364_v49 = vadd.f32 1.0, %v3561_v35 }
 0x837   :  { %3562 = vrcp.f32 %v3364_v49  ;;  %v3376_v34 = vand.u32 2147483648, %v3364_v49  ;;  %v3374_v8 = vand.u32 2147483647, %v3364_v49  ;;  %vm3370_vm7 = vweird.f32 %v3364_v49 }
 0x839   :  { %v3377_v30 = vor.u32 1.1754944e-38, %v3376_v34  ;;  %vm3375_vm9 = vcmp.eq.f32.partialorder %v3374_v8, 8.507059e+37 }
 0x83d   :  { %v3563_v39 = vpop.eup %3562 }
 0x83e   :  { %v3366_v56 = vmul.f32 %v3563_v39, %v3364_v49  ;;  %vm3371_vm5 = vweird.f32 %v3563_v39 }
 0x83f   :  { %vm3372_vm10 = vmor %vm3370_vm7, %vm3371_vm5 }
 0x840   :  { %v3367_v22 = vsub.f32 1.0, %v3366_v56 }
 0x842   :  { %v3368_v38 = vmul.f32 %v3563_v39, %v3367_v22 }
 0x844   :  { %v3369_v27 = vadd.f32 %v3563_v39, %v3368_v38 }
 0x846   :  { %v3373_v62 = vsel %vm3372_vm10, %v3563_v39, %v3369_v27 }
 0x847   :  { %v3378_v0 = vsel %vm3375_vm9, %v3377_v30, %v3373_v62 }
 0x848   :  { %3381 = vst.msk [vmem:[%s6677_s3] sm:$0xff] %vm3380_vm1, %v3378_v0 }
 0x849   :  { %3386 = vsyncpa [#allocation4], 1 }
 0x84a   :  { %3387 = vsyncpa [#allocation6], 1 }

</bundles_post_ra>
